<compile_context>
chip_gen: v5e
topology: v5e:2x2
jax: 0.10.0
libtpu: 0.0.40
codegen_flags: <defaults>
</compile_context>

<pallas_src>
import jax
import jax.numpy as jnp
from jax.experimental import pallas as pl
from jax.experimental.pallas import tpu as pltpu

OUT_PAD = 128  # final layer lane-padded to a full 128-lane slab


def mlp_kernel(x_ref, w1_ref, b1_ref, w2_ref, b2_ref, w3_ref, b3_ref, out_ref):
    # Layer 1: Linear(784 -> 512) + ReLU.  bf16 operands, f32 MXU accumulation,
    # bias-add + ReLU in f32 on the VPU.
    h = jnp.dot(x_ref[...], w1_ref[...], preferred_element_type=jnp.float32)
    h = jnp.maximum(h + b1_ref[...], 0.0).astype(jnp.bfloat16)
    # Layer 2: Linear(512 -> 512) + ReLU.
    h = jnp.dot(h, w2_ref[...], preferred_element_type=jnp.float32)
    h = jnp.maximum(h + b2_ref[...], 0.0).astype(jnp.bfloat16)
    # Layer 3: Linear(512 -> 10) + ReLU (the module's Sequential ends in ReLU).
    # w3/b3 are zero-padded to 128 lanes -> dense output store, full MXU column.
    h = jnp.dot(h, w3_ref[...], preferred_element_type=jnp.float32)
    h = jnp.maximum(h + b3_ref[...], 0.0)
    out_ref[...] = h.astype(out_ref.dtype)


def prepare_params(params):
    """One-time prep: bf16 weights, f32 biases, lane-pad last layer to 128."""
    n_out = params["w3"].shape[1]
    w3 = jnp.zeros((params["w3"].shape[0], OUT_PAD), jnp.bfloat16)
    w3 = w3.at[:, :n_out].set(params["w3"].astype(jnp.bfloat16))
    b3 = jnp.zeros((1, OUT_PAD), jnp.float32)
    b3 = b3.at[:, :n_out].set(params["b3"].astype(jnp.float32))
    return dict(
        w1=params["w1"].astype(jnp.bfloat16), b1=params["b1"].astype(jnp.float32),
        w2=params["w2"].astype(jnp.bfloat16), b2=params["b2"].astype(jnp.float32),
        w3=w3, b3=b3, n_out=n_out)


def neural_network_forward(x_nchw, params, *, tile_m=256):
    """Forward pass of the PyTorch NeuralNetwork module.

    x_nchw: (N, 1, 28, 28) float32
    params: output of prepare_params()
    returns logits: (N, 10) float32
    """
    n = x_nchw.shape[0]
    # nn.Flatten(): flatten all dims except batch; cast activations to bf16.
    x = x_nchw.reshape(n, -1).astype(jnp.bfloat16)          # (N, 784)
    d_in = x.shape[1]

    # Batch tile: MXU-aligned (256) for large batches, otherwise the smallest
    # multiple of 8 covering the batch.  Pad N up to a multiple of the tile.
    tm = min(tile_m, max(8, ((n + 7) // 8) * 8))
    n_pad = pl.cdiv(n, tm) * tm
    if n_pad != n:
        x = jnp.pad(x, ((0, n_pad - n), (0, 0)))

    w1, b1 = params["w1"], params["b1"]
    w2, b2 = params["w2"], params["b2"]
    w3, b3 = params["w3"], params["b3"]
    n_out = params["n_out"]

    # Weights/biases: constant block index -> fetched once, VMEM-resident
    # across all grid steps (no re-DMA).
    resident = lambda shape: pl.BlockSpec(shape, lambda i: (0, 0))

    d1, d2 = w1.shape[1], w2.shape[1]
    flops = 2 * n_pad * (d_in * d1 + d1 * d2 + d2 * OUT_PAD)
    bytes_accessed = (x.size * 2 + (w1.size + w2.size + w3.size) * 2
                      + (b1.size + b2.size + b3.size) * 4
                      + n_pad * OUT_PAD * 4)

    out = pl.pallas_call(
        mlp_kernel,
        out_shape=jax.ShapeDtypeStruct((n_pad, OUT_PAD), jnp.float32),
        grid=(n_pad // tm,),
        in_specs=[
            pl.BlockSpec((tm, d_in), lambda i: (i, 0)),   # x: tiled over batch
            resident(w1.shape), resident(b1.shape),
            resident(w2.shape), resident(b2.shape),
            resident(w3.shape), resident(b3.shape),
        ],
        out_specs=pl.BlockSpec((tm, OUT_PAD), lambda i: (i, 0)),
        compiler_params=pltpu.CompilerParams(
            dimension_semantics=("parallel",),   # shard batch across TCs (v7x)
            vmem_limit_bytes=32 << 20,           # real footprint is a few MiB
        ),
        cost_estimate=pl.CostEstimate(
            flops=flops, transcendentals=0, bytes_accessed=bytes_accessed),
    )(x, w1, b1, w2, b2, w3, b3)
    return out[:n, :n_out]


def init_params(key):
    """Deterministic init matching the module's layer shapes.

    torch.nn.Linear(in, out) has weight (out, in); we store the transpose
    (in, out) so the kernel does x @ W + b.  Uniform(-1/sqrt(in), 1/sqrt(in))
    mirrors PyTorch's default Linear init.
    """
    dims = [(28 * 28, 512), (512, 512), (512, 10)]
    params = {}
    for i, (fin, fout) in enumerate(dims, start=1):
        key, kw, kb = jax.random.split(key, 3)
        bound = 1.0 / (fin ** 0.5)
        params[f"w{i}"] = jax.random.uniform(
            kw, (fin, fout), jnp.float32, minval=-bound, maxval=bound)
        params[f"b{i}"] = jax.random.uniform(
            kb, (1, fout), jnp.float32, minval=-bound, maxval=bound)
    return params


if __name__ == "__main__":
    key = jax.random.PRNGKey(0)
    key, kx = jax.random.split(key)

    params = prepare_params(init_params(key))

    # Small MNIST-shaped batch, NCHW like PyTorch.  N=200 with tile_m=128
    # exercises the multi-step grid and the batch-padding path (200 -> 256).
    n = 200
    x = jax.random.normal(kx, (n, 1, 28, 28), jnp.float32)

    logits = neural_network_forward(x, params, tile_m=128)
    jax.block_until_ready(logits)

    # Pure-JAX reference using the same bf16-operand / f32-accumulate numerics.
    xf = x.reshape(n, -1).astype(jnp.bfloat16)
    lin = lambda h, w, b: jnp.dot(h, w, preferred_element_type=jnp.float32) + b
    ref = jnp.maximum(lin(xf, params["w1"], params["b1"]), 0.0).astype(jnp.bfloat16)
    ref = jnp.maximum(lin(ref, params["w2"], params["b2"]), 0.0).astype(jnp.bfloat16)
    ref = jnp.maximum(lin(ref, params["w3"], params["b3"]), 0.0)[:, :params["n_out"]]

    assert logits.shape == (n, 10)
    assert jnp.allclose(logits, ref, atol=5e-2, rtol=5e-2), \
        float(jnp.max(jnp.abs(logits - ref)))

    print("KERNEL_OK")
</pallas_src>

<mosaic_0001>
module attributes {stable_mosaic.version = 11 : i64} {
  func.func @mlp_kernel(%arg0: i32, %arg1: memref<128x784xbf16, #tpu.memory_space<vmem>>, %arg2: memref<784x512xbf16, #tpu.memory_space<vmem>>, %arg3: memref<1x512xf32, #tpu.memory_space<vmem>>, %arg4: memref<512x512xbf16, #tpu.memory_space<vmem>>, %arg5: memref<1x512xf32, #tpu.memory_space<vmem>>, %arg6: memref<512x128xbf16, #tpu.memory_space<vmem>>, %arg7: memref<1x128xf32, #tpu.memory_space<vmem>>, %arg8: memref<128x128xf32, #tpu.memory_space<vmem>>) attributes {dimension_semantics = [#tpu.dimension_semantics<parallel>], iteration_bounds = array<i64: 2>, scalar_prefetch = 0 : i64, scratch_operands = 0 : i64, tpu.core_type = #tpu.core_type<tc>, window_params = [{transform_indices = @transform_0, window_bounds = array<i64: 128, 784>}, {pipeline_mode = #tpu.pipeline_mode<synchronous>, transform_indices = @transform_1, window_bounds = array<i64: 784, 512>}, {pipeline_mode = #tpu.pipeline_mode<synchronous>, transform_indices = @transform_2, window_bounds = array<i64: 1, 512>}, {pipeline_mode = #tpu.pipeline_mode<synchronous>, transform_indices = @transform_3, window_bounds = array<i64: 512, 512>}, {pipeline_mode = #tpu.pipeline_mode<synchronous>, transform_indices = @transform_4, window_bounds = array<i64: 1, 512>}, {pipeline_mode = #tpu.pipeline_mode<synchronous>, transform_indices = @transform_5, window_bounds = array<i64: 512, 128>}, {pipeline_mode = #tpu.pipeline_mode<synchronous>, transform_indices = @transform_6, window_bounds = array<i64: 1, 128>}, {transform_indices = @transform_7, window_bounds = array<i64: 128, 128>}]} {
    %c0 = arith.constant 0 : index
    %c0_0 = arith.constant 0 : index
    %0 = vector.load %arg1[%c0, %c0_0] : memref<128x784xbf16, #tpu.memory_space<vmem>>, vector<128x784xbf16>
    %c0_1 = arith.constant 0 : index
    %c0_2 = arith.constant 0 : index
    %1 = vector.load %arg2[%c0_1, %c0_2] : memref<784x512xbf16, #tpu.memory_space<vmem>>, vector<784x512xbf16>
    %cst = arith.constant dense<0.000000e+00> : vector<128x512xf32>
    %2 = tpu.matmul %0, %1, %cst {dimension_numbers = #tpu.dot_dimension_numbers<[1], [0], [0], [1], [0, 0, 1, 1], [], []>} : vector<128x784xbf16>, vector<784x512xbf16>, vector<128x512xf32> -> vector<128x512xf32>
    %c0_3 = arith.constant 0 : index
    %c0_4 = arith.constant 0 : index
    %3 = vector.load %arg3[%c0_3, %c0_4] : memref<1x512xf32, #tpu.memory_space<vmem>>, vector<1x512xf32>
    %4 = vector.broadcast %3 : vector<1x512xf32> to vector<128x512xf32>
    %5 = arith.addf %2, %4 : vector<128x512xf32>
    %cst_5 = arith.constant 0.000000e+00 : f32
    %6 = vector.broadcast %cst_5 : f32 to vector<128x512xf32>
    %7 = arith.maximumf %5, %6 : vector<128x512xf32>
    %8 = arith.truncf %7 : vector<128x512xf32> to vector<128x512xbf16>
    %c0_6 = arith.constant 0 : index
    %c0_7 = arith.constant 0 : index
    %9 = vector.load %arg4[%c0_6, %c0_7] : memref<512x512xbf16, #tpu.memory_space<vmem>>, vector<512x512xbf16>
    %cst_8 = arith.constant dense<0.000000e+00> : vector<128x512xf32>
    %10 = tpu.matmul %8, %9, %cst_8 {dimension_numbers = #tpu.dot_dimension_numbers<[1], [0], [0], [1], [0, 0, 1, 1], [], []>} : vector<128x512xbf16>, vector<512x512xbf16>, vector<128x512xf32> -> vector<128x512xf32>
    %c0_9 = arith.constant 0 : index
    %c0_10 = arith.constant 0 : index
    %11 = vector.load %arg5[%c0_9, %c0_10] : memref<1x512xf32, #tpu.memory_space<vmem>>, vector<1x512xf32>
    %12 = vector.broadcast %11 : vector<1x512xf32> to vector<128x512xf32>
    %13 = arith.addf %10, %12 : vector<128x512xf32>
    %cst_11 = arith.constant 0.000000e+00 : f32
    %14 = vector.broadcast %cst_11 : f32 to vector<128x512xf32>
    %15 = arith.maximumf %13, %14 : vector<128x512xf32>
    %16 = arith.truncf %15 : vector<128x512xf32> to vector<128x512xbf16>
    %c0_12 = arith.constant 0 : index
    %c0_13 = arith.constant 0 : index
    %17 = vector.load %arg6[%c0_12, %c0_13] : memref<512x128xbf16, #tpu.memory_space<vmem>>, vector<512x128xbf16>
    %cst_14 = arith.constant dense<0.000000e+00> : vector<128x128xf32>
    %18 = tpu.matmul %16, %17, %cst_14 {dimension_numbers = #tpu.dot_dimension_numbers<[1], [0], [0], [1], [0, 0, 1, 1], [], []>} : vector<128x512xbf16>, vector<512x128xbf16>, vector<128x128xf32> -> vector<128x128xf32>
    %c0_15 = arith.constant 0 : index
    %c0_16 = arith.constant 0 : index
    %19 = vector.load %arg7[%c0_15, %c0_16] : memref<1x128xf32, #tpu.memory_space<vmem>>, vector<1x128xf32>
    %20 = vector.broadcast %19 : vector<1x128xf32> to vector<128x128xf32>
    %21 = arith.addf %18, %20 : vector<128x128xf32>
    %cst_17 = arith.constant 0.000000e+00 : f32
    %22 = vector.broadcast %cst_17 : f32 to vector<128x128xf32>
    %23 = arith.maximumf %21, %22 : vector<128x128xf32>
    %c0_18 = arith.constant 0 : index
    %c0_19 = arith.constant 0 : index
    %24 = vector.load %arg8[%c0_18, %c0_19] : memref<128x128xf32, #tpu.memory_space<vmem>>, vector<128x128xf32>
    tpu.vector_store %arg8[%c0_18, %c0_19], %23 {strides = array<i32>} : memref<128x128xf32, #tpu.memory_space<vmem>>, vector<128x128xf32>,
    return
  }
  func.func @transform_0(%arg0: i32) -> (i32, i32) {
    %c0_i32 = arith.constant 0 : i32
    %c0_i32_0 = arith.constant 0 : i32
    return %arg0, %c0_i32 : i32, i32
  }
  func.func @transform_1(%arg0: i32) -> (i32, i32) {
    %c0_i32 = arith.constant 0 : i32
    %c0_i32_0 = arith.constant 0 : i32
    %c0_i32_1 = arith.constant 0 : i32
    return %c0_i32, %c0_i32_0 : i32, i32
  }
  func.func @transform_2(%arg0: i32) -> (i32, i32) {
    %c0_i32 = arith.constant 0 : i32
    %c0_i32_0 = arith.constant 0 : i32
    %c0_i32_1 = arith.constant 0 : i32
    return %c0_i32, %c0_i32_0 : i32, i32
  }
  func.func @transform_3(%arg0: i32) -> (i32, i32) {
    %c0_i32 = arith.constant 0 : i32
    %c0_i32_0 = arith.constant 0 : i32
    %c0_i32_1 = arith.constant 0 : i32
    return %c0_i32, %c0_i32_0 : i32, i32
  }
  func.func @transform_4(%arg0: i32) -> (i32, i32) {
    %c0_i32 = arith.constant 0 : i32
    %c0_i32_0 = arith.constant 0 : i32
    %c0_i32_1 = arith.constant 0 : i32
    return %c0_i32, %c0_i32_0 : i32, i32
  }
  func.func @transform_5(%arg0: i32) -> (i32, i32) {
    %c0_i32 = arith.constant 0 : i32
    %c0_i32_0 = arith.constant 0 : i32
    %c0_i32_1 = arith.constant 0 : i32
    return %c0_i32, %c0_i32_0 : i32, i32
  }
  func.func @transform_6(%arg0: i32) -> (i32, i32) {
    %c0_i32 = arith.constant 0 : i32
    %c0_i32_0 = arith.constant 0 : i32
    %c0_i32_1 = arith.constant 0 : i32
    return %c0_i32, %c0_i32_0 : i32, i32
  }
  func.func @transform_7(%arg0: i32) -> (i32, i32) {
    %c0_i32 = arith.constant 0 : i32
    %c0_i32_0 = arith.constant 0 : i32
    return %arg0, %c0_i32 : i32, i32
  }
}

</mosaic_0001>

<bundles_post_ra>
// kernel: tpu_custom_call.1
= control target key start
LH: loop header
LB: loop body
LE: loop exit
PB: predicated region body
PF: predicated region fallthrough
CT: control target
= control target key end

     0   :  { %12 = vsyncpa [#allocation3], 0  ;;  %s10506_s0 = inlined_call_operand.vmem [shape: bf16[256,784], index: 0, kind: input, shape index: {}]   ;;  %s10507_s1 = inlined_call_operand.vmem [shape: bf16[784,512], index: 1, kind: input, shape index: {}]   ;;  %s10508_s2 = inlined_call_operand.vmem [shape: f32[1,512], index: 2, kind: input, shape index: {}]   ;;  %s10509_s3 = inlined_call_operand.hbm [shape: bf16[512,512], index: 3, kind: input, shape index: {}]   ;;  %s10510_s4 = inlined_call_operand.vmem [shape: f32[1,512], index: 4, kind: input, shape index: {}]   ;;  %s10511_s5 = inlined_call_operand.hbm [shape: bf16[512,128], index: 5, kind: input, shape index: {}]   ;;  %s10512_s6 = inlined_call_operand.vmem [shape: f32[1,128], index: 6, kind: input, shape index: {}]   ;;  %s10513_s7 = inlined_call_operand.hbm [shape: f32[256,128], index: 7, kind: output, shape index: {}]  }
   0x1   :  { %13 = vsyncpa [#allocation6], 0 }
   0x2   :  { %14 = vsyncpa [#allocation4], 0 }
   0x3   :  { %16 = vsyncpa [#allocation4 + $0x1], 0  ;;  %s7947_s24 = smov 0   ;;  %s7949_s25 = smov 0  }
   0x4   :  { %s7951_s26 = smov 0   ;;  %s7953_s27 = smov 0  }
   0x5 LB: > { %s7968_s28 = sadd.s32 4294967295, %s7897_s27   ;;  %s5587_s29 = sadd.s32 4294967294, %s7897_s27   ;;  %s7897_s27 = sphi %s7953_s27, %s10743_s27   ;;  %s7893_s26 = sphi %s7951_s26, %s10742_s26   ;;  %s7889_s25 = sphi %s7949_s25, %s10741_s25   ;;  %s7885_s24 = sphi %s7947_s24, %s10740_s24  }
   0x6   : > { %s7972_s30 = sadd.s32 1, %s7897_s27   ;;  %s181_s8 = sadd.s32 1, %s7893_s26 }
   0x7   : > { %s178_s9 = ssub.s32 %s7897_s27, %s7972_s30  ;;  %p191_p0 = scmp.ne.s32.totalorder %s7893_s26, %s7889_s25 }
   0x8   : > { %p179_p1 = scmp.eq.s32.totalorder %s178_s9, 0  ;;  %p192_p2 = scmp.eq.s32.totalorder %s7968_s28, 1 }
   0x9   : > { %p197_p3 = scmp.ne.s32.totalorder %s7889_s25, %s7885_s24  ;;  %p198_p4 = scmp.eq.s32.totalorder %s5587_s29, 1 }
   0xa   : > { %s7983_s10 = scalar_select %p179_p1, %s7893_s26, %s181_s8  }
   0xb   : > { %p7985_p5 = por %p192_p2, %p191_p0  ;;  %p7989_p6 = por %p198_p4, %p197_p3 }
   0xc   : > { %p5588_p7 = scmp.ge.s32.totalorder %s7897_s27, 1  ;;  %p205_p8 = scmp.lt.s32.totalorder %s7897_s27, 3 }
   0xd   : > { %p7718_p9 = scmp.eq.s32.totalorder %s7968_s28, 0  ;;  %s222_s16 = sshll.u32 %s10509_s3, 4  ;;  %s223_s16 = int_to_ptr.hbm [resolvable:$true] %s222_s16 }
   0xe   : > { %p7996_p10 = pnand %p5588_p7, %p205_p8  ;;  %s7899_s17 = smov [#allocation2]  }
   0xf   : > { %s224_s18 = sshll.u32 %s7899_s17, 4  ;;  %s239_s21 = sshll.u32 %s10511_s5, 4  ;;  %s225_s18 = int_to_ptr.vmem [resolvable:$true] %s224_s18  ;;  %s240_s21 = int_to_ptr.hbm [resolvable:$true] %s239_s21 }
  0x10   : > { %p7707_p11 = pneg %p7996_p10  ;;  %s7900_s22 = smov 256  }
  0x11   : > { %s7901_s23 = smov 16   ;;  %s7902_s29 = smov [#allocation5]  }
  0x12   : > { %p7708_p12 = pnand %p7718_p9, %p7707_p11  ;;  %s241_s8 = sshll.u32 %s7902_s29, 4  ;;  %s242_s8 = int_to_ptr.vmem [resolvable:$true] %s241_s8 }
  0x13   : > { %s7903_s9 = smov 64   ;;  %s7904_s14 = smov 4  }
  0x14   : > { %7710 = dma.hbm_to_vmem [thread:$0]  (!%p7708_p12), %s223_s16, 16384, %s225_s18, [#allocation3], %s7900_s22, %s7900_s22, %s7901_s23  }
  0x15   : > { %7713 = dma.hbm_to_vmem [thread:$0]  (!%p7708_p12), %s240_s21, 4096, %s242_s8, [#allocation6], %s7903_s9, %s7903_s9, %s7904_s14  }
  0x16   : > { %270 = sbr.rel (%p7996_p10) target bundleno = 1773 (0x6ed), region = 48 }
  0x1b   : > { %7872 = dma.done.wait (%p7718_p9), [#allocation3], 16384  }
  0x1c   : > { %7874 = vsyncadd (%p7718_p9), [#allocation3], 4294950912 }
  0x1d   : > { %7876 = dma.done.wait (%p7718_p9), [#allocation6], 4096  }
  0x1e   : > { %7878 = vsyncadd (%p7718_p9), [#allocation6], 4294963200  ;;  %s5596_s15 = sshll.u32 %s7968_s28, 4  ;;  %v5936_v0 = vld [vmem:[%s10507_s1 + $0xe0] sm:$0xf]  ;;  %vm1848_vm0 = vcmask 130048  }
  0x1f   : > { %v7369_v1 = vld [vmem:[%s10507_s1 + $0xec] sm:$0xf0]  ;;  %v6064_v2 = vld [vmem:[%s10507_s1 + $0x1e0] sm:$0xf]  ;;  %p8119_p13 = scmp.lt.s32.totalorder %s5596_s15, 31  ;;  %s306_s18 = sand.u32 1, %s7889_s25  }
  0x20   : > { %v5937_v3 = vor.u32 %v7369_v1, %v5936_v0  ;;  %v7401_v4 = vld [vmem:[%s10507_s1 + $0x1ec] sm:$0xf0]  ;;  %v6192_v5 = vld [vmem:[%s10507_s1 + $0x2e0] sm:$0xf]  ;;  %s5595_s19 = sshll.u32 %s306_s18, 7  ;;  %s7695_s21 = sshll.u32 %s7968_s28, 7 }
  0x21   : > { %v7433_v6 = vld [vmem:[%s10507_s1 + $0x2ec] sm:$0xf0]  ;;  %v6065_v7 = vor.u32 %v7401_v4, %v6064_v2  ;;  %v6320_v9 = vld [vmem:[%s10507_s1 + $0x3e0] sm:$0xf]  ;;  %s10745_s15 = smov (!%p8119_p13, %s5596_s15), 31  ;;  %s10440_s20 = scalar_lea.vmem [#allocation7], %s5595_s19 }
  0x22   : > { %v6193_v8 = vor.u32 %v7433_v6, %v6192_v5  ;;  %v7465_v10 = vld [vmem:[%s10507_s1 + $0x3ec] sm:$0xf0]  ;;  %v5920_v11 = vld [vmem:[%s10507_s1 + $0xc0] sm:$0xf]  ;;  %1873 = vmatpush.bf16.msra.mxu0 %v5937_v3  ;;  %s7696_s22 = smul.u32 28, %s10745_s15  ;;  %s5499_s29 = scalar_lea.hbm %s10513_s7, %s7695_s21 }
  0x23   : > { %v6321_v12 = vor.u32 %v7465_v10, %v6320_v9  ;;  %v7365_v13 = vld [vmem:[%s10507_s1 + $0xcc] sm:$0xf0]  ;;  %v6048_v14 = vld [vmem:[%s10507_s1 + $0x1c0] sm:$0xf]  ;;  %1922 = vmatpush.bf16.msra.mxu1 %v6065_v7  ;;  %s5500_s14 = sshll.u32 %s10440_s20, 4  ;;  %s5502_s8 = sshll.u32 %s5499_s29, 4  ;;  %s5501_s14 = int_to_ptr.vmem [resolvable:$true] %s5500_s14  ;;  %s5503_s8 = int_to_ptr.hbm [resolvable:$true] %s5502_s8 }
  0x24   : > { %v7397_v15 = vld [vmem:[%s10507_s1 + $0x1cc] sm:$0xf0]  ;;  %1971 = vmatpush.bf16.msra.mxu2 %v6193_v8  ;;  %v5921_v16 = vor.u32 %v7365_v13, %v5920_v11  ;;  %v6176_v18 = vld [vmem:[%s10507_s1 + $0x2c0] sm:$0xf]  ;;  %s8208_s17 = scalar_lea.vmem %s10506_s0, %s7696_s22  ;;  %s5488_s28 = scalar_lea.sflag [#allocation4], %s306_s18 }
  0x25   : > { %v6049_v17 = vor.u32 %v7397_v15, %v6048_v14  ;;  %v7429_v19 = vld [vmem:[%s10507_s1 + $0x2cc] sm:$0xf0]  ;;  %v6304_v20 = vld [vmem:[%s10507_s1 + $0x3c0] sm:$0xf]  ;;  %2020 = vmatpush.bf16.msra.mxu3 %v6321_v12  ;;  %s7841_s9 = sshra.s32 %s5503_s8, 4  ;;  %s7847_s13 = scalar_lea.hbm %s10513_s7, 256  ;;  %s7842_s9 = int_to_ptr.hbm [resolvable:$true] %s7841_s9 }
  0x26   : > { %v6177_v21 = vor.u32 %v7429_v19, %v6176_v18  ;;  %v7461_v22 = vld [vmem:[%s10507_s1 + $0x3cc] sm:$0xf0]  ;;  %v5904_v23 = vld [vmem:[%s10507_s1 + $0xa0] sm:$0xf]  ;;  %1874 = vmatpush.bf16.msra.mxu0 %v5921_v16  ;;  %s7843_s16 = scalar_lea.hbm %s7842_s9, 128  ;;  %p7848_p3 = scmp.lt.s32.totalorder %s7842_s9, %s10513_s7 }
  0x27   : > { %v7361_v24 = vld [vmem:[%s10507_s1 + $0xac] sm:$0xf0]  ;;  %v6305_v25 = vor.u32 %v7461_v22, %v6304_v20  ;;  %v6032_v26 = vld [vmem:[%s10507_s1 + $0x1a0] sm:$0xf]  ;;  %1923 = vmatpush.bf16.msra.mxu1 %v6049_v17  ;;  %p7844_p0 = scmp.ne.s32.totalorder %s7842_s9, %s7843_s16  ;;  %p7849_p4 = scmp.lt.s32.totalorder %s7847_s13, %s7843_s16 }
  0x28   : > { %v7393_v27 = vld [vmem:[%s10507_s1 + $0x1ac] sm:$0xf0]  ;;  %v6160_v28 = vld [vmem:[%s10507_s1 + $0x2a0] sm:$0xf]  ;;  %v5905_v29 = vor.u32 %v7361_v24, %v5904_v23  ;;  %1972 = vmatpush.bf16.msra.mxu2 %v6177_v21 }
  0x29   : > { %v7425_v30 = vld [vmem:[%s10507_s1 + $0x2ac] sm:$0xf0]  ;;  %v6288_v31 = vld [vmem:[%s10507_s1 + $0x3a0] sm:$0xf]  ;;  %v6033_v33 = vor.u32 %v7393_v27, %v6032_v26  ;;  %2021 = vmatpush.bf16.msra.mxu3 %v6305_v25  ;;  %p7845_p1 = pnand %p7844_p0, %p7985_p5  ;;  %p7850_p7 = por %p7849_p4, %p7848_p3 }
  0x2a   : > { %v7457_v32 = vld [vmem:[%s10507_s1 + $0x3ac] sm:$0xf0]  ;;  %v6161_v34 = vor.u32 %v7425_v30, %v6160_v28  ;;  %v5888_v35 = vld [vmem:[%s10507_s1 + $0x80] sm:$0xf]  ;;  %1875 = vmatpush.bf16.msra.mxu0 %v5905_v29  ;;  %v7286_v29 = vld [vmem:[%s8208_s17 + $0x18] sm:$0xf0] }
  0x2b   : > { %v7357_v36 = vld [vmem:[%s10507_s1 + $0x8c] sm:$0xf0]  ;;  %v6016_v37 = vld [vmem:[%s10507_s1 + $0x180] sm:$0xf]  ;;  %v6289_v38 = vor.u32 %v7457_v32, %v6288_v31  ;;  %1924 = vmatpush.bf16.msra.mxu1 %v6033_v33  ;;  %v7283_v30 = vld [vmem:[%s8208_s17 + $0x4] sm:$0xf]  ;;  %p7846_p2 = pneg %p7845_p1 }
  0x2c   : > { %v7389_v39 = vld [vmem:[%s10507_s1 + $0x18c] sm:$0xf0]  ;;  %v6144_v40 = vld [vmem:[%s10507_s1 + $0x280] sm:$0xf]  ;;  %v5889_v44 = vor.u32 %v7357_v36, %v5888_v35  ;;  %1973 = vmatpush.bf16.msra.mxu2 %v6161_v34  ;;  %v7367_v35 = vld [vmem:[%s10507_s1 + $0xe4] sm:$0xf] }
  0x2d   : > { %v7421_v41 = vld [vmem:[%s10507_s1 + $0x28c] sm:$0xf0]  ;;  %v6272_v42 = vld [vmem:[%s10507_s1 + $0x380] sm:$0xf]  ;;  %v6017_v45 = vor.u32 %v7389_v39, %v6016_v37  ;;  %2022 = vmatpush.bf16.msra.mxu3 %v6289_v38  ;;  %v5938_v36 = vld [vmem:[%s10507_s1 + $0xf0] sm:$0xf0]  ;;  %p7851_p8 = pnand %p7850_p7, %p7846_p2 }
  0x2e   : > { %v7453_v43 = vld [vmem:[%s10507_s1 + $0x38c] sm:$0xf0]  ;;  %v6145_v46 = vor.u32 %v7421_v41, %v6144_v40  ;;  %v5872_v47 = vld [vmem:[%s10507_s1 + $0x60] sm:$0xf]  ;;  %1876 = vmatpush.bf16.msra.mxu0 %v5889_v44  ;;  %v5608_v39 = vld [vmem:[%s8208_s17 + $0x8] sm:$0xf] }
  0x2f   : > { %v7353_v48 = vld [vmem:[%s10507_s1 + $0x6c] sm:$0xf0]  ;;  %v6000_v49 = vld [vmem:[%s10507_s1 + $0x160] sm:$0xf]  ;;  %v6273_v50 = vor.u32 %v7453_v43, %v6272_v42  ;;  %1925 = vmatpush.bf16.msra.mxu1 %v6017_v45  ;;  %v7287_v40 = vld [vmem:[%s8208_s17 + $0x20] sm:$0xf0] }
  0x30   : > { %v7385_v51 = vld [vmem:[%s10507_s1 + $0x16c] sm:$0xf0]  ;;  %v6128_v52 = vld [vmem:[%s10507_s1 + $0x260] sm:$0xf]  ;;  %v5873_v56 = vor.u32 %v7353_v48, %v5872_v47  ;;  %1974 = vmatpush.bf16.msra.mxu2 %v6145_v46  ;;  %v7284_v41 = vld [vmem:[%s8208_s17 + $0xc] sm:$0xf]  ;;  %v5941_v48 = vor.u32 %v7367_v35, %v5938_v36 }
  0x31   : > { %v7417_v53 = vld [vmem:[%s10507_s1 + $0x26c] sm:$0xf0]  ;;  %v6256_v54 = vld [vmem:[%s10507_s1 + $0x360] sm:$0xf]  ;;  %v6001_v57 = vor.u32 %v7385_v51, %v6000_v49  ;;  %2023 = vmatpush.bf16.msra.mxu3 %v6273_v50  ;;  %v5610_v43 = vld [vmem:[%s8208_s17 + $0x24] sm:$0xf0] }
  0x32   : > { %v7449_v55 = vld [vmem:[%s10507_s1 + $0x36c] sm:$0xf0]  ;;  %v6129_v58 = vor.u32 %v7417_v53, %v6128_v52  ;;  %v5856_v59 = vld [vmem:[%s10507_s1 + $0x40] sm:$0xf]  ;;  %1877 = vmatpush.bf16.msra.mxu0 %v5873_v56  ;;  %v8267_v52 = vor.u32 %v7287_v40, %v5608_v39  ;;  %v7363_v53 = vld [vmem:[%s10507_s1 + $0xc4] sm:$0xf] }
  0x33   : > { %v7349_v60 = vld [vmem:[%s10507_s1 + $0x4c] sm:$0xf0]  ;;  %v5984_v61 = vld [vmem:[%s10507_s1 + $0x140] sm:$0xf]  ;;  %v6257_v62 = vor.u32 %v7449_v55, %v6256_v54  ;;  %1926 = vmatpush.bf16.msra.mxu1 %v6001_v57  ;;  %v5922_v54 = vld [vmem:[%s10507_s1 + $0xd0] sm:$0xf0]  ;;  %v8275_v55 = vor.u32 %v7284_v41, %v5610_v43 }
  0x34   : > { %v7381_v63 = vld [vmem:[%s10507_s1 + $0x14c] sm:$0xf0]  ;;  %v6112_v0 = vld [vmem:[%s10507_s1 + $0x240] sm:$0xf]  ;;  %v5857_v4 = vor.u32 %v7349_v60, %v5856_v59  ;;  %1975 = vmatpush.bf16.msra.mxu2 %v6129_v58  ;;  %v5925_v60 = vor.u32 %v7363_v53, %v5922_v54  ;;  %v5664_v35 = vld [vmem:[%s8208_s17 + $0x78] sm:$0xf] }
  0x35   : > { %v7413_v1 = vld [vmem:[%s10507_s1 + $0x24c] sm:$0xf0]  ;;  %v6240_v2 = vld [vmem:[%s10507_s1 + $0x340] sm:$0xf]  ;;  %v5985_v5 = vor.u32 %v7381_v63, %v5984_v61  ;;  %2024 = vmatpush.bf16.msra.mxu3 %v6257_v62  ;;  %v7301_v36 = vld [vmem:[%s8208_s17 + $0x90] sm:$0xf0] }
  0x36   : > { %v7445_v3 = vld [vmem:[%s10507_s1 + $0x34c] sm:$0xf0]  ;;  %v6113_v6 = vor.u32 %v7413_v1, %v6112_v0  ;;  %v5840_v7 = vld [vmem:[%s10507_s1 + $0x20] sm:$0xf]  ;;  %1878 = vmatpush.bf16.msra.mxu0 %v5857_v4  ;;  %v7359_v0 = vld [vmem:[%s10507_s1 + $0xa4] sm:$0xf]  ;;  %v8361_v41 = vor.u32 %v7301_v36, %v5664_v35 }
  0x37   : > { %v7345_v8 = vld [vmem:[%s10507_s1 + $0x2c] sm:$0xf0]  ;;  %v5968_v9 = vld [vmem:[%s10507_s1 + $0x120] sm:$0xf]  ;;  %v6241_v10 = vor.u32 %v7445_v3, %v6240_v2  ;;  %1927 = vmatpush.bf16.msra.mxu1 %v5985_v5  ;;  %v5906_v4 = vld [vmem:[%s10507_s1 + $0xb0] sm:$0xf0] }
  0x38   : > { %v7377_v11 = vld [vmem:[%s10507_s1 + $0x12c] sm:$0xf0]  ;;  %v6096_v12 = vld [vmem:[%s10507_s1 + $0x220] sm:$0xf]  ;;  %v5841_v17 = vor.u32 %v7345_v8, %v5840_v7  ;;  %1976 = vmatpush.bf16.msra.mxu2 %v6113_v6  ;;  %v5909_v5 = vor.u32 %v7359_v0, %v5906_v4 }
  0x39   : > { %v7409_v13 = vld [vmem:[%s10507_s1 + $0x22c] sm:$0xf0]  ;;  %v6224_v14 = vld [vmem:[%s10507_s1 + $0x320] sm:$0xf]  ;;  %v5969_v21 = vor.u32 %v7377_v11, %v5968_v9  ;;  %2025 = vmatpush.bf16.msra.mxu3 %v6241_v10  ;;  %v5628_v10 = vld [vmem:[%s8208_s17 + $0x38] sm:$0xf] }
  0x3a   : > { %v7441_v15 = vld [vmem:[%s10507_s1 + $0x32c] sm:$0xf0]  ;;  %v5824_v16 = vld [vmem:[%s10507_s1] sm:$0xf]  ;;  %v6097_v22 = vor.u32 %v7409_v13, %v6096_v12  ;;  %1879 = vmatpush.bf16.msra.mxu0 %v5841_v17  ;;  %v7293_v11 = vld [vmem:[%s8208_s17 + $0x50] sm:$0xf0] }
  0x3b   : > { %v7341_v18 = vld [vmem:[%s10507_s1 + $0xc] sm:$0xf0]  ;;  %v5952_v19 = vld [vmem:[%s10507_s1 + $0x100] sm:$0xf]  ;;  %v6225_v26 = vor.u32 %v7441_v15, %v6224_v14  ;;  %1928 = vmatpush.bf16.msra.mxu1 %v5969_v21  ;;  %v7290_v12 = vld [vmem:[%s8208_s17 + $0x3c] sm:$0xf] }
  0x3c   : > { %v7373_v20 = vld [vmem:[%s10507_s1 + $0x10c] sm:$0xf0]  ;;  %v6080_v23 = vld [vmem:[%s10507_s1 + $0x200] sm:$0xf]  ;;  %v5825_v33 = vor.u32 %v7341_v18, %v5824_v16  ;;  %1977 = vmatpush.bf16.msra.mxu2 %v6097_v22  ;;  %v5630_v13 = vld [vmem:[%s8208_s17 + $0x54] sm:$0xf0]  ;;  %v8319_v18 = vor.u32 %v7293_v11, %v5628_v10 }
  0x3d   : > { %v7405_v24 = vld [vmem:[%s10507_s1 + $0x20c] sm:$0xf0]  ;;  %v6208_v25 = vld [vmem:[%s10507_s1 + $0x300] sm:$0xf]  ;;  %v5953_v37 = vor.u32 %v7373_v20, %v5952_v19  ;;  %2026 = vmatpush.bf16.msra.mxu3 %v6225_v26  ;;  %v7294_v15 = vld [vmem:[%s8208_s17 + $0x58] sm:$0xf0]  ;;  %v8321_v19 = vor.u32 %v7290_v12, %v5630_v13 }
  0x3e   : > { %v7437_v27 = vld [vmem:[%s10507_s1 + $0x30c] sm:$0xf0]  ;;  %v5600_v28 = vld [vmem:[%s8208_s17] sm:$0xf]  ;;  %v6081_v38 = vor.u32 %v7405_v24, %v6080_v23  ;;  %1880 = vmatpush.bf16.msra.mxu0 %v5825_v33  ;;  %v7291_v16 = vld [vmem:[%s8208_s17 + $0x44] sm:$0xf] }
  0x3f   : > { %v6592_v31 = vld [vmem:[%s10507_s1 + $0x600] sm:$0xf]  ;;  %v7533_v32 = vld [vmem:[%s10507_s1 + $0x60c] sm:$0xf0]  ;;  %v6209_v42 = vor.u32 %v7437_v27, %v6208_v25  ;;  %v8257_v47 = vor.u32 %v7286_v29, %v5600_v28  ;;  %1929 = vmatpush.bf16.msra.mxu1 %v5953_v37  ;;  %10605 = vst [vmem:[#allocation13_spill] sm:$0xff] %v8319_v18 }
  0x40   : > { %v5602_v34 = vld [vmem:[%s8208_s17 + $0x1c] sm:$0xf0]  ;;  %v6593_v44 = vor.u32 %v7533_v32, %v6592_v31  ;;  %v7497_v46 = vld [vmem:[%s10507_s1 + $0x4ec] sm:$0xf0]  ;;  %1978 = vmatpush.bf16.msra.mxu2 %v6081_v38  ;;  %10606 = vst [vmem:[#allocation14_spill] sm:$0xff] %v8321_v19 }
  0x41   : > { %v6448_v45 = vld [vmem:[%s10507_s1 + $0x4e0] sm:$0xf]  ;;  %10603 = vst [vmem:[#allocation11_spill] sm:$0xff] %v8257_v47  ;;  %v7529_v50 = vld [vmem:[%s10507_s1 + $0x5ec] sm:$0xf0]  ;;  %v8265_v51 = vor.u32 %v7283_v30, %v5602_v34  ;;  %2027 = vmatpush.bf16.msra.mxu3 %v6209_v42  ;;  %1881 = vmatmul.bf16.vlgmr.msra.gmra.mxu0 %v8257_v47 }
  0x42   : > { %v6576_v49 = vld [vmem:[%s10507_s1 + $0x5e0] sm:$0xf]  ;;  %v6449_v56 = vor.u32 %v7497_v46, %v6448_v45  ;;  %v7493_v59 = vld [vmem:[%s10507_s1 + $0x4cc] sm:$0xf0]  ;;  %v7355_v24 = vld [vmem:[%s10507_s1 + $0x84] sm:$0xf] }
  0x43   : > { %10604 = vst [vmem:[#allocation12_spill] sm:$0xff] %v8265_v51  ;;  %v6577_v57 = vor.u32 %v7529_v50, %v6576_v49  ;;  %v6432_v58 = vld [vmem:[%s10507_s1 + $0x4c0] sm:$0xf]  ;;  %v7525_v62 = vld [vmem:[%s10507_s1 + $0x5cc] sm:$0xf0]  ;;  %1930 = vmatmul.bf16.vlgmr.msra.gmra.mxu1 %v8265_v51  ;;  %1979 = vmatmul.bf16.vlgmr.msra.gmra.mxu2 %v8267_v52 }
  0x44   : > { %2174 = vmatpush.bf16.msrb.mxu2 %v6593_v44  ;;  %v6560_v61 = vld [vmem:[%s10507_s1 + $0x5c0] sm:$0xf]  ;;  %2028 = vmatmul.bf16.vlgmr.msra.gmra.mxu3 %v8275_v55  ;;  %v6433_v63 = vor.u32 %v7493_v59, %v6432_v58  ;;  %v7489_v3 = vld [vmem:[%s10507_s1 + $0x4ac] sm:$0xf0]  ;;  %v5890_v26 = vld [vmem:[%s10507_s1 + $0x90] sm:$0xf0] }
  0x45   : > { %2216 = vmatpush.bf16.msrb.mxu3 %v5941_v48  ;;  %2069 = vmatpush.bf16.msrb.mxu0 %v6449_v56  ;;  %v6561_v1 = vor.u32 %v7525_v62, %v6560_v61  ;;  %v6416_v2 = vld [vmem:[%s10507_s1 + $0x4a0] sm:$0xf]  ;;  %v7521_v7 = vld [vmem:[%s10507_s1 + $0x5ac] sm:$0xf0]  ;;  %v5893_v29 = vor.u32 %v7355_v24, %v5890_v26  ;;  %v7300_v32 = vld [vmem:[%s8208_s17 + $0x88] sm:$0xf0] }
  0x46   : > { %2118 = vmatpush.bf16.msrb.mxu1 %v6577_v57  ;;  %v6544_v6 = vld [vmem:[%s10507_s1 + $0x5a0] sm:$0xf]  ;;  %v6417_v8 = vor.u32 %v7489_v3, %v6416_v2  ;;  %v7485_v23 = vld [vmem:[%s10507_s1 + $0x48c] sm:$0xf0]  ;;  %v7297_v33 = vld [vmem:[%s8208_s17 + $0x74] sm:$0xf] }
  0x47   : > { %v6545_v9 = vor.u32 %v7521_v7, %v6544_v6  ;;  %v5636_v14 = vld [vmem:[%s8208_s17 + $0x40] sm:$0xf]  ;;  %v7517_v28 = vld [vmem:[%s10507_s1 + $0x58c] sm:$0xf0]  ;;  %v7298_v37 = vld [vmem:[%s8208_s17 + $0x7c] sm:$0xf] }
  0x48   : > { %v5638_v17 = vld [vmem:[%s8208_s17 + $0x5c] sm:$0xf0]  ;;  %v8323_v20 = vor.u32 %v7294_v15, %v5636_v14  ;;  %v5656_v31 = vld [vmem:[%s8208_s17 + $0x70] sm:$0xf]  ;;  %v5666_v38 = vld [vmem:[%s8208_s17 + $0x94] sm:$0xf0] }
  0x49   : > { %2217 = vmatpush.bf16.msrb.mxu3 %v5925_v60  ;;  %2070 = vmatpush.bf16.msrb.mxu0 %v6433_v63  ;;  %v8325_v21 = vor.u32 %v7291_v16, %v5638_v17  ;;  %v6400_v22 = vld [vmem:[%s10507_s1 + $0x480] sm:$0xf]  ;;  %v5658_v34 = vld [vmem:[%s8208_s17 + $0x8c] sm:$0xf0]  ;;  %v8357_v39 = vor.u32 %v7300_v32, %v5656_v31  ;;  %v8363_v42 = vor.u32 %v7298_v37, %v5666_v38  ;;  %v7351_v45 = vld [vmem:[%s10507_s1 + $0x64] sm:$0xf] }
  0x4a   : > { %2119 = vmatpush.bf16.msrb.mxu1 %v6561_v1  ;;  %v6401_v25 = vor.u32 %v7485_v23, %v6400_v22  ;;  %v6528_v27 = vld [vmem:[%s10507_s1 + $0x580] sm:$0xf]  ;;  %v8359_v40 = vor.u32 %v7297_v33, %v5658_v34  ;;  %v7481_v44 = vld [vmem:[%s10507_s1 + $0x46c] sm:$0xf0]  ;;  %v5874_v48 = vld [vmem:[%s10507_s1 + $0x70] sm:$0xf0] }
  0x4b   : > { %v6529_v30 = vor.u32 %v7517_v28, %v6528_v27  ;;  %10607 = vst [vmem:[#allocation15_spill] sm:$0xff] %v8357_v39  ;;  %v6384_v43 = vld [vmem:[%s10507_s1 + $0x460] sm:$0xf]  ;;  %v7513_v50 = vld [vmem:[%s10507_s1 + $0x56c] sm:$0xf0]  ;;  %v5877_v53 = vor.u32 %v7351_v45, %v5874_v48 }
  0x4c   : > { %10608 = vst [vmem:[#allocation16_spill] sm:$0xff] %v8359_v40  ;;  %v6385_v46 = vor.u32 %v7481_v44, %v6384_v43  ;;  %v6512_v49 = vld [vmem:[%s10507_s1 + $0x560] sm:$0xf]  ;;  %v5684_v56 = vld [vmem:[%s8208_s17 + $0xa8] sm:$0xf] }
  0x4d   : > { %2218 = vmatpush.bf16.msrb.mxu3 %v5909_v5  ;;  %2071 = vmatpush.bf16.msrb.mxu0 %v6417_v8  ;;  %v6513_v54 = vor.u32 %v7513_v50, %v6512_v49  ;;  %v7307_v57 = vld [vmem:[%s8208_s17 + $0xc0] sm:$0xf0]  ;;  %v7304_v58 = vld [vmem:[%s8208_s17 + $0xac] sm:$0xf]  ;;  %v5686_v59 = vld [vmem:[%s8208_s17 + $0xc4] sm:$0xf0] }
  0x4e   : > { %2120 = vmatpush.bf16.msrb.mxu1 %v6545_v9  ;;  %v5692_v60 = vld [vmem:[%s8208_s17 + $0xb0] sm:$0xf]  ;;  %v7308_v61 = vld [vmem:[%s8208_s17 + $0xc8] sm:$0xf0]  ;;  %v7305_v62 = vld [vmem:[%s8208_s17 + $0xb4] sm:$0xf]  ;;  %v8395_v0 = vor.u32 %v7307_v57, %v5684_v56  ;;  %v8397_v1 = vor.u32 %v7304_v58, %v5686_v59 }
  0x4f   : > { %v5694_v63 = vld [vmem:[%s8208_s17 + $0xcc] sm:$0xf0]  ;;  %v8399_v2 = vor.u32 %v7308_v61, %v5692_v60  ;;  %v6368_v4 = vld [vmem:[%s10507_s1 + $0x440] sm:$0xf]  ;;  %v7347_v6 = vld [vmem:[%s10507_s1 + $0x44] sm:$0xf] }
  0x50   : > { %10609 = vst [vmem:[#allocation17_spill] sm:$0xff] %v8395_v0  ;;  %v8401_v3 = vor.u32 %v7305_v62, %v5694_v63  ;;  %v7477_v5 = vld [vmem:[%s10507_s1 + $0x44c] sm:$0xf0]  ;;  %v5858_v8 = vld [vmem:[%s10507_s1 + $0x50] sm:$0xf0] }
  0x51   : > { %1886 = vmatmul.bf16.gmra.mxu0 %v8319_v18  ;;  %2219 = vmatpush.bf16.msrb.mxu3 %v5893_v29  ;;  %10610 = vst [vmem:[#allocation18_spill] sm:$0xff] %v8397_v1  ;;  %v6369_v7 = vor.u32 %v7477_v5, %v6368_v4  ;;  %v6496_v9 = vld [vmem:[%s10507_s1 + $0x540] sm:$0xf]  ;;  %v7509_v10 = vld [vmem:[%s10507_s1 + $0x54c] sm:$0xf0]  ;;  %v5861_v11 = vor.u32 %v7347_v6, %v5858_v8 }
  0x52   : > { %2072 = vmatpush.bf16.msrb.mxu0 %v6401_v25  ;;  %2121 = vmatpush.bf16.msrb.mxu1 %v6529_v30  ;;  %v6497_v12 = vor.u32 %v7509_v10, %v6496_v9  ;;  %v5712_v13 = vld [vmem:[%s8208_s17 + $0xe0] sm:$0xf]  ;;  %v7314_v14 = vld [vmem:[%s8208_s17 + $0xf8] sm:$0xf0]  ;;  %v7311_v15 = vld [vmem:[%s8208_s17 + $0xe4] sm:$0xf] }
  0x53   : > { %1935 = vmatmul.bf16.gmra.mxu1 %v8321_v19  ;;  %1984 = vmatmul.bf16.gmra.mxu2 %v8323_v20  ;;  %v5714_v16 = vld [vmem:[%s8208_s17 + $0xfc] sm:$0xf0]  ;;  %v5720_v17 = vld [vmem:[%s8208_s17 + $0xe8] sm:$0xf]  ;;  %v7315_v22 = vld [vmem:[%s8208_s17 + $0x100] sm:$0xf0]  ;;  %v8433_v25 = vor.u32 %v7314_v14, %v5712_v13 }
  0x54   : > { %2033 = vmatmul.bf16.gmra.mxu3 %v8325_v21  ;;  %v7312_v23 = vld [vmem:[%s8208_s17 + $0xec] sm:$0xf]  ;;  %v5722_v24 = vld [vmem:[%s8208_s17 + $0x104] sm:$0xf0]  ;;  %v8435_v26 = vor.u32 %v7311_v15, %v5714_v16  ;;  %v8437_v27 = vor.u32 %v7315_v22, %v5720_v17  ;;  %v6352_v29 = vld [vmem:[%s10507_s1 + $0x420] sm:$0xf] }
  0x55   : > { %2220 = vmatpush.bf16.msrb.mxu3 %v5877_v53  ;;  %10611 = vst [vmem:[#allocation19_spill] sm:$0xff] %v8433_v25  ;;  %v8439_v28 = vor.u32 %v7312_v23, %v5722_v24  ;;  %v7473_v30 = vld [vmem:[%s10507_s1 + $0x42c] sm:$0xf0]  ;;  %v7343_v31 = vld [vmem:[%s10507_s1 + $0x24] sm:$0xf] }
  0x56   : > { %2073 = vmatpush.bf16.msrb.mxu0 %v6385_v46  ;;  %2122 = vmatpush.bf16.msrb.mxu1 %v6513_v54  ;;  %10612 = vst [vmem:[#allocation20_spill] sm:$0xff] %v8435_v26  ;;  %v6353_v32 = vor.u32 %v7473_v30, %v6352_v29  ;;  %v5842_v33 = vld [vmem:[%s10507_s1 + $0x30] sm:$0xf0]  ;;  %v6480_v34 = vld [vmem:[%s10507_s1 + $0x520] sm:$0xf] }
  0x57   : > { %v7505_v35 = vld [vmem:[%s10507_s1 + $0x52c] sm:$0xf0]  ;;  %v5845_v36 = vor.u32 %v7343_v31, %v5842_v33  ;;  %v5740_v38 = vld [vmem:[%s8208_s17 + $0x118] sm:$0xf]  ;;  %v7321_v43 = vld [vmem:[%s8208_s17 + $0x130] sm:$0xf0] }
  0x58   : > { %v6481_v37 = vor.u32 %v7505_v35, %v6480_v34  ;;  %v7318_v44 = vld [vmem:[%s8208_s17 + $0x11c] sm:$0xf]  ;;  %v5742_v45 = vld [vmem:[%s8208_s17 + $0x134] sm:$0xf0]  ;;  %v5748_v46 = vld [vmem:[%s8208_s17 + $0x120] sm:$0xf]  ;;  %v8471_v53 = vor.u32 %v7321_v43, %v5740_v38 }
  0x59   : > { %2221 = vmatpush.bf16.msrb.mxu3 %v5861_v11  ;;  %v7322_v48 = vld [vmem:[%s8208_s17 + $0x138] sm:$0xf0]  ;;  %v7319_v49 = vld [vmem:[%s8208_s17 + $0x124] sm:$0xf]  ;;  %v5750_v50 = vld [vmem:[%s8208_s17 + $0x13c] sm:$0xf0]  ;;  %v8473_v54 = vor.u32 %v7318_v44, %v5742_v45 }
  0x5a   : > { %2074 = vmatpush.bf16.msrb.mxu0 %v6369_v7  ;;  %2123 = vmatpush.bf16.msrb.mxu1 %v6497_v12  ;;  %10613 = vst [vmem:[#allocation21_spill] sm:$0xff] %v8471_v53  ;;  %v8475_v56 = vor.u32 %v7322_v48, %v5748_v46  ;;  %v8477_v57 = vor.u32 %v7319_v49, %v5750_v50  ;;  %v6336_v58 = vld [vmem:[%s10507_s1 + $0x400] sm:$0xf]  ;;  %v7469_v59 = vld [vmem:[%s10507_s1 + $0x40c] sm:$0xf0] }
  0x5b   : > { %10614 = vst [vmem:[#allocation22_spill] sm:$0xff] %v8473_v54  ;;  %v7339_v60 = vld [vmem:[%s10507_s1 + $0x4] sm:$0xf]  ;;  %v6337_v61 = vor.u32 %v7469_v59, %v6336_v58  ;;  %v5826_v62 = vld [vmem:[%s10507_s1 + $0x10] sm:$0xf0] }
  0x5c   : > { %v6464_v63 = vld [vmem:[%s10507_s1 + $0x500] sm:$0xf]  ;;  %v7501_v4 = vld [vmem:[%s10507_s1 + $0x50c] sm:$0xf0]  ;;  %v5829_v5 = vor.u32 %v7339_v60, %v5826_v62  ;;  %v7328_v8 = vld [vmem:[%s8208_s17 + $0x168] sm:$0xf0] }
  0x5d   : > { %2222 = vmatpush.bf16.msrb.mxu3 %v5845_v36  ;;  %v6465_v6 = vor.u32 %v7501_v4, %v6464_v63  ;;  %v5768_v7 = vld [vmem:[%s8208_s17 + $0x150] sm:$0xf]  ;;  %v7325_v9 = vld [vmem:[%s8208_s17 + $0x154] sm:$0xf]  ;;  %v5776_v11 = vld [vmem:[%s8208_s17 + $0x158] sm:$0xf] }
  0x5e   : > { %2075 = vmatpush.bf16.msrb.mxu0 %v6353_v32  ;;  %2124 = vmatpush.bf16.msrb.mxu1 %v6481_v37  ;;  %v5770_v10 = vld [vmem:[%s8208_s17 + $0x16c] sm:$0xf0]  ;;  %v7329_v12 = vld [vmem:[%s8208_s17 + $0x170] sm:$0xf0]  ;;  %v7326_v13 = vld [vmem:[%s8208_s17 + $0x15c] sm:$0xf]  ;;  %v8509_v15 = vor.u32 %v7328_v8, %v5768_v7 }
  0x5f   : > { %v5778_v14 = vld [vmem:[%s8208_s17 + $0x174] sm:$0xf0]  ;;  %v8511_v16 = vor.u32 %v7325_v9, %v5770_v10  ;;  %v8513_v17 = vor.u32 %v7329_v12, %v5776_v11  ;;  %v7463_v23 = vld [vmem:[%s10507_s1 + $0x3e4] sm:$0xf]  ;;  %v6322_v24 = vld [vmem:[%s10507_s1 + $0x3f0] sm:$0xf0] }
  0x60   : > { %10615 = vst [vmem:[#allocation23_spill] sm:$0xff] %v8509_v15  ;;  %v8515_v22 = vor.u32 %v7326_v13, %v5778_v14  ;;  %v7399_v29 = vld [vmem:[%s10507_s1 + $0x1e4] sm:$0xf]  ;;  %v6325_v30 = vor.u32 %v7463_v23, %v6322_v24  ;;  %v6066_v31 = vld [vmem:[%s10507_s1 + $0x1f0] sm:$0xf0] }
  0x61   : > { %1891 = vmatmul.bf16.gmra.mxu0 %v8357_v39  ;;  %2223 = vmatpush.bf16.msrb.mxu3 %v5829_v5  ;;  %10616 = vst [vmem:[#allocation24_spill] sm:$0xff] %v8511_v16  ;;  %v7495_v32 = vld [vmem:[%s10507_s1 + $0x4e4] sm:$0xf]  ;;  %v6450_v33 = vld [vmem:[%s10507_s1 + $0x4f0] sm:$0xf0]  ;;  %v6069_v34 = vor.u32 %v7399_v29, %v6066_v31 }
  0x62   : > { %2076 = vmatpush.bf16.msrb.mxu0 %v6337_v61  ;;  %2125 = vmatpush.bf16.msrb.mxu1 %v6465_v6  ;;  %v6453_v35 = vor.u32 %v7495_v32, %v6450_v33  ;;  %v7431_v36 = vld [vmem:[%s10507_s1 + $0x2e4] sm:$0xf]  ;;  %v6194_v37 = vld [vmem:[%s10507_s1 + $0x2f0] sm:$0xf0]  ;;  %v5796_v43 = vld [vmem:[%s8208_s17 + $0x188] sm:$0xf] }
  0x63   : > { %1940 = vmatmul.bf16.gmra.mxu1 %v8359_v40  ;;  %1989 = vmatmul.bf16.gmra.mxu2 %v8361_v41  ;;  %v6197_v38 = vor.u32 %v7431_v36, %v6194_v37  ;;  %v7335_v44 = vld [vmem:[%s8208_s17 + $0x1a0] sm:$0xf0]  ;;  %v7332_v45 = vld [vmem:[%s8208_s17 + $0x18c] sm:$0xf]  ;;  %v5798_v46 = vld [vmem:[%s8208_s17 + $0x1a4] sm:$0xf0] }
  0x64   : > { %2038 = vmatmul.bf16.gmra.mxu3 %v8363_v42  ;;  %2363 = vmatpush.bf16.msra.mxu2 %v6325_v30  ;;  %v5804_v48 = vld [vmem:[%s8208_s17 + $0x190] sm:$0xf]  ;;  %v7336_v49 = vld [vmem:[%s8208_s17 + $0x1a8] sm:$0xf0]  ;;  %v7333_v50 = vld [vmem:[%s8208_s17 + $0x194] sm:$0xf]  ;;  %v8553_v59 = vor.u32 %v7335_v44, %v5796_v43  ;;  %v8555_v60 = vor.u32 %v7332_v45, %v5798_v46 }
  0x65   : > { %2412 = vmatpush.bf16.msra.mxu3 %v6453_v35  ;;  %v5806_v58 = vld [vmem:[%s8208_s17 + $0x1ac] sm:$0xf0]  ;;  %v8557_v61 = vor.u32 %v7336_v49, %v5804_v48  ;;  %v7459_v63 = vld [vmem:[%s10507_s1 + $0x3c4] sm:$0xf]  ;;  %v6306_v4 = vld [vmem:[%s10507_s1 + $0x3d0] sm:$0xf0] }
  0x66   : > { %2265 = vmatpush.bf16.msra.mxu0 %v6069_v34  ;;  %2314 = vmatpush.bf16.msra.mxu1 %v6197_v38  ;;  %10617 = vst [vmem:[#allocation25_spill] sm:$0xff] %v8553_v59  ;;  %v8559_v62 = vor.u32 %v7333_v50, %v5806_v58  ;;  %v7395_v5 = vld [vmem:[%s10507_s1 + $0x1c4] sm:$0xf]  ;;  %v6309_v6 = vor.u32 %v7459_v63, %v6306_v4  ;;  %v6050_v7 = vld [vmem:[%s10507_s1 + $0x1d0] sm:$0xf0] }
  0x67   : > { %10618 = vst [vmem:[#allocation26_spill] sm:$0xff] %v8555_v60  ;;  %v7491_v8 = vld [vmem:[%s10507_s1 + $0x4c4] sm:$0xf]  ;;  %v6434_v9 = vld [vmem:[%s10507_s1 + $0x4d0] sm:$0xf0]  ;;  %v6053_v10 = vor.u32 %v7395_v5, %v6050_v7 }
  0x68   : > { %10619 = vst [vmem:[#allocation27_spill] sm:$0xff] %v8557_v61  ;;  %v6437_v11 = vor.u32 %v7491_v8, %v6434_v9  ;;  %v578_v12 = vld [vmem:[%s10508_s2] sm:$0xf]  ;;  %2364 = vmatpush.bf16.msra.mxu2 %v6309_v6  ;;  %v7427_v13 = vld [vmem:[%s10507_s1 + $0x2c4] sm:$0xf] }
  0x69   : > { %10620 = vst [vmem:[#allocation28_spill] sm:$0xff] %v8559_v62  ;;  %v6178_v14 = vld [vmem:[%s10507_s1 + $0x2d0] sm:$0xf0]  ;;  %v8592_v23 = vperm.slane %v578_v12, 0  ;;  %v5616_v29 = vld [vmem:[%s8208_s17 + $0x10] sm:$0xf] }
  0x6a   : > { %2266 = vmatpush.bf16.msra.mxu0 %v6053_v10  ;;  %2413 = vmatpush.bf16.msra.mxu3 %v6437_v11  ;;  %v6181_v24 = vor.u32 %v7427_v13, %v6178_v14  ;;  %v7288_v30 = vld [vmem:[%s8208_s17 + $0x28] sm:$0xf0]  ;;  %v7285_v31 = vld [vmem:[%s8208_s17 + $0x14] sm:$0xf]  ;;  %v5618_v32 = vld [vmem:[%s8208_s17 + $0x2c] sm:$0xf0] }
  0x6b   : > { %v5624_v33 = vld [vmem:[%s8208_s17 + $0x18] sm:$0xf]  ;;  %v7289_v34 = vld [vmem:[%s8208_s17 + $0x30] sm:$0xf0]  ;;  %v8600_v35 = vor.u32 %v7288_v30, %v5616_v29  ;;  %v8602_v37 = vor.u32 %v7285_v31, %v5618_v32  ;;  %v7455_v46 = vld [vmem:[%s10507_s1 + $0x3a4] sm:$0xf] }
  0x6c   : > { %2315 = vmatpush.bf16.msra.mxu1 %v6181_v24  ;;  %v8604_v38 = vor.u32 %v7289_v34, %v5624_v33  ;;  %v6290_v48 = vld [vmem:[%s10507_s1 + $0x3b0] sm:$0xf0]  ;;  %v7391_v49 = vld [vmem:[%s10507_s1 + $0x1a4] sm:$0xf]  ;;  %v5644_v31 = vld [vmem:[%s8208_s17 + $0x48] sm:$0xf] }
  0x6d   : > { %10621 = vst [vmem:[#allocation29_spill] sm:$0xff] %v8600_v35  ;;  %v6293_v50 = vor.u32 %v7455_v46, %v6290_v48  ;;  %v6034_v58 = vld [vmem:[%s10507_s1 + $0x1b0] sm:$0xf0]  ;;  %v7487_v63 = vld [vmem:[%s10507_s1 + $0x4a4] sm:$0xf] }
  0x6e   : > { %10622 = vst [vmem:[#allocation30_spill] sm:$0xff] %v8602_v37  ;;  %v6418_v4 = vld [vmem:[%s10507_s1 + $0x4b0] sm:$0xf0]  ;;  %v6037_v6 = vor.u32 %v7391_v49, %v6034_v58  ;;  %v7423_v14 = vld [vmem:[%s10507_s1 + $0x2a4] sm:$0xf] }
  0x6f   : > { %10623 = vst [vmem:[#allocation31_spill] sm:$0xff] %v8604_v38  ;;  %v6421_v7 = vor.u32 %v7487_v63, %v6418_v4  ;;  %2365 = vmatpush.bf16.msra.mxu2 %v6293_v50  ;;  %v6162_v24 = vld [vmem:[%s10507_s1 + $0x2b0] sm:$0xf0]  ;;  %v7295_v32 = vld [vmem:[%s8208_s17 + $0x60] sm:$0xf0] }
  0x70   : > { %2267 = vmatpush.bf16.msra.mxu0 %v6037_v6  ;;  %v6165_v30 = vor.u32 %v7423_v14, %v6162_v24  ;;  %v7292_v33 = vld [vmem:[%s8208_s17 + $0x4c] sm:$0xf]  ;;  %v5646_v34 = vld [vmem:[%s8208_s17 + $0x64] sm:$0xf0]  ;;  %v6402_v14 = vld [vmem:[%s10507_s1 + $0x490] sm:$0xf0] }
  0x71   : > { %1896 = vmatmul.bf16.gmra.mxu0 %v8395_v0  ;;  %2414 = vmatpush.bf16.msra.mxu3 %v6421_v7  ;;  %v8647_v50 = vor.u32 %v7292_v33, %v5646_v34  ;;  %v7451_v7 = vld [vmem:[%s10507_s1 + $0x384] sm:$0xf] }
  0x72   : > { %2316 = vmatpush.bf16.msra.mxu1 %v6165_v30 }
  0x73   : > { %1945 = vmatmul.bf16.gmra.mxu1 %v8397_v1  ;;  %1994 = vmatmul.bf16.gmra.mxu2 %v8399_v2  ;;  %10624 = vst [vmem:[#allocation32_spill] sm:$0xff] %v8647_v50 }
  0x74   : > { %2043 = vmatmul.bf16.gmra.mxu3 %v8401_v3 }
  0x81   : > { %1901 = vmatmul.bf16.gmra.mxu0 %v8433_v25 }
  0x83   : > { %1950 = vmatmul.bf16.gmra.mxu1 %v8435_v26  ;;  %1999 = vmatmul.bf16.gmra.mxu2 %v8437_v27 }
  0x84   : > { %2048 = vmatmul.bf16.gmra.mxu3 %v8439_v28 }
  0x91   : > { %1906 = vmatmul.bf16.gmra.mxu0 %v8471_v53 }
  0x93   : > { %1955 = vmatmul.bf16.gmra.mxu1 %v8473_v54  ;;  %2004 = vmatmul.bf16.gmra.mxu2 %v8475_v56 }
  0x94   : > { %2053 = vmatmul.bf16.gmra.mxu3 %v8477_v57 }
  0xa1   : > { %1911 = vmatmul.bf16.gmra.mxu0 %v8509_v15 }
  0xa3   : > { %1960 = vmatmul.bf16.gmra.mxu1 %v8511_v16  ;;  %2009 = vmatmul.bf16.gmra.mxu2 %v8513_v17 }
  0xa4   : > { %2058 = vmatmul.bf16.gmra.mxu3 %v8515_v22 }
  0xb1   : > { %1916 = vmatmul.bf16.gmra.mxu0 %v8553_v59 }
  0xb3   : > { %1965 = vmatmul.bf16.gmra.mxu1 %v8555_v60  ;;  %2014 = vmatmul.bf16.gmra.mxu2 %v8557_v61 }
  0xb4   : > { %2063 = vmatmul.bf16.gmra.mxu3 %v8559_v62 }
  0xbe   : > { %v1882_v36 = vpop.f32.mrf.mxu0 }
  0xbf   : > { %v1883_v43 = vadd.f32 %v1882_v36, %v8592_v23  ;;  %v5652_v36 = vld [vmem:[%s8208_s17 + $0x50] sm:$0xf] }
  0xc0   : > { %v1931_v44 = vpop.f32.mrf.mxu1 }
  0xc1   : > { %v1932_v45 = vadd.f32 %v1931_v44, %v1883_v43  ;;  %2077 = vmatmul.bf16.vlgmr.msrb.gmra.mxu0 %v8600_v35  ;;  %v7296_v43 = vld [vmem:[%s8208_s17 + $0x68] sm:$0xf0] }
  0xc2   : > { %v8649_v58 = vor.u32 %v7296_v43, %v5652_v36 }
  0xc3   : > { %2126 = vmatmul.bf16.vlgmr.msrb.gmra.mxu1 %v8602_v37  ;;  %6606 = vmatmul.msk.bf16.vlgmr.msrb.gmra.mxu2 %vm1848_vm0, %v8604_v38 }
  0xc4   : > { %2224 = vmatmul.bf16.vlgmr.msrb.gmra.mxu3 %v8257_v47  ;;  %10625 = vst [vmem:[#allocation33_spill] sm:$0xff] %v8649_v58 }
  0xc6   : > { %v1980_v5 = vpop.f32.mrf.mxu2  ;;  %v1884_v10 = vpop.f32.mrf.mxu0 }
  0xc7   : > { %v1981_v8 = vadd.f32 %v1980_v5, %v1932_v45  ;;  %v2029_v9 = vpop.f32.mrf.mxu3  ;;  %v1885_v11 = vadd.f32 %v1884_v10, %v8592_v23  ;;  %v8645_v45 = vor.u32 %v7295_v32, %v5644_v31 }
  0xc8   : > { %v1933_v12 = vpop.f32.mrf.mxu1 }
  0xc9   : > { %v8631_v13 = vadd.f32 %v2029_v9, %v1981_v8  ;;  %v1934_v29 = vadd.f32 %v1933_v12, %v1885_v11  ;;  %v6274_v8 = vld [vmem:[%s10507_s1 + $0x390] sm:$0xf0]  ;;  %v7387_v9 = vld [vmem:[%s10507_s1 + $0x184] sm:$0xf] }
  0xca   : > { %v6277_v10 = vor.u32 %v7451_v7, %v6274_v8  ;;  %v6018_v11 = vld [vmem:[%s10507_s1 + $0x190] sm:$0xf0]  ;;  %v7483_v12 = vld [vmem:[%s10507_s1 + $0x484] sm:$0xf]  ;;  %v5674_v7 = vld [vmem:[%s8208_s17 + $0x9c] sm:$0xf0] }
  0xcb   : > { %v6405_v30 = vor.u32 %v7483_v12, %v6402_v14  ;;  %v5680_v8 = vld [vmem:[%s8208_s17 + $0x88] sm:$0xf] }
  0xcc   : > { %2366 = vmatpush.bf16.msra.mxu2 %v6277_v10 }
  0xcd   : > { %2415 = vmatpush.bf16.msra.mxu3 %v6405_v30 }
  0xce   : > { %v1982_v44 = vpop.f32.mrf.mxu2  ;;  %v1887_v49 = vpop.f32.mrf.mxu0 }
  0xcf   : > { %v1983_v46 = vadd.f32 %v1982_v44, %v1934_v29  ;;  %v2031_v48 = vpop.f32.mrf.mxu3  ;;  %v1888_v63 = vadd.f32 %v1887_v49, %v8592_v23  ;;  %v6021_v29 = vor.u32 %v7387_v9, %v6018_v11  ;;  %v7419_v44 = vld [vmem:[%s10507_s1 + $0x284] sm:$0xf] }
  0xd0   : > { %v1936_v4 = vpop.f32.mrf.mxu1  ;;  %v7303_v9 = vld [vmem:[%s8208_s17 + $0xa0] sm:$0xf0] }
  0xd1   : > { %v8652_v5 = vadd.f32 %v2031_v48, %v1983_v46  ;;  %v1937_v6 = vadd.f32 %v1936_v4, %v1888_v63  ;;  %2082 = vmatmul.bf16.gmra.mxu0 %v8645_v45  ;;  %v6146_v46 = vld [vmem:[%s10507_s1 + $0x290] sm:$0xf0]  ;;  %v5672_v63 = vld [vmem:[%s8208_s17 + $0x80] sm:$0xf]  ;;  %v7302_v4 = vld [vmem:[%s8208_s17 + $0x98] sm:$0xf0]  ;;  %v8696_v30 = vor.u32 %v7303_v9, %v5680_v8 }
  0xd2   : > { %2268 = vmatpush.bf16.msra.mxu0 %v6021_v29  ;;  %v6149_v49 = vor.u32 %v7419_v44, %v6146_v46  ;;  %v8692_v11 = vor.u32 %v7302_v4, %v5672_v63  ;;  %v6258_v44 = vld [vmem:[%s10507_s1 + $0x370] sm:$0xf0]  ;;  %v7383_v46 = vld [vmem:[%s10507_s1 + $0x164] sm:$0xf] }
  0xd3   : > { %2131 = vmatmul.bf16.gmra.mxu1 %v8647_v50  ;;  %6607 = vmatmul.msk.bf16.gmra.mxu2 %vm1848_vm0, %v8649_v58  ;;  %10627 = vst [vmem:[#allocation35_spill] sm:$0xff] %v8696_v30  ;;  %v7479_v63 = vld [vmem:[%s10507_s1 + $0x464] sm:$0xf]  ;;  %v6386_v4 = vld [vmem:[%s10507_s1 + $0x470] sm:$0xf0] }
  0xd4   : > { %2229 = vmatmul.bf16.gmra.mxu3 %v8319_v18  ;;  %2317 = vmatpush.bf16.msra.mxu1 %v6149_v49  ;;  %v6002_v49 = vld [vmem:[%s10507_s1 + $0x170] sm:$0xf0]  ;;  %v6389_v8 = vor.u32 %v7479_v63, %v6386_v4  ;;  %v5702_v63 = vld [vmem:[%s8208_s17 + $0xd4] sm:$0xf0]  ;;  %v5708_v4 = vld [vmem:[%s8208_s17 + $0xc0] sm:$0xf] }
  0xd6   : > { %v1985_v24 = vpop.f32.mrf.mxu2  ;;  %v1889_v33 = vpop.f32.mrf.mxu0  ;;  %2416 = vmatpush.bf16.msra.mxu3 %v6389_v8 }
  0xd7   : > { %v1986_v31 = vadd.f32 %v1985_v24, %v1937_v6  ;;  %v2034_v32 = vpop.f32.mrf.mxu3  ;;  %v1890_v34 = vadd.f32 %v1889_v33, %v8592_v23  ;;  %v7299_v6 = vld [vmem:[%s8208_s17 + $0x84] sm:$0xf] }
  0xd8   : > { %v1938_v36 = vpop.f32.mrf.mxu1  ;;  %v8694_v29 = vor.u32 %v7299_v6, %v5674_v7  ;;  %v6005_v7 = vor.u32 %v7383_v46, %v6002_v49  ;;  %v5700_v46 = vld [vmem:[%s8208_s17 + $0xb8] sm:$0xf]  ;;  %v7309_v49 = vld [vmem:[%s8208_s17 + $0xd0] sm:$0xf0] }
  0xd9   : > { %v8678_v43 = vadd.f32 %v2034_v32, %v1986_v31  ;;  %v1939_v48 = vadd.f32 %v1938_v36, %v1890_v34  ;;  %v7447_v36 = vld [vmem:[%s10507_s1 + $0x364] sm:$0xf]  ;;  %v8739_v8 = vor.u32 %v7309_v49, %v5700_v46 }
  0xda   : > { %10626 = vst [vmem:[#allocation34_spill] sm:$0xff] %v8694_v29  ;;  %2269 = vmatpush.bf16.msra.mxu0 %v6005_v7  ;;  %v7379_v46 = vld [vmem:[%s10507_s1 + $0x144] sm:$0xf] }
  0xde   : > { %v1987_v10 = vpop.f32.mrf.mxu2  ;;  %v1892_v24 = vpop.f32.mrf.mxu0 }
  0xdf   : > { %v1988_v12 = vadd.f32 %v1987_v10, %v1939_v48  ;;  %v2036_v14 = vpop.f32.mrf.mxu3  ;;  %v1893_v31 = vadd.f32 %v1892_v24, %v8592_v23  ;;  %v6261_v48 = vor.u32 %v7447_v36, %v6258_v44 }
  0xe0   : > { %v1941_v32 = vpop.f32.mrf.mxu1 }
  0xe1   : > { %v8699_v33 = vadd.f32 %v2036_v14, %v1988_v12  ;;  %v1942_v34 = vadd.f32 %v1941_v32, %v1893_v31  ;;  %2087 = vmatmul.bf16.gmra.mxu0 %v8692_v11  ;;  %2367 = vmatpush.bf16.msra.mxu2 %v6261_v48  ;;  %v7415_v32 = vld [vmem:[%s10507_s1 + $0x264] sm:$0xf]  ;;  %v7306_v48 = vld [vmem:[%s8208_s17 + $0xbc] sm:$0xf] }
  0xe3   : > { %2136 = vmatmul.bf16.gmra.mxu1 %v8694_v29  ;;  %6608 = vmatmul.msk.bf16.gmra.mxu2 %vm1848_vm0, %v8696_v30 }
  0xe4   : > { %2234 = vmatmul.bf16.gmra.mxu3 %v8357_v39  ;;  %v8741_v39 = vor.u32 %v7306_v48, %v5702_v63  ;;  %v5986_v48 = vld [vmem:[%s10507_s1 + $0x150] sm:$0xf0]  ;;  %v7475_v63 = vld [vmem:[%s10507_s1 + $0x444] sm:$0xf] }
  0xe6   : > { %v1990_v6 = vpop.f32.mrf.mxu2  ;;  %v1894_v12 = vpop.f32.mrf.mxu0  ;;  %10628 = vst [vmem:[#allocation36_spill] sm:$0xff] %v8741_v39 }
  0xe7   : > { %v1991_v9 = vadd.f32 %v1990_v6, %v1942_v34  ;;  %v2039_v10 = vpop.f32.mrf.mxu3  ;;  %v1895_v14 = vadd.f32 %v1894_v12, %v8592_v23  ;;  %v6130_v34 = vld [vmem:[%s10507_s1 + $0x270] sm:$0xf0]  ;;  %v7310_v6 = vld [vmem:[%s8208_s17 + $0xd8] sm:$0xf0] }
  0xe8   : > { %v1943_v24 = vpop.f32.mrf.mxu1  ;;  %v6133_v44 = vor.u32 %v7415_v32, %v6130_v34  ;;  %v8743_v30 = vor.u32 %v7310_v6, %v5708_v4  ;;  %v6370_v4 = vld [vmem:[%s10507_s1 + $0x450] sm:$0xf0] }
  0xe9   : > { %v8725_v31 = vadd.f32 %v2039_v10, %v1991_v9  ;;  %v1944_v36 = vadd.f32 %v1943_v24, %v1895_v14 }
  0xea   : > { %2318 = vmatpush.bf16.msra.mxu1 %v6133_v44  ;;  %10629 = vst [vmem:[#allocation37_spill] sm:$0xff] %v8743_v30  ;;  %v6242_v44 = vld [vmem:[%s10507_s1 + $0x350] sm:$0xf0] }
  0xee   : > { %v1992_v7 = vpop.f32.mrf.mxu2  ;;  %v1897_v12 = vpop.f32.mrf.mxu0 }
  0xef   : > { %v1993_v9 = vadd.f32 %v1992_v7, %v1944_v36  ;;  %v2041_v10 = vpop.f32.mrf.mxu3  ;;  %v1898_v14 = vadd.f32 %v1897_v12, %v8592_v23  ;;  %v7443_v36 = vld [vmem:[%s10507_s1 + $0x344] sm:$0xf]  ;;  %v5989_v7 = vor.u32 %v7379_v46, %v5986_v48 }
  0xf0   : > { %v1946_v24 = vpop.f32.mrf.mxu1  ;;  %v6245_v49 = vor.u32 %v7443_v36, %v6242_v44  ;;  %v7411_v46 = vld [vmem:[%s10507_s1 + $0x244] sm:$0xf] }
  0xf1   : > { %v8746_v32 = vadd.f32 %v2041_v10, %v1993_v9  ;;  %v1947_v34 = vadd.f32 %v1946_v24, %v1898_v14  ;;  %2092 = vmatmul.bf16.gmra.mxu0 %v8739_v8  ;;  %v6373_v9 = vor.u32 %v7475_v63, %v6370_v4  ;;  %v5728_v4 = vld [vmem:[%s8208_s17 + $0xf0] sm:$0xf] }
  0xf2   : > { %2368 = vmatpush.bf16.msra.mxu2 %v6245_v49  ;;  %2270 = vmatpush.bf16.msra.mxu0 %v5989_v7  ;;  %v7313_v49 = vld [vmem:[%s8208_s17 + $0xf4] sm:$0xf] }
  0xf3   : > { %2141 = vmatmul.bf16.gmra.mxu1 %v8741_v39  ;;  %6609 = vmatmul.msk.bf16.gmra.mxu2 %vm1848_vm0, %v8743_v30  ;;  %v7317_v30 = vld [vmem:[%s8208_s17 + $0x110] sm:$0xf0] }
  0xf4   : > { %2239 = vmatmul.bf16.gmra.mxu3 %v8395_v0  ;;  %v5730_v0 = vld [vmem:[%s8208_s17 + $0x10c] sm:$0xf0] }
  0xf5   : > { %2417 = vmatpush.bf16.msra.mxu3 %v6373_v9  ;;  %v8788_v29 = vor.u32 %v7313_v49, %v5730_v0  ;;  %v7439_v0 = vld [vmem:[%s10507_s1 + $0x324] sm:$0xf] }
  0xf6   : > { %v1995_v6 = vpop.f32.mrf.mxu2  ;;  %v1899_v14 = vpop.f32.mrf.mxu0 }
  0xf7   : > { %v1996_v10 = vadd.f32 %v1995_v6, %v1947_v34  ;;  %v2044_v12 = vpop.f32.mrf.mxu3  ;;  %v1900_v24 = vadd.f32 %v1899_v14, %v8592_v23  ;;  %v6114_v34 = vld [vmem:[%s10507_s1 + $0x250] sm:$0xf0]  ;;  %v7316_v6 = vld [vmem:[%s8208_s17 + $0x108] sm:$0xf0]  ;;  %v5736_v14 = vld [vmem:[%s8208_s17 + $0xf8] sm:$0xf] }
  0xf8   : > { %v1948_v36 = vpop.f32.mrf.mxu1  ;;  %v6117_v63 = vor.u32 %v7411_v46, %v6114_v34  ;;  %v8786_v9 = vor.u32 %v7316_v6, %v5728_v4  ;;  %10630 = vst [vmem:[#allocation38_spill] sm:$0xff] %v8788_v29  ;;  %v8790_v18 = vor.u32 %v7317_v30, %v5736_v14  ;;  %v7375_v30 = vld [vmem:[%s10507_s1 + $0x124] sm:$0xf]  ;;  %v6354_v6 = vld [vmem:[%s10507_s1 + $0x430] sm:$0xf0] }
  0xf9   : > { %v8772_v44 = vadd.f32 %v2044_v12, %v1996_v10  ;;  %v1949_v48 = vadd.f32 %v1948_v36, %v1900_v24  ;;  %v7471_v4 = vld [vmem:[%s10507_s1 + $0x424] sm:$0xf] }
  0xfa   : > { %2319 = vmatpush.bf16.msra.mxu1 %v6117_v63  ;;  %10631 = vst [vmem:[#allocation39_spill] sm:$0xff] %v8790_v18  ;;  %v5970_v63 = vld [vmem:[%s10507_s1 + $0x130] sm:$0xf0] }
  0xfb   : > { %v5973_v14 = vor.u32 %v7375_v30, %v5970_v63  ;;  %v7407_v30 = vld [vmem:[%s10507_s1 + $0x224] sm:$0xf] }
  0xfd   : > { %2271 = vmatpush.bf16.msra.mxu0 %v5973_v14 }
  0xfe   : > { %v1997_v7 = vpop.f32.mrf.mxu2  ;;  %v1902_v39 = vpop.f32.mrf.mxu0 }
  0xff   : > { %v1998_v10 = vadd.f32 %v1997_v7, %v1949_v48  ;;  %v2046_v12 = vpop.f32.mrf.mxu3  ;;  %v1903_v24 = vadd.f32 %v1902_v39, %v8592_v23  ;;  %v6226_v39 = vld [vmem:[%s10507_s1 + $0x330] sm:$0xf0]  ;;  %v6357_v7 = vor.u32 %v7471_v4, %v6354_v6  ;;  %v5756_v6 = vld [vmem:[%s8208_s17 + $0x128] sm:$0xf] }
 0x100   : > { %v1951_v36 = vpop.f32.mrf.mxu1  ;;  %v6229_v48 = vor.u32 %v7439_v0, %v6226_v39 }
 0x101   : > { %v8793_v46 = vadd.f32 %v2046_v12, %v1998_v10  ;;  %v1952_v34 = vadd.f32 %v1951_v36, %v1903_v24  ;;  %2097 = vmatmul.bf16.gmra.mxu0 %v8786_v9  ;;  %2418 = vmatpush.bf16.msra.mxu3 %v6357_v7 }
 0x102   : > { %2369 = vmatpush.bf16.msra.mxu2 %v6229_v48  ;;  %v7320_v48 = vld [vmem:[%s8208_s17 + $0x12c] sm:$0xf] }
 0x103   : > { %2146 = vmatmul.bf16.gmra.mxu1 %v8788_v29  ;;  %6610 = vmatmul.msk.bf16.gmra.mxu2 %vm1848_vm0, %v8790_v18  ;;  %v7324_v18 = vld [vmem:[%s8208_s17 + $0x148] sm:$0xf0] }
 0x104   : > { %2244 = vmatmul.bf16.gmra.mxu3 %v8433_v25  ;;  %v5758_v25 = vld [vmem:[%s8208_s17 + $0x144] sm:$0xf0] }
 0x105   : > { %v8835_v58 = vor.u32 %v7320_v48, %v5758_v25  ;;  %v6210_v25 = vld [vmem:[%s10507_s1 + $0x310] sm:$0xf0] }
 0x106   : > { %v2000_v49 = vpop.f32.mrf.mxu2  ;;  %v1904_v24 = vpop.f32.mrf.mxu0 }
 0x107   : > { %v2001_v10 = vadd.f32 %v2000_v49, %v1952_v34  ;;  %v2049_v12 = vpop.f32.mrf.mxu3  ;;  %v1905_v36 = vadd.f32 %v1904_v24, %v8592_v23  ;;  %v6098_v34 = vld [vmem:[%s10507_s1 + $0x230] sm:$0xf0]  ;;  %v7323_v49 = vld [vmem:[%s8208_s17 + $0x140] sm:$0xf0]  ;;  %v5764_v24 = vld [vmem:[%s8208_s17 + $0x130] sm:$0xf] }
 0x108   : > { %v1953_v0 = vpop.f32.mrf.mxu1  ;;  %v6101_v4 = vor.u32 %v7407_v30, %v6098_v34  ;;  %v8833_v7 = vor.u32 %v7323_v49, %v5756_v6  ;;  %10632 = vst [vmem:[#allocation40_spill] sm:$0xff] %v8835_v58  ;;  %v8837_v50 = vor.u32 %v7324_v18, %v5764_v24  ;;  %v7435_v18 = vld [vmem:[%s10507_s1 + $0x304] sm:$0xf]  ;;  %v6338_v49 = vld [vmem:[%s10507_s1 + $0x410] sm:$0xf0] }
 0x109   : > { %v8819_v39 = vadd.f32 %v2049_v12, %v2001_v10  ;;  %v1954_v63 = vadd.f32 %v1953_v0, %v1905_v36  ;;  %v7467_v6 = vld [vmem:[%s10507_s1 + $0x404] sm:$0xf] }
 0x10a   : > { %2320 = vmatpush.bf16.msra.mxu1 %v6101_v4  ;;  %10633 = vst [vmem:[#allocation41_spill] sm:$0xff] %v8837_v50  ;;  %v5954_v4 = vld [vmem:[%s10507_s1 + $0x110] sm:$0xf0] }
 0x10e   : > { %v2002_v14 = vpop.f32.mrf.mxu2  ;;  %v1907_v29 = vpop.f32.mrf.mxu0 }
 0x10f   : > { %v2003_v10 = vadd.f32 %v2002_v14, %v1954_v63  ;;  %v2051_v12 = vpop.f32.mrf.mxu3  ;;  %v1908_v36 = vadd.f32 %v1907_v29, %v8592_v23  ;;  %v7371_v29 = vld [vmem:[%s10507_s1 + $0x104] sm:$0xf]  ;;  %v6213_v63 = vor.u32 %v7435_v18, %v6210_v25  ;;  %v6341_v14 = vor.u32 %v7467_v6, %v6338_v49  ;;  %v5784_v49 = vld [vmem:[%s8208_s17 + $0x160] sm:$0xf] }
 0x110   : > { %v1956_v0 = vpop.f32.mrf.mxu1  ;;  %v5957_v24 = vor.u32 %v7371_v29, %v5954_v4  ;;  %v7403_v29 = vld [vmem:[%s10507_s1 + $0x204] sm:$0xf] }
 0x111   : > { %v8840_v30 = vadd.f32 %v2051_v12, %v2003_v10  ;;  %v1957_v34 = vadd.f32 %v1956_v0, %v1908_v36  ;;  %2102 = vmatmul.bf16.gmra.mxu0 %v8833_v7  ;;  %2370 = vmatpush.bf16.msra.mxu2 %v6213_v63  ;;  %v7327_v63 = vld [vmem:[%s8208_s17 + $0x164] sm:$0xf] }
 0x112   : > { %2272 = vmatpush.bf16.msra.mxu0 %v5957_v24  ;;  %2419 = vmatpush.bf16.msra.mxu3 %v6341_v14 }
 0x113   : > { %2151 = vmatmul.bf16.gmra.mxu1 %v8835_v58  ;;  %6611 = vmatmul.msk.bf16.gmra.mxu2 %vm1848_vm0, %v8837_v50  ;;  %v7331_v50 = vld [vmem:[%s8208_s17 + $0x180] sm:$0xf0] }
 0x114   : > { %2249 = vmatmul.bf16.gmra.mxu3 %v8471_v53  ;;  %v5786_v53 = vld [vmem:[%s8208_s17 + $0x17c] sm:$0xf0] }
 0x115   : > { %v8882_v47 = vor.u32 %v7327_v63, %v5786_v53  ;;  %v5944_v53 = vld [vmem:[%s10507_s1 + $0xe8] sm:$0xf] }
 0x116   : > { %v2005_v48 = vpop.f32.mrf.mxu2  ;;  %v1909_v36 = vpop.f32.mrf.mxu0 }
 0x117   : > { %v2006_v10 = vadd.f32 %v2005_v48, %v1957_v34  ;;  %v2054_v12 = vpop.f32.mrf.mxu3  ;;  %v1910_v0 = vadd.f32 %v1909_v36, %v8592_v23  ;;  %v6082_v34 = vld [vmem:[%s10507_s1 + $0x210] sm:$0xf0]  ;;  %v7330_v48 = vld [vmem:[%s8208_s17 + $0x178] sm:$0xf0]  ;;  %v5792_v36 = vld [vmem:[%s8208_s17 + $0x168] sm:$0xf] }
 0x118   : > { %v1958_v18 = vpop.f32.mrf.mxu1  ;;  %v6085_v6 = vor.u32 %v7403_v29, %v6082_v34  ;;  %v8880_v14 = vor.u32 %v7330_v48, %v5784_v49  ;;  %10635 = vst [vmem:[#allocation43_spill] sm:$0xff] %v8882_v47  ;;  %v8884_v38 = vor.u32 %v7331_v50, %v5792_v36  ;;  %v7370_v50 = vld [vmem:[%s10507_s1 + $0xf4] sm:$0xf0]  ;;  %v6072_v49 = vld [vmem:[%s10507_s1 + $0x1e8] sm:$0xf] }
 0x119   : > { %v8866_v25 = vadd.f32 %v2054_v12, %v2006_v10  ;;  %v1959_v4 = vadd.f32 %v1958_v18, %v1910_v0  ;;  %v7402_v48 = vld [vmem:[%s10507_s1 + $0x1f4] sm:$0xf0] }
 0x11a   : > { %2321 = vmatpush.bf16.msra.mxu1 %v6085_v6  ;;  %10634 = vst [vmem:[#allocation42_spill] sm:$0xff] %v8880_v14  ;;  %v6578_v6 = vld [vmem:[%s10507_s1 + $0x5f0] sm:$0xf0] }
 0x11b   : > { %10636 = vst [vmem:[#allocation44_spill] sm:$0xff] %v8884_v38 }
 0x11e   : > { %v2007_v24 = vpop.f32.mrf.mxu2  ;;  %v1912_v58 = vpop.f32.mrf.mxu0 }
 0x11f   : > { %v2008_v10 = vadd.f32 %v2007_v24, %v1959_v4  ;;  %v2056_v12 = vpop.f32.mrf.mxu3  ;;  %v1913_v0 = vadd.f32 %v1912_v58, %v8592_v23  ;;  %v7527_v58 = vld [vmem:[%s10507_s1 + $0x5e4] sm:$0xf]  ;;  %v5945_v4 = vor.u32 %v7370_v50, %v5944_v53  ;;  %v6073_v24 = vor.u32 %v7402_v48, %v6072_v49  ;;  %v5812_v48 = vld [vmem:[%s8208_s17 + $0x198] sm:$0xf] }
 0x120   : > { %v1961_v18 = vpop.f32.mrf.mxu1  ;;  %v6581_v36 = vor.u32 %v7527_v58, %v6578_v6  ;;  %v7531_v58 = vld [vmem:[%s10507_s1 + $0x604] sm:$0xf] }
 0x121   : > { %v8887_v29 = vadd.f32 %v2056_v12, %v2008_v10  ;;  %v1962_v34 = vadd.f32 %v1961_v18, %v1913_v0  ;;  %2107 = vmatmul.bf16.gmra.mxu0 %v8880_v14  ;;  %2559 = vmatpush.bf16.msrb.mxu2 %v5945_v4  ;;  %v7334_v4 = vld [vmem:[%s8208_s17 + $0x19c] sm:$0xf] }
 0x122   : > { %2461 = vmatpush.bf16.msrb.mxu0 %v6581_v36  ;;  %2608 = vmatpush.bf16.msrb.mxu3 %v6073_v24 }
 0x123   : > { %2156 = vmatmul.bf16.gmra.mxu1 %v8882_v47  ;;  %6612 = vmatmul.msk.bf16.gmra.mxu2 %vm1848_vm0, %v8884_v38  ;;  %v7338_v38 = vld [vmem:[%s8208_s17 + $0x1b8] sm:$0xf0] }
 0x124   : > { %2254 = vmatmul.bf16.gmra.mxu3 %v8509_v15  ;;  %v5814_v15 = vld [vmem:[%s8208_s17 + $0x1b4] sm:$0xf0] }
 0x125   : > { %v8929_v37 = vor.u32 %v7334_v4, %v5814_v15  ;;  %v5928_v15 = vld [vmem:[%s10507_s1 + $0xc8] sm:$0xf] }
 0x126   : > { %v2010_v63 = vpop.f32.mrf.mxu2  ;;  %v1914_v0 = vpop.f32.mrf.mxu0 }
 0x127   : > { %v2011_v10 = vadd.f32 %v2010_v63, %v1962_v34  ;;  %v2059_v12 = vpop.f32.mrf.mxu3  ;;  %v1915_v18 = vadd.f32 %v1914_v0, %v8592_v23  ;;  %v6594_v34 = vld [vmem:[%s10507_s1 + $0x610] sm:$0xf0]  ;;  %v5820_v0 = vld [vmem:[%s8208_s17 + $0x1a0] sm:$0xf]  ;;  %10638 = vst [vmem:[#allocation46_spill] sm:$0xff] %v8929_v37 }
 0x128   : > { %v1963_v53 = vpop.f32.mrf.mxu1  ;;  %v6597_v49 = vor.u32 %v7531_v58, %v6594_v34  ;;  %v7337_v63 = vld [vmem:[%s8208_s17 + $0x1b0] sm:$0xf0]  ;;  %v8931_v62 = vor.u32 %v7338_v38, %v5820_v0  ;;  %v7523_v38 = vld [vmem:[%s10507_s1 + $0x5c4] sm:$0xf] }
 0x129   : > { %v8913_v50 = vadd.f32 %v2059_v12, %v2011_v10  ;;  %v1964_v6 = vadd.f32 %v1963_v53, %v1915_v18  ;;  %v8927_v24 = vor.u32 %v7337_v63, %v5812_v48  ;;  %v6056_v48 = vld [vmem:[%s10507_s1 + $0x1c8] sm:$0xf]  ;;  %v7398_v63 = vld [vmem:[%s10507_s1 + $0x1d4] sm:$0xf0] }
 0x12a   : > { %2517 = vmatpush.bf16.msrb.mxu1 %v6597_v49  ;;  %10639 = vst [vmem:[#allocation47_spill] sm:$0xff] %v8931_v62  ;;  %v6562_v49 = vld [vmem:[%s10507_s1 + $0x5d0] sm:$0xf0] }
 0x12b   : > { %10637 = vst [vmem:[#allocation45_spill] sm:$0xff] %v8927_v24  ;;  %v6565_v0 = vor.u32 %v7523_v38, %v6562_v49 }
 0x12d   : > { %2462 = vmatpush.bf16.msrb.mxu0 %v6565_v0 }
 0x12e   : > { %v2012_v36 = vpop.f32.mrf.mxu2  ;;  %v1917_v47 = vpop.f32.mrf.mxu0 }
 0x12f   : > { %v2013_v10 = vadd.f32 %v2012_v36, %v1964_v6  ;;  %v2061_v12 = vpop.f32.mrf.mxu3  ;;  %v1918_v18 = vadd.f32 %v1917_v47, %v8592_v23  ;;  %v7366_v47 = vld [vmem:[%s10507_s1 + $0xd4] sm:$0xf0]  ;;  %v6057_v36 = vor.u32 %v7398_v63, %v6056_v48 }
 0x130   : > { %v1966_v53 = vpop.f32.mrf.mxu1  ;;  %v5929_v6 = vor.u32 %v7366_v47, %v5928_v15 }
 0x131   : > { %v8934_v58 = vadd.f32 %v2061_v12, %v2013_v10  ;;  %v1967_v34 = vadd.f32 %v1966_v53, %v1918_v18  ;;  %2112 = vmatmul.bf16.gmra.mxu0 %v8927_v24  ;;  %2609 = vmatpush.bf16.msrb.mxu3 %v6057_v36 }
 0x132   : > { %2560 = vmatpush.bf16.msrb.mxu2 %v5929_v6 }
 0x133   : > { %2161 = vmatmul.bf16.gmra.mxu1 %v8929_v37  ;;  %6613 = vmatmul.msk.bf16.gmra.mxu2 %vm1848_vm0, %v8931_v62 }
 0x134   : > { %2259 = vmatmul.bf16.gmra.mxu3 %v8553_v59 }
 0x136   : > { %v2015_v4 = vpop.f32.mrf.mxu2  ;;  %v1919_v18 = vpop.f32.mrf.mxu0 }
 0x137   : > { %v2016_v10 = vadd.f32 %v2015_v4, %v1967_v34  ;;  %v2064_v12 = vpop.f32.mrf.mxu3  ;;  %v1920_v53 = vadd.f32 %v1919_v18, %v8592_v23  ;;  %v6546_v23 = vld [vmem:[%s10507_s1 + $0x5b0] sm:$0xf0] }
 0x138   : > { %v1968_v15 = vpop.f32.mrf.mxu1 }
 0x139   : > { %v8960_v47 = vadd.f32 %v2064_v12, %v2016_v10  ;;  %v1969_v59 = vadd.f32 %v1968_v15, %v1920_v53 }
 0x13e   : > { %v2017_v62 = vpop.f32.mrf.mxu2  ;;  %v2078_v61 = vpop.f32.mrf.mxu0 }
 0x13f   : > { %v2018_v37 = vadd.f32 %v2017_v62, %v1969_v59  ;;  %v2066_v24 = vpop.f32.mrf.mxu3  ;;  %v2079_v60 = vadd.f32 %v2078_v61, %v8631_v13  ;;  %v5912_v59 = vld [vmem:[%s10507_s1 + $0xa8] sm:$0xf]  ;;  %v7362_v61 = vld [vmem:[%s10507_s1 + $0xb4] sm:$0xf0] }
 0x140   : > { %v2127_v38 = vpop.f32.mrf.mxu1  ;;  %v5913_v62 = vor.u32 %v7362_v61, %v5912_v59  ;;  %v7394_v13 = vld [vmem:[%s10507_s1 + $0x1b4] sm:$0xf0] }
 0x141   : > { %v8963_v49 = vadd.f32 %v2066_v24, %v2018_v37  ;;  %v2128_v34 = vadd.f32 %v2127_v38, %v2079_v60  ;;  %2273 = vmatmul.bf16.vlgmr.msra.gmra.mxu0 %v8265_v51  ;;  %v7519_v60 = vld [vmem:[%s10507_s1 + $0x5a4] sm:$0xf]  ;;  %v6040_v37 = vld [vmem:[%s10507_s1 + $0x1a8] sm:$0xf] }
 0x142   : > { %v6549_v6 = vor.u32 %v7519_v60, %v6546_v23  ;;  %v6041_v48 = vor.u32 %v7394_v13, %v6040_v37  ;;  %2561 = vmatpush.bf16.msrb.mxu2 %v5913_v62  ;;  %v7515_v37 = vld [vmem:[%s10507_s1 + $0x584] sm:$0xf] }
 0x143   : > { %2322 = vmatmul.bf16.vlgmr.msra.gmra.mxu1 %v8267_v52  ;;  %2371 = vmatmul.bf16.vlgmr.msra.gmra.mxu2 %v8275_v55 }
 0x144   : > { %2420 = vmatmul.bf16.vlgmr.msra.gmra.mxu3 %v8600_v35  ;;  %2463 = vmatpush.bf16.msrb.mxu0 %v6549_v6  ;;  %v6024_v6 = vld [vmem:[%s10507_s1 + $0x188] sm:$0xf] }
 0x145   : > { %2610 = vmatpush.bf16.msrb.mxu3 %v6041_v48  ;;  %v7390_v48 = vld [vmem:[%s10507_s1 + $0x194] sm:$0xf0] }
 0x146   : > { %v2176_v24 = vpop.f32.mrf.mxu2  ;;  %v2080_v0 = vpop.f32.mrf.mxu0 }
 0x147   : > { %v2177_v63 = vadd.f32 %v2176_v24, %v2128_v34  ;;  %v8987_v4 = vpop.f32.mrf.mxu3  ;;  %v2081_v36 = vadd.f32 %v2080_v0, %v8652_v5  ;;  %v5896_v5 = vld [vmem:[%s10507_s1 + $0x88] sm:$0xf]  ;;  %v6530_v24 = vld [vmem:[%s10507_s1 + $0x590] sm:$0xf0] }
 0x148   : > { %v2129_v10 = vpop.f32.mrf.mxu1  ;;  %v6533_v0 = vor.u32 %v7515_v37, %v6530_v24 }
 0x149   : > { %v2130_v12 = vadd.f32 %v2129_v10, %v2081_v36  ;;  %v3245_v60 = vmax.f32 %v2177_v63, 0.0  ;;  %v6025_v36 = vor.u32 %v7390_v48, %v6024_v6  ;;  %v7511_v48 = vld [vmem:[%s10507_s1 + $0x564] sm:$0xf] }
 0x14a   : > { %2464 = vmatpush.bf16.msrb.mxu0 %v6533_v0  ;;  %v6514_v0 = vld [vmem:[%s10507_s1 + $0x570] sm:$0xf0] }
 0x14b   : > { %2611 = vmatpush.bf16.msrb.mxu3 %v6025_v36  ;;  %v6008_v36 = vld [vmem:[%s10507_s1 + $0x168] sm:$0xf] }
 0x14e   : > { %v2178_v18 = vpop.f32.mrf.mxu2  ;;  %v2083_v38 = vpop.f32.mrf.mxu0 }
 0x14f   : > { %v2179_v53 = vadd.f32 %v2178_v18, %v2130_v12  ;;  %v8990_v15 = vpop.f32.mrf.mxu3  ;;  %v2084_v59 = vadd.f32 %v2083_v38, %v8678_v43  ;;  %v7358_v43 = vld [vmem:[%s10507_s1 + $0x94] sm:$0xf0] }
 0x150   : > { %v2132_v61 = vpop.f32.mrf.mxu1  ;;  %v5897_v13 = vor.u32 %v7358_v43, %v5896_v5 }
 0x151   : > { %v3249_v34 = vmax.f32 %v2179_v53, 0.0  ;;  %v2133_v23 = vadd.f32 %v2132_v61, %v2084_v59  ;;  %2278 = vmatmul.bf16.gmra.mxu0 %v8321_v19 }
 0x152   : > { %2562 = vmatpush.bf16.msrb.mxu2 %v5897_v13 }
 0x153   : > { %v8994_v62 = vpack.c.bf16 %v3249_v34, %v3245_v60  ;;  %2327 = vmatmul.bf16.gmra.mxu1 %v8323_v20  ;;  %2376 = vmatmul.bf16.gmra.mxu2 %v8325_v21 }
 0x154   : > { %2425 = vmatmul.bf16.gmra.mxu3 %v8645_v45 }
 0x155   : > { %10640 = vst [vmem:[#allocation48_spill] sm:$0xff] %v8994_v62 }
 0x156   : > { %v2181_v63 = vpop.f32.mrf.mxu2  ;;  %v2085_v18 = vpop.f32.mrf.mxu0 }
 0x157   : > { %v2182_v10 = vadd.f32 %v2181_v63, %v2133_v23  ;;  %v9017_v12 = vpop.f32.mrf.mxu3  ;;  %v2086_v53 = vadd.f32 %v2085_v18, %v8699_v33  ;;  %v5880_v33 = vld [vmem:[%s10507_s1 + $0x68] sm:$0xf] }
 0x158   : > { %v2134_v38 = vpop.f32.mrf.mxu1 }
 0x159   : > { %v2135_v59 = vadd.f32 %v2134_v38, %v2086_v53  ;;  %v3253_v24 = vmax.f32 %v2182_v10, 0.0  ;;  %v7386_v10 = vld [vmem:[%s10507_s1 + $0x174] sm:$0xf0]  ;;  %v6517_v53 = vor.u32 %v7511_v48, %v6514_v0 }
 0x15a   : > { %v6009_v38 = vor.u32 %v7386_v10, %v6008_v36 }
 0x15b   : > { %2465 = vmatpush.bf16.msrb.mxu0 %v6517_v53  ;;  %v5992_v53 = vld [vmem:[%s10507_s1 + $0x148] sm:$0xf] }
 0x15c   : > { %2612 = vmatpush.bf16.msrb.mxu3 %v6009_v38  ;;  %v7382_v38 = vld [vmem:[%s10507_s1 + $0x154] sm:$0xf0] }
 0x15e   : > { %v2183_v61 = vpop.f32.mrf.mxu2  ;;  %v2088_v5 = vpop.f32.mrf.mxu0 }
 0x15f   : > { %v2184_v60 = vadd.f32 %v2183_v61, %v2135_v59  ;;  %v9020_v34 = vpop.f32.mrf.mxu3  ;;  %v2089_v43 = vadd.f32 %v2088_v5, %v8725_v31  ;;  %v7354_v31 = vld [vmem:[%s10507_s1 + $0x74] sm:$0xf0] }
 0x160   : > { %v2137_v37 = vpop.f32.mrf.mxu1  ;;  %v5881_v63 = vor.u32 %v7354_v31, %v5880_v33 }
 0x161   : > { %v3257_v23 = vmax.f32 %v2184_v60, 0.0  ;;  %v2138_v6 = vadd.f32 %v2137_v37, %v2089_v43  ;;  %2283 = vmatmul.bf16.gmra.mxu0 %v8359_v40 }
 0x162   : > { %2563 = vmatpush.bf16.msrb.mxu2 %v5881_v63 }
 0x163   : > { %v9024_v13 = vpack.c.bf16 %v3257_v23, %v3253_v24  ;;  %2332 = vmatmul.bf16.gmra.mxu1 %v8361_v41  ;;  %2381 = vmatmul.bf16.gmra.mxu2 %v8363_v42 }
 0x164   : > { %2430 = vmatmul.bf16.gmra.mxu3 %v8692_v11 }
 0x165   : > { %10641 = vst [vmem:[#allocation49_spill] sm:$0xff] %v9024_v13 }
 0x166   : > { %v2186_v18 = vpop.f32.mrf.mxu2  ;;  %v2090_v60 = vpop.f32.mrf.mxu0 }
 0x167   : > { %v2187_v59 = vadd.f32 %v2186_v18, %v2138_v6  ;;  %v9047_v61 = vpop.f32.mrf.mxu3  ;;  %v2091_v5 = vadd.f32 %v2090_v60, %v8746_v32  ;;  %v5864_v32 = vld [vmem:[%s10507_s1 + $0x48] sm:$0xf]  ;;  %v6498_v18 = vld [vmem:[%s10507_s1 + $0x550] sm:$0xf0] }
 0x168   : > { %v2139_v43 = vpop.f32.mrf.mxu1 }
 0x169   : > { %v2140_v37 = vadd.f32 %v2139_v43, %v2091_v5  ;;  %v3261_v0 = vmax.f32 %v2187_v59, 0.0  ;;  %v5993_v5 = vor.u32 %v7382_v38, %v5992_v53 }
 0x16b   : > { %2613 = vmatpush.bf16.msrb.mxu3 %v5993_v5  ;;  %v7378_v5 = vld [vmem:[%s10507_s1 + $0x134] sm:$0xf0] }
 0x16e   : > { %v2188_v24 = vpop.f32.mrf.mxu2  ;;  %v2093_v31 = vpop.f32.mrf.mxu0 }
 0x16f   : > { %v2189_v23 = vadd.f32 %v2188_v24, %v2140_v37  ;;  %v9050_v33 = vpop.f32.mrf.mxu3  ;;  %v2094_v13 = vadd.f32 %v2093_v31, %v8772_v44  ;;  %v7350_v44 = vld [vmem:[%s10507_s1 + $0x54] sm:$0xf0] }
 0x170   : > { %v2142_v48 = vpop.f32.mrf.mxu1  ;;  %v5865_v10 = vor.u32 %v7350_v44, %v5864_v32 }
 0x171   : > { %v3265_v6 = vmax.f32 %v2189_v23, 0.0  ;;  %v2143_v36 = vadd.f32 %v2142_v48, %v2094_v13  ;;  %2288 = vmatmul.bf16.gmra.mxu0 %v8397_v1  ;;  %v7507_v13 = vld [vmem:[%s10507_s1 + $0x544] sm:$0xf] }
 0x172   : > { %v6501_v60 = vor.u32 %v7507_v13, %v6498_v18  ;;  %2564 = vmatpush.bf16.msrb.mxu2 %v5865_v10 }
 0x173   : > { %v9054_v63 = vpack.c.bf16 %v3265_v6, %v3261_v0  ;;  %2337 = vmatmul.bf16.gmra.mxu1 %v8399_v2  ;;  %2386 = vmatmul.bf16.gmra.mxu2 %v8401_v3 }
 0x174   : > { %2435 = vmatmul.bf16.gmra.mxu3 %v8739_v8  ;;  %2466 = vmatpush.bf16.msrb.mxu0 %v6501_v60  ;;  %v5976_v60 = vld [vmem:[%s10507_s1 + $0x128] sm:$0xf] }
 0x175   : > { %10642 = vst [vmem:[#allocation50_spill] sm:$0xff] %v9054_v63 }
 0x176   : > { %v2191_v59 = vpop.f32.mrf.mxu2  ;;  %v2095_v24 = vpop.f32.mrf.mxu0 }
 0x177   : > { %v2192_v43 = vadd.f32 %v2191_v59, %v2143_v36  ;;  %v9077_v37 = vpop.f32.mrf.mxu3  ;;  %v2096_v23 = vadd.f32 %v2095_v24, %v8793_v46  ;;  %v5848_v46 = vld [vmem:[%s10507_s1 + $0x28] sm:$0xf]  ;;  %v6482_v59 = vld [vmem:[%s10507_s1 + $0x530] sm:$0xf0] }
 0x178   : > { %v2144_v31 = vpop.f32.mrf.mxu1 }
 0x179   : > { %v2145_v48 = vadd.f32 %v2144_v31, %v2096_v23  ;;  %v3269_v18 = vmax.f32 %v2192_v43, 0.0  ;;  %v5977_v23 = vor.u32 %v7378_v5, %v5976_v60 }
 0x17b   : > { %2614 = vmatpush.bf16.msrb.mxu3 %v5977_v23  ;;  %v7374_v23 = vld [vmem:[%s10507_s1 + $0x114] sm:$0xf0] }
 0x17e   : > { %v2193_v0 = vpop.f32.mrf.mxu2  ;;  %v2098_v44 = vpop.f32.mrf.mxu0 }
 0x17f   : > { %v2194_v6 = vadd.f32 %v2193_v0, %v2145_v48  ;;  %v9080_v32 = vpop.f32.mrf.mxu3  ;;  %v2099_v63 = vadd.f32 %v2098_v44, %v8819_v39  ;;  %v7346_v39 = vld [vmem:[%s10507_s1 + $0x34] sm:$0xf0] }
 0x180   : > { %v2147_v13 = vpop.f32.mrf.mxu1  ;;  %v5849_v38 = vor.u32 %v7346_v39, %v5848_v46 }
 0x181   : > { %v3273_v36 = vmax.f32 %v2194_v6, 0.0  ;;  %v2148_v53 = vadd.f32 %v2147_v13, %v2099_v63  ;;  %2293 = vmatmul.bf16.gmra.mxu0 %v8435_v26  ;;  %v7503_v63 = vld [vmem:[%s10507_s1 + $0x524] sm:$0xf] }
 0x182   : > { %v6485_v24 = vor.u32 %v7503_v63, %v6482_v59  ;;  %2565 = vmatpush.bf16.msrb.mxu2 %v5849_v38 }
 0x183   : > { %v9084_v10 = vpack.c.bf16 %v3273_v36, %v3269_v18  ;;  %2342 = vmatmul.bf16.gmra.mxu1 %v8437_v27  ;;  %2391 = vmatmul.bf16.gmra.mxu2 %v8439_v28 }
 0x184   : > { %2440 = vmatmul.bf16.gmra.mxu3 %v8786_v9  ;;  %2467 = vmatpush.bf16.msrb.mxu0 %v6485_v24  ;;  %v5960_v24 = vld [vmem:[%s10507_s1 + $0x108] sm:$0xf] }
 0x185   : > { %10643 = vst [vmem:[#allocation51_spill] sm:$0xff] %v9084_v10 }
 0x186   : > { %v2196_v43 = vpop.f32.mrf.mxu2  ;;  %v2100_v0 = vpop.f32.mrf.mxu0 }
 0x187   : > { %v2197_v31 = vadd.f32 %v2196_v43, %v2148_v53  ;;  %v9107_v48 = vpop.f32.mrf.mxu3  ;;  %v2101_v6 = vadd.f32 %v2100_v0, %v8840_v30  ;;  %v5832_v30 = vld [vmem:[%s10507_s1 + $0x8] sm:$0xf]  ;;  %v6466_v43 = vld [vmem:[%s10507_s1 + $0x510] sm:$0xf0] }
 0x188   : > { %v2149_v44 = vpop.f32.mrf.mxu1 }
 0x189   : > { %v2150_v13 = vadd.f32 %v2149_v44, %v2101_v6  ;;  %v3277_v59 = vmax.f32 %v2197_v31, 0.0  ;;  %v5961_v6 = vor.u32 %v7374_v23, %v5960_v24 }
 0x18b   : > { %2615 = vmatpush.bf16.msrb.mxu3 %v5961_v6  ;;  %v7530_v6 = vld [vmem:[%s10507_s1 + $0x5f4] sm:$0xf0] }
 0x18e   : > { %v2198_v18 = vpop.f32.mrf.mxu2  ;;  %v2103_v39 = vpop.f32.mrf.mxu0 }
 0x18f   : > { %v2199_v36 = vadd.f32 %v2198_v18, %v2150_v13  ;;  %v9110_v46 = vpop.f32.mrf.mxu3  ;;  %v2104_v10 = vadd.f32 %v2103_v39, %v8866_v25  ;;  %v7342_v25 = vld [vmem:[%s10507_s1 + $0x14] sm:$0xf0] }
 0x190   : > { %v2152_v63 = vpop.f32.mrf.mxu1  ;;  %v5833_v5 = vor.u32 %v7342_v25, %v5832_v30 }
 0x191   : > { %v3281_v53 = vmax.f32 %v2199_v36, 0.0  ;;  %v2153_v60 = vadd.f32 %v2152_v63, %v2104_v10  ;;  %2298 = vmatmul.bf16.gmra.mxu0 %v8473_v54  ;;  %v7499_v10 = vld [vmem:[%s10507_s1 + $0x504] sm:$0xf] }
 0x192   : > { %v6469_v0 = vor.u32 %v7499_v10, %v6466_v43  ;;  %2566 = vmatpush.bf16.msrb.mxu2 %v5833_v5 }
 0x193   : > { %v9114_v38 = vpack.c.bf16 %v3281_v53, %v3277_v59  ;;  %2347 = vmatmul.bf16.gmra.mxu1 %v8475_v56  ;;  %2396 = vmatmul.bf16.gmra.mxu2 %v8477_v57 }
 0x194   : > { %2445 = vmatmul.bf16.gmra.mxu3 %v8833_v7  ;;  %2468 = vmatpush.bf16.msrb.mxu0 %v6469_v0  ;;  %v6584_v0 = vld [vmem:[%s10507_s1 + $0x5e8] sm:$0xf] }
 0x195   : > { %10644 = vst [vmem:[#allocation52_spill] sm:$0xff] %v9114_v38 }
 0x196   : > { %v2201_v31 = vpop.f32.mrf.mxu2  ;;  %v2105_v18 = vpop.f32.mrf.mxu0 }
 0x197   : > { %v2202_v44 = vadd.f32 %v2201_v31, %v2153_v60  ;;  %v9137_v13 = vpop.f32.mrf.mxu3  ;;  %v2106_v36 = vadd.f32 %v2105_v18, %v8887_v29  ;;  %v6456_v29 = vld [vmem:[%s10507_s1 + $0x4e8] sm:$0xf]  ;;  %v7434_v31 = vld [vmem:[%s10507_s1 + $0x2f4] sm:$0xf0] }
 0x198   : > { %v2154_v39 = vpop.f32.mrf.mxu1 }
 0x199   : > { %v2155_v63 = vadd.f32 %v2154_v39, %v2106_v36  ;;  %v3285_v43 = vmax.f32 %v2202_v44, 0.0  ;;  %v6585_v36 = vor.u32 %v7530_v6, %v6584_v0 }
 0x19b   : > { %2804 = vmatpush.bf16.msra.mxu3 %v6585_v36 }
 0x19e   : > { %v2203_v59 = vpop.f32.mrf.mxu2  ;;  %v2108_v25 = vpop.f32.mrf.mxu0 }
 0x19f   : > { %v2204_v53 = vadd.f32 %v2203_v59, %v2155_v63  ;;  %v9140_v30 = vpop.f32.mrf.mxu3  ;;  %v2109_v38 = vadd.f32 %v2108_v25, %v8913_v50  ;;  %v7498_v50 = vld [vmem:[%s10507_s1 + $0x4f4] sm:$0xf0] }
 0x1a0   : > { %v2157_v10 = vpop.f32.mrf.mxu1  ;;  %v6457_v23 = vor.u32 %v7498_v50, %v6456_v29 }
 0x1a1   : > { %v3289_v60 = vmax.f32 %v2204_v53, 0.0  ;;  %v2158_v24 = vadd.f32 %v2157_v10, %v2109_v38  ;;  %2303 = vmatmul.bf16.gmra.mxu0 %v8511_v16  ;;  %v6200_v38 = vld [vmem:[%s10507_s1 + $0x2e8] sm:$0xf] }
 0x1a2   : > { %v6201_v18 = vor.u32 %v7434_v31, %v6200_v38  ;;  %2755 = vmatpush.bf16.msra.mxu2 %v6457_v23  ;;  %v6328_v10 = vld [vmem:[%s10507_s1 + $0x3e8] sm:$0xf] }
 0x1a3   : > { %v9144_v5 = vpack.c.bf16 %v3289_v60, %v3285_v43  ;;  %2352 = vmatmul.bf16.gmra.mxu1 %v8513_v17  ;;  %2401 = vmatmul.bf16.gmra.mxu2 %v8515_v22  ;;  %v7466_v43 = vld [vmem:[%s10507_s1 + $0x3f4] sm:$0xf0] }
 0x1a4   : > { %2450 = vmatmul.bf16.gmra.mxu3 %v8880_v14  ;;  %2657 = vmatpush.bf16.msra.mxu0 %v6201_v18  ;;  %v6329_v29 = vor.u32 %v7466_v43, %v6328_v10  ;;  %v10646_v18 = vld [vmem:[#allocation26_spill] sm:$0xff]  ;;  %v6440_v10 = vld [vmem:[%s10507_s1 + $0x4c8] sm:$0xf] }
 0x1a5   : > { %10645 = vst [vmem:[#allocation53_spill] sm:$0xff] %v9144_v5  ;;  %v7462_v5 = vld [vmem:[%s10507_s1 + $0x3d4] sm:$0xf0] }
 0x1a6   : > { %v2206_v44 = vpop.f32.mrf.mxu2  ;;  %v2110_v59 = vpop.f32.mrf.mxu0  ;;  %2706 = vmatpush.bf16.msra.mxu1 %v6329_v29  ;;  %v6568_v29 = vld [vmem:[%s10507_s1 + $0x5c8] sm:$0xf] }
 0x1a7   : > { %v2207_v39 = vadd.f32 %v2206_v44, %v2158_v24  ;;  %v9167_v63 = vpop.f32.mrf.mxu3  ;;  %v2111_v53 = vadd.f32 %v2110_v59, %v8934_v58  ;;  %v10648_v59 = vld [vmem:[#allocation27_spill] sm:$0xff] }
 0x1a8   : > { %v2159_v25 = vpop.f32.mrf.mxu1 }
 0x1a9   : > { %v2160_v60 = vadd.f32 %v2159_v25, %v2111_v53  ;;  %v3293_v0 = vmax.f32 %v2207_v39, 0.0  ;;  %v10649_v53 = vld [vmem:[#allocation28_spill] sm:$0xff]  ;;  %v10650_v25 = vld [vmem:[#allocation45_spill] sm:$0xff] }
 0x1aa   : > { %v6184_v39 = vld [vmem:[%s10507_s1 + $0x2c8] sm:$0xf] }
 0x1ae   : > { %v2208_v24 = vpop.f32.mrf.mxu2  ;;  %v2113_v23 = vpop.f32.mrf.mxu0 }
 0x1af   : > { %v2209_v50 = vadd.f32 %v2208_v24, %v2160_v60  ;;  %v9176_v38 = vpop.f32.mrf.mxu3  ;;  %v2114_v58 = vadd.f32 %v2113_v23, %v8960_v47  ;;  %v7494_v47 = vld [vmem:[%s10507_s1 + $0x4d4] sm:$0xf0] }
 0x1b0   : > { %v2162_v31 = vpop.f32.mrf.mxu1  ;;  %v6441_v43 = vor.u32 %v7494_v47, %v6440_v10  ;;  %v7430_v60 = vld [vmem:[%s10507_s1 + $0x2d4] sm:$0xf0] }
 0x1b1   : > { %v3297_v6 = vmax.f32 %v2209_v50, 0.0  ;;  %v2163_v44 = vadd.f32 %v2162_v31, %v2114_v58  ;;  %2308 = vmatmul.bf16.gmra.mxu0 %v10646_v18  ;;  %v7526_v24 = vld [vmem:[%s10507_s1 + $0x5d4] sm:$0xf0]  ;;  %v6185_v23 = vor.u32 %v7430_v60, %v6184_v39 }
 0x1b2   : > { %v6569_v58 = vor.u32 %v7526_v24, %v6568_v29  ;;  %2756 = vmatpush.bf16.msra.mxu2 %v6441_v43 }
 0x1b3   : > { %v9180_v36 = vpack.c.bf16 %v3297_v6, %v3293_v0  ;;  %2357 = vmatmul.bf16.gmra.mxu1 %v10648_v59  ;;  %2406 = vmatmul.bf16.gmra.mxu2 %v10649_v53  ;;  %v10651_v59 = vld [vmem:[#allocation30_spill] sm:$0xff] }
 0x1b4   : > { %2455 = vmatmul.bf16.gmra.mxu3 %v10650_v25  ;;  %2658 = vmatpush.bf16.msra.mxu0 %v6185_v23 }
 0x1b5   : > { %10647 = vst [vmem:[#allocation54_spill] sm:$0xff] %v9180_v36  ;;  %2805 = vmatpush.bf16.msra.mxu3 %v6569_v58  ;;  %v6312_v36 = vld [vmem:[%s10507_s1 + $0x3c8] sm:$0xf] }
 0x1b6   : > { %v2211_v50 = vpop.f32.mrf.mxu2  ;;  %v2115_v6 = vpop.f32.mrf.mxu0  ;;  %v6313_v43 = vor.u32 %v7462_v5, %v6312_v36  ;;  %v10654_v5 = vld [vmem:[#allocation11_spill] sm:$0xff]  ;;  %v7490_v36 = vld [vmem:[%s10507_s1 + $0x4b4] sm:$0xf0] }
 0x1b7   : > { %v2212_v31 = vadd.f32 %v2211_v50, %v2163_v44  ;;  %v9203_v0 = vpop.f32.mrf.mxu3  ;;  %v2116_v10 = vadd.f32 %v2115_v6, %v8963_v49  ;;  %v9215_v44 = vld [vmem:[%s10508_s2] sm:$0xf] }
 0x1b8   : > { %v2164_v47 = vpop.f32.mrf.mxu1  ;;  %v9218_v39 = vperm.slane %v9215_v44, 1  ;;  %2707 = vmatpush.bf16.msra.mxu1 %v6313_v43 }
 0x1b9   : > { %v2165_v49 = vadd.f32 %v2164_v47, %v2116_v10  ;;  %v3301_v62 = vmax.f32 %v2212_v31, 0.0  ;;  %v10653_v10 = vld [vmem:[#allocation31_spill] sm:$0xff]  ;;  %v7426_v31 = vld [vmem:[%s10507_s1 + $0x2b4] sm:$0xf0]  ;;  %v6552_v47 = vld [vmem:[%s10507_s1 + $0x5a8] sm:$0xf] }
 0x1ba   : > { %v2226_v60 = vadd.f32 %v8987_v4, %v9218_v39  ;;  %v6424_v4 = vld [vmem:[%s10507_s1 + $0x4a8] sm:$0xf]  ;;  %v2228_v43 = vadd.f32 %v8990_v15, %v9218_v39  ;;  %v7458_v15 = vld [vmem:[%s10507_s1 + $0x3b4] sm:$0xf0] }
 0x1be   : > { %v2213_v29 = vpop.f32.mrf.mxu2  ;;  %v2274_v23 = vpop.f32.mrf.mxu0 }
 0x1bf   : > { %v2214_v24 = vadd.f32 %v2213_v29, %v2165_v49  ;;  %v9222_v50 = vpop.f32.mrf.mxu3  ;;  %v2275_v58 = vadd.f32 %v2274_v23, %v2226_v60  ;;  %v7522_v49 = vld [vmem:[%s10507_s1 + $0x5b4] sm:$0xf0] }
 0x1c0   : > { %v2323_v6 = vpop.f32.mrf.mxu1 }
 0x1c1   : > { %v3305_v25 = vmax.f32 %v2214_v24, 0.0  ;;  %v2324_v53 = vadd.f32 %v2323_v6, %v2275_v58  ;;  %2469 = vmatmul.bf16.vlgmr.msrb.gmra.mxu0 %v10651_v59  ;;  %v6553_v24 = vor.u32 %v7522_v49, %v6552_v47 }
 0x1c3   : > { %v9225_v14 = vpack.c.bf16 %v3305_v25, %v3301_v62  ;;  %6614 = vmatmul.msk.bf16.vlgmr.msrb.gmra.mxu1 %vm1848_vm0, %v10653_v10  ;;  %2567 = vmatmul.bf16.vlgmr.msrb.gmra.mxu2 %v10654_v5  ;;  %v6168_v62 = vld [vmem:[%s10507_s1 + $0x2a8] sm:$0xf]  ;;  %v6425_v25 = vor.u32 %v7490_v36, %v6424_v4 }
 0x1c4   : > { %2616 = vmatmul.bf16.vlgmr.msrb.gmra.mxu3 %v8265_v51  ;;  %v6169_v29 = vor.u32 %v7426_v31, %v6168_v62  ;;  %v6296_v51 = vld [vmem:[%s10507_s1 + $0x3a8] sm:$0xf] }
 0x1c5   : > { %10652 = vst [vmem:[#allocation55_spill] sm:$0xff] %v9225_v14  ;;  %2757 = vmatpush.bf16.msra.mxu2 %v6425_v25  ;;  %2806 = vmatpush.bf16.msra.mxu3 %v6553_v24  ;;  %v6297_v31 = vor.u32 %v7458_v15, %v6296_v51  ;;  %v6408_v51 = vld [vmem:[%s10507_s1 + $0x488] sm:$0xf] }
 0x1c6   : > { %v2372_v60 = vpop.f32.mrf.mxu2  ;;  %v2276_v6 = vpop.f32.mrf.mxu0  ;;  %2659 = vmatpush.bf16.msra.mxu0 %v6169_v29 }
 0x1c7   : > { %v2373_v23 = vadd.f32 %v2372_v60, %v2324_v53  ;;  %v2421_v58 = vpop.f32.mrf.mxu3  ;;  %v2277_v4 = vadd.f32 %v2276_v6, %v2228_v43  ;;  %2708 = vmatpush.bf16.msra.mxu1 %v6297_v31  ;;  %v2231_v53 = vadd.f32 %v9017_v12, %v9218_v39  ;;  %v10656_v6 = vld [vmem:[#allocation33_spill] sm:$0xff]  ;;  %v7486_v12 = vld [vmem:[%s10507_s1 + $0x494] sm:$0xf0]  ;;  %v6536_v31 = vld [vmem:[%s10507_s1 + $0x588] sm:$0xf] }
 0x1c8   : > { %v2325_v36 = vpop.f32.mrf.mxu1  ;;  %v6409_v15 = vor.u32 %v7486_v12, %v6408_v51 }
 0x1c9   : > { %v9251_v14 = vadd.f32 %v2421_v58, %v2373_v23  ;;  %v2326_v62 = vadd.f32 %v2325_v36, %v2277_v4  ;;  %v10655_v58 = vld [vmem:[#allocation32_spill] sm:$0xff]  ;;  %v10657_v4 = vld [vmem:[#allocation13_spill] sm:$0xff] }
 0x1ca   : > { %v6152_v36 = vld [vmem:[%s10507_s1 + $0x288] sm:$0xf]  ;;  %2758 = vmatpush.bf16.msra.mxu2 %v6409_v15 }
 0x1ce   : > { %v2374_v25 = vpop.f32.mrf.mxu2  ;;  %v2279_v43 = vpop.f32.mrf.mxu0 }
 0x1cf   : > { %v2375_v47 = vadd.f32 %v2374_v25, %v2326_v62  ;;  %v2423_v49 = vpop.f32.mrf.mxu3  ;;  %v2280_v60 = vadd.f32 %v2279_v43, %v2231_v53  ;;  %v7422_v62 = vld [vmem:[%s10507_s1 + $0x294] sm:$0xf0]  ;;  %v2233_v25 = vadd.f32 %v9020_v34, %v9218_v39 }
 0x1d0   : > { %v2328_v29 = vpop.f32.mrf.mxu1  ;;  %v7518_v53 = vld [vmem:[%s10507_s1 + $0x594] sm:$0xf0] }
 0x1d1   : > { %v9261_v24 = vadd.f32 %v2423_v49, %v2375_v47  ;;  %v2329_v23 = vadd.f32 %v2328_v29, %v2280_v60  ;;  %2474 = vmatmul.bf16.gmra.mxu0 %v10655_v58  ;;  %v6153_v49 = vor.u32 %v7422_v62, %v6152_v36  ;;  %v6537_v43 = vor.u32 %v7518_v53, %v6536_v31  ;;  %v7454_v34 = vld [vmem:[%s10507_s1 + $0x394] sm:$0xf0] }
 0x1d3   : > { %6615 = vmatmul.msk.bf16.gmra.mxu1 %vm1848_vm0, %v10656_v6  ;;  %2572 = vmatmul.bf16.gmra.mxu2 %v10657_v4  ;;  %v6280_v6 = vld [vmem:[%s10507_s1 + $0x388] sm:$0xf] }
 0x1d4   : > { %2621 = vmatmul.bf16.gmra.mxu3 %v8321_v19  ;;  %2660 = vmatpush.bf16.msra.mxu0 %v6153_v49  ;;  %v6281_v62 = vor.u32 %v7454_v34, %v6280_v6  ;;  %v7482_v6 = vld [vmem:[%s10507_s1 + $0x474] sm:$0xf0] }
 0x1d5   : > { %2807 = vmatpush.bf16.msra.mxu3 %v6537_v43 }
 0x1d6   : > { %v2377_v47 = vpop.f32.mrf.mxu2  ;;  %v2281_v51 = vpop.f32.mrf.mxu0  ;;  %2709 = vmatpush.bf16.msra.mxu1 %v6281_v62  ;;  %v6520_v62 = vld [vmem:[%s10507_s1 + $0x568] sm:$0xf] }
 0x1d7   : > { %v2378_v60 = vadd.f32 %v2377_v47, %v2329_v23  ;;  %v2426_v29 = vpop.f32.mrf.mxu3  ;;  %v2282_v12 = vadd.f32 %v2281_v51, %v2233_v25  ;;  %v2236_v23 = vadd.f32 %v9047_v61, %v9218_v39  ;;  %v10659_v51 = vld [vmem:[#allocation35_spill] sm:$0xff]  ;;  %v6392_v61 = vld [vmem:[%s10507_s1 + $0x468] sm:$0xf] }
 0x1d8   : > { %v2330_v19 = vpop.f32.mrf.mxu1  ;;  %v6393_v34 = vor.u32 %v7482_v6, %v6392_v61 }
 0x1d9   : > { %v9288_v4 = vadd.f32 %v2426_v29, %v2378_v60  ;;  %v2331_v36 = vadd.f32 %v2330_v19, %v2282_v12  ;;  %v10658_v29 = vld [vmem:[#allocation34_spill] sm:$0xff]  ;;  %v10660_v19 = vld [vmem:[#allocation15_spill] sm:$0xff]  ;;  %v6136_v12 = vld [vmem:[%s10507_s1 + $0x268] sm:$0xf] }
 0x1da   : > { %2759 = vmatpush.bf16.msra.mxu2 %v6393_v34 }
 0x1de   : > { %v2379_v15 = vpop.f32.mrf.mxu2  ;;  %v2284_v25 = vpop.f32.mrf.mxu0 }
 0x1df   : > { %v2380_v31 = vadd.f32 %v2379_v15, %v2331_v36  ;;  %v2428_v53 = vpop.f32.mrf.mxu3  ;;  %v2285_v47 = vadd.f32 %v2284_v25, %v2236_v23  ;;  %v7418_v36 = vld [vmem:[%s10507_s1 + $0x274] sm:$0xf0]  ;;  %v2238_v15 = vadd.f32 %v9050_v33, %v9218_v39 }
 0x1e0   : > { %v2333_v49 = vpop.f32.mrf.mxu1  ;;  %v7514_v23 = vld [vmem:[%s10507_s1 + $0x574] sm:$0xf0] }
 0x1e1   : > { %v9298_v43 = vadd.f32 %v2428_v53, %v2380_v31  ;;  %v2334_v60 = vadd.f32 %v2333_v49, %v2285_v47  ;;  %2479 = vmatmul.bf16.gmra.mxu0 %v10658_v29  ;;  %v6137_v53 = vor.u32 %v7418_v36, %v6136_v12  ;;  %v6521_v25 = vor.u32 %v7514_v23, %v6520_v62  ;;  %v7450_v33 = vld [vmem:[%s10507_s1 + $0x374] sm:$0xf0] }
 0x1e3   : > { %6616 = vmatmul.msk.bf16.gmra.mxu1 %vm1848_vm0, %v10659_v51  ;;  %2577 = vmatmul.bf16.gmra.mxu2 %v10660_v19  ;;  %v6264_v51 = vld [vmem:[%s10507_s1 + $0x368] sm:$0xf] }
 0x1e4   : > { %2626 = vmatmul.bf16.gmra.mxu3 %v8359_v40  ;;  %2661 = vmatpush.bf16.msra.mxu0 %v6137_v53  ;;  %v6265_v36 = vor.u32 %v7450_v33, %v6264_v51  ;;  %v7478_v51 = vld [vmem:[%s10507_s1 + $0x454] sm:$0xf0] }
 0x1e5   : > { %2808 = vmatpush.bf16.msra.mxu3 %v6521_v25 }
 0x1e6   : > { %v2382_v31 = vpop.f32.mrf.mxu2  ;;  %v2286_v61 = vpop.f32.mrf.mxu0  ;;  %2710 = vmatpush.bf16.msra.mxu1 %v6265_v36  ;;  %v6504_v36 = vld [vmem:[%s10507_s1 + $0x548] sm:$0xf] }
 0x1e7   : > { %v2383_v47 = vadd.f32 %v2382_v31, %v2334_v60  ;;  %v2431_v49 = vpop.f32.mrf.mxu3  ;;  %v2287_v6 = vadd.f32 %v2286_v61, %v2238_v15  ;;  %v2241_v60 = vadd.f32 %v9077_v37, %v9218_v39  ;;  %v10662_v61 = vld [vmem:[#allocation37_spill] sm:$0xff]  ;;  %v6376_v37 = vld [vmem:[%s10507_s1 + $0x448] sm:$0xf] }
 0x1e8   : > { %v2335_v40 = vpop.f32.mrf.mxu1  ;;  %v6377_v33 = vor.u32 %v7478_v51, %v6376_v37 }
 0x1e9   : > { %v9325_v19 = vadd.f32 %v2431_v49, %v2383_v47  ;;  %v2336_v12 = vadd.f32 %v2335_v40, %v2287_v6  ;;  %v10661_v49 = vld [vmem:[#allocation36_spill] sm:$0xff]  ;;  %v10663_v40 = vld [vmem:[#allocation17_spill] sm:$0xff] }
 0x1ea   : > { %v6120_v6 = vld [vmem:[%s10507_s1 + $0x248] sm:$0xf]  ;;  %2760 = vmatpush.bf16.msra.mxu2 %v6377_v33 }
 0x1ee   : > { %v2384_v34 = vpop.f32.mrf.mxu2  ;;  %v2289_v15 = vpop.f32.mrf.mxu0 }
 0x1ef   : > { %v2385_v62 = vadd.f32 %v2384_v34, %v2336_v12  ;;  %v2433_v23 = vpop.f32.mrf.mxu3  ;;  %v2290_v31 = vadd.f32 %v2289_v15, %v2241_v60  ;;  %v7414_v12 = vld [vmem:[%s10507_s1 + $0x254] sm:$0xf0]  ;;  %v2243_v34 = vadd.f32 %v9080_v32, %v9218_v39 }
 0x1f0   : > { %v2338_v53 = vpop.f32.mrf.mxu1  ;;  %v7510_v60 = vld [vmem:[%s10507_s1 + $0x554] sm:$0xf0] }
 0x1f1   : > { %v9335_v25 = vadd.f32 %v2433_v23, %v2385_v62  ;;  %v2339_v47 = vadd.f32 %v2338_v53, %v2290_v31  ;;  %2484 = vmatmul.bf16.gmra.mxu0 %v10661_v49  ;;  %v6121_v23 = vor.u32 %v7414_v12, %v6120_v6  ;;  %v6505_v15 = vor.u32 %v7510_v60, %v6504_v36  ;;  %v7446_v32 = vld [vmem:[%s10507_s1 + $0x354] sm:$0xf0] }
 0x1f3   : > { %6617 = vmatmul.msk.bf16.gmra.mxu1 %vm1848_vm0, %v10662_v61  ;;  %2582 = vmatmul.bf16.gmra.mxu2 %v10663_v40  ;;  %v6248_v61 = vld [vmem:[%s10507_s1 + $0x348] sm:$0xf] }
 0x1f4   : > { %2631 = vmatmul.bf16.gmra.mxu3 %v8397_v1  ;;  %2662 = vmatpush.bf16.msra.mxu0 %v6121_v23  ;;  %v6249_v12 = vor.u32 %v7446_v32, %v6248_v61  ;;  %v7474_v61 = vld [vmem:[%s10507_s1 + $0x434] sm:$0xf0] }
 0x1f5   : > { %2809 = vmatpush.bf16.msra.mxu3 %v6505_v15 }
 0x1f6   : > { %v2387_v62 = vpop.f32.mrf.mxu2  ;;  %v2291_v37 = vpop.f32.mrf.mxu0  ;;  %2711 = vmatpush.bf16.msra.mxu1 %v6249_v12  ;;  %v6488_v12 = vld [vmem:[%s10507_s1 + $0x528] sm:$0xf] }
 0x1f7   : > { %v2388_v31 = vadd.f32 %v2387_v62, %v2339_v47  ;;  %v2436_v53 = vpop.f32.mrf.mxu3  ;;  %v2292_v51 = vadd.f32 %v2291_v37, %v2243_v34  ;;  %v2246_v47 = vadd.f32 %v9107_v48, %v9218_v39  ;;  %v10665_v37 = vld [vmem:[#allocation39_spill] sm:$0xff]  ;;  %v6360_v48 = vld [vmem:[%s10507_s1 + $0x428] sm:$0xf] }
 0x1f8   : > { %v2340_v1 = vpop.f32.mrf.mxu1  ;;  %v6361_v32 = vor.u32 %v7474_v61, %v6360_v48 }
 0x1f9   : > { %v9362_v40 = vadd.f32 %v2436_v53, %v2388_v31  ;;  %v2341_v6 = vadd.f32 %v2340_v1, %v2292_v51  ;;  %v10664_v53 = vld [vmem:[#allocation38_spill] sm:$0xff]  ;;  %v10666_v1 = vld [vmem:[#allocation19_spill] sm:$0xff]  ;;  %v6104_v51 = vld [vmem:[%s10507_s1 + $0x228] sm:$0xf] }
 0x1fa   : > { %2761 = vmatpush.bf16.msra.mxu2 %v6361_v32 }
 0x1fe   : > { %v2389_v33 = vpop.f32.mrf.mxu2  ;;  %v2294_v34 = vpop.f32.mrf.mxu0 }
 0x1ff   : > { %v2390_v36 = vadd.f32 %v2389_v33, %v2341_v6  ;;  %v2438_v60 = vpop.f32.mrf.mxu3  ;;  %v2295_v62 = vadd.f32 %v2294_v34, %v2246_v47  ;;  %v7410_v6 = vld [vmem:[%s10507_s1 + $0x234] sm:$0xf0]  ;;  %v2248_v33 = vadd.f32 %v9110_v46, %v9218_v39 }
 0x200   : > { %v2343_v23 = vpop.f32.mrf.mxu1  ;;  %v7506_v47 = vld [vmem:[%s10507_s1 + $0x534] sm:$0xf0] }
 0x201   : > { %v9372_v15 = vadd.f32 %v2438_v60, %v2390_v36  ;;  %v2344_v31 = vadd.f32 %v2343_v23, %v2295_v62  ;;  %2489 = vmatmul.bf16.gmra.mxu0 %v10664_v53  ;;  %v6105_v60 = vor.u32 %v7410_v6, %v6104_v51  ;;  %v6489_v34 = vor.u32 %v7506_v47, %v6488_v12  ;;  %v7442_v46 = vld [vmem:[%s10507_s1 + $0x334] sm:$0xf0] }
 0x203   : > { %6618 = vmatmul.msk.bf16.gmra.mxu1 %vm1848_vm0, %v10665_v37  ;;  %2587 = vmatmul.bf16.gmra.mxu2 %v10666_v1  ;;  %v6232_v37 = vld [vmem:[%s10507_s1 + $0x328] sm:$0xf] }
 0x204   : > { %2636 = vmatmul.bf16.gmra.mxu3 %v8435_v26  ;;  %2663 = vmatpush.bf16.msra.mxu0 %v6105_v60  ;;  %v6233_v6 = vor.u32 %v7442_v46, %v6232_v37  ;;  %v7470_v37 = vld [vmem:[%s10507_s1 + $0x414] sm:$0xf0] }
 0x205   : > { %2810 = vmatpush.bf16.msra.mxu3 %v6489_v34 }
 0x206   : > { %v2392_v36 = vpop.f32.mrf.mxu2  ;;  %v2296_v48 = vpop.f32.mrf.mxu0  ;;  %2712 = vmatpush.bf16.msra.mxu1 %v6233_v6  ;;  %v6472_v6 = vld [vmem:[%s10507_s1 + $0x508] sm:$0xf] }
 0x207   : > { %v2393_v62 = vadd.f32 %v2392_v36, %v2344_v31  ;;  %v2441_v23 = vpop.f32.mrf.mxu3  ;;  %v2297_v61 = vadd.f32 %v2296_v48, %v2248_v33  ;;  %v2251_v31 = vadd.f32 %v9137_v13, %v9218_v39  ;;  %v10668_v48 = vld [vmem:[#allocation41_spill] sm:$0xff]  ;;  %v6344_v13 = vld [vmem:[%s10507_s1 + $0x408] sm:$0xf] }
 0x208   : > { %v2345_v26 = vpop.f32.mrf.mxu1  ;;  %v6345_v46 = vor.u32 %v7470_v37, %v6344_v13 }
 0x209   : > { %v9399_v1 = vadd.f32 %v2441_v23, %v2393_v62  ;;  %v2346_v51 = vadd.f32 %v2345_v26, %v2297_v61  ;;  %v10667_v23 = vld [vmem:[#allocation40_spill] sm:$0xff]  ;;  %v10669_v26 = vld [vmem:[#allocation21_spill] sm:$0xff] }
 0x20a   : > { %v6088_v61 = vld [vmem:[%s10507_s1 + $0x208] sm:$0xf]  ;;  %2762 = vmatpush.bf16.msra.mxu2 %v6345_v46 }
 0x20e   : > { %v2394_v32 = vpop.f32.mrf.mxu2  ;;  %v2299_v33 = vpop.f32.mrf.mxu0 }
 0x20f   : > { %v2395_v12 = vadd.f32 %v2394_v32, %v2346_v51  ;;  %v2443_v47 = vpop.f32.mrf.mxu3  ;;  %v2300_v36 = vadd.f32 %v2299_v33, %v2251_v31  ;;  %v7406_v51 = vld [vmem:[%s10507_s1 + $0x214] sm:$0xf0]  ;;  %v2253_v32 = vadd.f32 %v9140_v30, %v9218_v39 }
 0x210   : > { %v2348_v60 = vpop.f32.mrf.mxu1  ;;  %v7502_v31 = vld [vmem:[%s10507_s1 + $0x514] sm:$0xf0] }
 0x211   : > { %v9409_v34 = vadd.f32 %v2443_v47, %v2395_v12  ;;  %v2349_v62 = vadd.f32 %v2348_v60, %v2300_v36  ;;  %2494 = vmatmul.bf16.gmra.mxu0 %v10667_v23  ;;  %v6089_v47 = vor.u32 %v7406_v51, %v6088_v61  ;;  %v6473_v33 = vor.u32 %v7502_v31, %v6472_v6  ;;  %v7438_v30 = vld [vmem:[%s10507_s1 + $0x314] sm:$0xf0] }
 0x213   : > { %6619 = vmatmul.msk.bf16.gmra.mxu1 %vm1848_vm0, %v10668_v48  ;;  %2592 = vmatmul.bf16.gmra.mxu2 %v10669_v26  ;;  %v6216_v48 = vld [vmem:[%s10507_s1 + $0x308] sm:$0xf] }
 0x214   : > { %2641 = vmatmul.bf16.gmra.mxu3 %v8473_v54  ;;  %2664 = vmatpush.bf16.msra.mxu0 %v6089_v47  ;;  %v6217_v51 = vor.u32 %v7438_v30, %v6216_v48  ;;  %v6074_v48 = vld [vmem:[%s10507_s1 + $0x1f8] sm:$0xf0] }
 0x215   : > { %2811 = vmatpush.bf16.msra.mxu3 %v6473_v33 }
 0x216   : > { %v2397_v12 = vpop.f32.mrf.mxu2  ;;  %v2301_v13 = vpop.f32.mrf.mxu0  ;;  %2713 = vmatpush.bf16.msra.mxu1 %v6217_v51  ;;  %v7432_v51 = vld [vmem:[%s10507_s1 + $0x2ec] sm:$0xf] }
 0x217   : > { %v2398_v36 = vadd.f32 %v2397_v12, %v2349_v62  ;;  %v2446_v60 = vpop.f32.mrf.mxu3  ;;  %v2302_v37 = vadd.f32 %v2301_v13, %v2253_v32  ;;  %v2256_v62 = vadd.f32 %v9167_v63, %v9218_v39  ;;  %v10671_v13 = vld [vmem:[#allocation44_spill] sm:$0xff] }
 0x218   : > { %v2350_v54 = vpop.f32.mrf.mxu1  ;;  %v7400_v63 = vld [vmem:[%s10507_s1 + $0x1ec] sm:$0xf] }
 0x219   : > { %v9436_v26 = vadd.f32 %v2446_v60, %v2398_v36  ;;  %v2351_v61 = vadd.f32 %v2350_v54, %v2302_v37  ;;  %v10670_v60 = vld [vmem:[#allocation43_spill] sm:$0xff]  ;;  %v6600_v37 = vld [vmem:[%s10507_s1 + $0x608] sm:$0xf]  ;;  %v6077_v30 = vor.u32 %v7400_v63, %v6074_v48 }
 0x21a   : > { %v10672_v54 = vld [vmem:[#allocation23_spill] sm:$0xff] }
 0x21b   : > { %2951 = vmatpush.bf16.msrb.mxu2 %v6077_v30 }
 0x21e   : > { %v2399_v46 = vpop.f32.mrf.mxu2  ;;  %v2304_v32 = vpop.f32.mrf.mxu0 }
 0x21f   : > { %v2400_v6 = vadd.f32 %v2399_v46, %v2351_v61  ;;  %v2448_v31 = vpop.f32.mrf.mxu3  ;;  %v2305_v12 = vadd.f32 %v2304_v32, %v2256_v62  ;;  %v7534_v61 = vld [vmem:[%s10507_s1 + $0x614] sm:$0xf0]  ;;  %v6202_v62 = vld [vmem:[%s10507_s1 + $0x2f8] sm:$0xf0]  ;;  %v2258_v46 = vadd.f32 %v9176_v38, %v9218_v39 }
 0x220   : > { %v2353_v47 = vpop.f32.mrf.mxu1  ;;  %v6205_v32 = vor.u32 %v7432_v51, %v6202_v62  ;;  %v5946_v38 = vld [vmem:[%s10507_s1 + $0xf8] sm:$0xf0] }
 0x221   : > { %v9446_v33 = vadd.f32 %v2448_v31, %v2400_v6  ;;  %v2354_v36 = vadd.f32 %v2353_v47, %v2305_v12  ;;  %2499 = vmatmul.bf16.gmra.mxu0 %v10670_v60  ;;  %v6601_v31 = vor.u32 %v7534_v61, %v6600_v37 }
 0x222   : > { %3000 = vmatpush.bf16.msrb.mxu3 %v6205_v32 }
 0x223   : > { %6620 = vmatmul.msk.bf16.gmra.mxu1 %vm1848_vm0, %v10671_v13  ;;  %2597 = vmatmul.bf16.gmra.mxu2 %v10672_v54  ;;  %v7368_v13 = vld [vmem:[%s10507_s1 + $0xec] sm:$0xf] }
 0x224   : > { %2646 = vmatmul.bf16.gmra.mxu3 %v8511_v16  ;;  %2860 = vmatpush.bf16.msrb.mxu0 %v6601_v31  ;;  %v5949_v61 = vor.u32 %v7368_v13, %v5946_v38  ;;  %v6058_v13 = vld [vmem:[%s10507_s1 + $0x1d8] sm:$0xf0] }
 0x226   : > { %v2402_v6 = vpop.f32.mrf.mxu2  ;;  %v2306_v63 = vpop.f32.mrf.mxu0  ;;  %2902 = vmatpush.bf16.msrb.mxu1 %v5949_v61  ;;  %v2263_v61 = vadd.f32 %v9222_v50, %v9218_v39 }
 0x227   : > { %v2403_v12 = vadd.f32 %v2402_v6, %v2354_v36  ;;  %v2451_v47 = vpop.f32.mrf.mxu3  ;;  %v2307_v48 = vadd.f32 %v2306_v63, %v2258_v46  ;;  %v2261_v36 = vadd.f32 %v9203_v0, %v9218_v39  ;;  %v10674_v63 = vld [vmem:[#allocation47_spill] sm:$0xff]  ;;  %v7396_v0 = vld [vmem:[%s10507_s1 + $0x1cc] sm:$0xf] }
 0x228   : > { %v2355_v16 = vpop.f32.mrf.mxu1  ;;  %v6061_v38 = vor.u32 %v7396_v0, %v6058_v13  ;;  %v7364_v0 = vld [vmem:[%s10507_s1 + $0xcc] sm:$0xf]  ;;  %v5930_v13 = vld [vmem:[%s10507_s1 + $0xd8] sm:$0xf0] }
 0x229   : > { %v9473_v54 = vadd.f32 %v2451_v47, %v2403_v12  ;;  %v2356_v37 = vadd.f32 %v2355_v16, %v2307_v48  ;;  %v10673_v47 = vld [vmem:[#allocation46_spill] sm:$0xff]  ;;  %v10675_v16 = vld [vmem:[#allocation25_spill] sm:$0xff]  ;;  %v7428_v48 = vld [vmem:[%s10507_s1 + $0x2cc] sm:$0xf]  ;;  %v5933_v50 = vor.u32 %v7364_v0, %v5930_v13 }
 0x22a   : > { %2952 = vmatpush.bf16.msrb.mxu2 %v6061_v38 }
 0x22b   : > { %2903 = vmatpush.bf16.msrb.mxu1 %v5933_v50 }
 0x22e   : > { %v2404_v30 = vpop.f32.mrf.mxu2  ;;  %v2309_v46 = vpop.f32.mrf.mxu0 }
 0x22f   : > { %v2405_v51 = vadd.f32 %v2404_v30, %v2356_v37  ;;  %v2453_v62 = vpop.f32.mrf.mxu3  ;;  %v2310_v6 = vadd.f32 %v2309_v46, %v2261_v36  ;;  %v6186_v37 = vld [vmem:[%s10507_s1 + $0x2d8] sm:$0xf0] }
 0x230   : > { %v2358_v31 = vpop.f32.mrf.mxu1  ;;  %v6189_v30 = vor.u32 %v7428_v48, %v6186_v37 }
 0x231   : > { %v9483_v32 = vadd.f32 %v2453_v62, %v2405_v51  ;;  %v2359_v12 = vadd.f32 %v2358_v31, %v2310_v6  ;;  %2504 = vmatmul.bf16.gmra.mxu0 %v10673_v47 }
 0x232   : > { %3001 = vmatpush.bf16.msrb.mxu3 %v6189_v30 }
 0x233   : > { %6621 = vmatmul.msk.bf16.gmra.mxu1 %vm1848_vm0, %v10674_v63  ;;  %2602 = vmatmul.bf16.gmra.mxu2 %v10675_v16 }
 0x234   : > { %2651 = vmatmul.bf16.gmra.mxu3 %v10646_v18 }
 0x236   : > { %v2407_v36 = vpop.f32.mrf.mxu2  ;;  %v2311_v46 = vpop.f32.mrf.mxu0 }
 0x237   : > { %v2408_v51 = vadd.f32 %v2407_v36, %v2359_v12  ;;  %v2456_v62 = vpop.f32.mrf.mxu3  ;;  %v2312_v6 = vadd.f32 %v2311_v46, %v2263_v61  ;;  %v7392_v46 = vld [vmem:[%s10507_s1 + $0x1ac] sm:$0xf] }
 0x238   : > { %v2360_v31 = vpop.f32.mrf.mxu1 }
 0x239   : > { %v9504_v18 = vadd.f32 %v2456_v62, %v2408_v51  ;;  %v2361_v39 = vadd.f32 %v2360_v31, %v2312_v6  ;;  %v9519_v62 = vperm.slane %v9215_v44, 2  ;;  %v7424_v31 = vld [vmem:[%s10507_s1 + $0x2ac] sm:$0xf]  ;;  %v6170_v44 = vld [vmem:[%s10507_s1 + $0x2b8] sm:$0xf0] }
 0x23a   : > { %v6173_v13 = vor.u32 %v7424_v31, %v6170_v44 }
 0x23c   : > { %3002 = vmatpush.bf16.msrb.mxu3 %v6173_v13 }
 0x23e   : > { %v2409_v12 = vpop.f32.mrf.mxu2  ;;  %v2470_v38 = vpop.f32.mrf.mxu0 }
 0x23f   : > { %v2410_v48 = vadd.f32 %v2409_v12, %v2361_v39  ;;  %v2458_v37 = vpop.f32.mrf.mxu3  ;;  %v2471_v61 = vadd.f32 %v2470_v38, %v9251_v14  ;;  %v6042_v14 = vld [vmem:[%s10507_s1 + $0x1b8] sm:$0xf0] }
 0x240   : > { %v2519_v36 = vpop.f32.mrf.mxu1  ;;  %v6045_v6 = vor.u32 %v7392_v46, %v6042_v14 }
 0x241   : > { %v9513_v30 = vadd.f32 %v2458_v37, %v2410_v48  ;;  %v2520_v51 = vadd.f32 %v2519_v36, %v2471_v61  ;;  %2665 = vmatmul.bf16.vlgmr.msra.gmra.mxu0 %v8267_v52  ;;  %v7360_v61 = vld [vmem:[%s10507_s1 + $0xac] sm:$0xf]  ;;  %v5914_v36 = vld [vmem:[%s10507_s1 + $0xb8] sm:$0xf0] }
 0x242   : > { %2953 = vmatpush.bf16.msrb.mxu2 %v6045_v6  ;;  %v5917_v14 = vor.u32 %v7360_v61, %v5914_v36  ;;  %v6154_v61 = vld [vmem:[%s10507_s1 + $0x298] sm:$0xf0] }
 0x243   : > { %2714 = vmatmul.bf16.vlgmr.msra.gmra.mxu1 %v8275_v55  ;;  %2763 = vmatmul.bf16.vlgmr.msra.gmra.mxu2 %v8600_v35  ;;  %v3246_v31 = vmax.f32 %v2520_v51, 0.0  ;;  %v7388_v51 = vld [vmem:[%s10507_s1 + $0x18c] sm:$0xf] }
 0x244   : > { %2812 = vmatmul.bf16.vlgmr.msra.gmra.mxu3 %v10651_v59  ;;  %2904 = vmatpush.bf16.msrb.mxu1 %v5917_v14 }
 0x246   : > { %v2568_v0 = vpop.f32.mrf.mxu2  ;;  %v2472_v12 = vpop.f32.mrf.mxu0 }
 0x247   : > { %v2569_v39 = vadd.f32 %v2568_v0, %v9519_v62  ;;  %v2617_v50 = vpop.f32.mrf.mxu3  ;;  %v2473_v48 = vadd.f32 %v2472_v12, %v9261_v24 }
 0x248   : > { %v2521_v37 = vpop.f32.mrf.mxu1 }
 0x249   : > { %v9536_v38 = vadd.f32 %v2617_v50, %v2569_v39  ;;  %v2522_v46 = vadd.f32 %v2521_v37, %v2473_v48  ;;  %v7420_v37 = vld [vmem:[%s10507_s1 + $0x28c] sm:$0xf] }
 0x24b   : > { %v3250_v44 = vmax.f32 %v2522_v46, 0.0  ;;  %v6157_v46 = vor.u32 %v7420_v37, %v6154_v61 }
 0x24d   : > { %v9544_v6 = vpack.c.bf16 %v3250_v44, %v3246_v31  ;;  %3003 = vmatpush.bf16.msrb.mxu3 %v6157_v46 }
 0x24e   : > { %v2570_v24 = vpop.f32.mrf.mxu2  ;;  %v2475_v39 = vpop.f32.mrf.mxu0 }
 0x24f   : > { %10676 = vst [vmem:[#allocation31_spill] sm:$0xff] %v9544_v6  ;;  %v2571_v0 = vadd.f32 %v2570_v24, %v9519_v62  ;;  %v2619_v13 = vpop.f32.mrf.mxu3  ;;  %v2476_v50 = vadd.f32 %v2475_v39, %v9288_v4  ;;  %v6026_v4 = vld [vmem:[%s10507_s1 + $0x198] sm:$0xf0]  ;;  %v7356_v39 = vld [vmem:[%s10507_s1 + $0x8c] sm:$0xf] }
 0x250   : > { %v2524_v12 = vpop.f32.mrf.mxu1  ;;  %v6029_v48 = vor.u32 %v7388_v51, %v6026_v4 }
 0x251   : > { %v9548_v59 = vadd.f32 %v2619_v13, %v2571_v0  ;;  %v2525_v35 = vadd.f32 %v2524_v12, %v2476_v50  ;;  %2670 = vmatmul.bf16.gmra.mxu0 %v8323_v20  ;;  %v5898_v50 = vld [vmem:[%s10507_s1 + $0x98] sm:$0xf0] }
 0x252   : > { %2954 = vmatpush.bf16.msrb.mxu2 %v6029_v48  ;;  %v5901_v51 = vor.u32 %v7356_v39, %v5898_v50  ;;  %v6138_v39 = vld [vmem:[%s10507_s1 + $0x278] sm:$0xf0] }
 0x253   : > { %2719 = vmatmul.bf16.gmra.mxu1 %v8325_v21  ;;  %2768 = vmatmul.bf16.gmra.mxu2 %v8645_v45  ;;  %v3254_v4 = vmax.f32 %v2525_v35, 0.0  ;;  %v7384_v35 = vld [vmem:[%s10507_s1 + $0x16c] sm:$0xf] }
 0x254   : > { %2817 = vmatmul.bf16.gmra.mxu3 %v10655_v58  ;;  %2905 = vmatpush.bf16.msrb.mxu1 %v5901_v51 }
 0x256   : > { %v2573_v36 = vpop.f32.mrf.mxu2  ;;  %v2477_v44 = vpop.f32.mrf.mxu0 }
 0x257   : > { %v2574_v14 = vadd.f32 %v2573_v36, %v9519_v62  ;;  %v2622_v31 = vpop.f32.mrf.mxu3  ;;  %v2478_v24 = vadd.f32 %v2477_v44, %v9298_v43 }
 0x258   : > { %v2526_v0 = vpop.f32.mrf.mxu1 }
 0x259   : > { %v9568_v13 = vadd.f32 %v2622_v31, %v2574_v14  ;;  %v2527_v12 = vadd.f32 %v2526_v0, %v2478_v24  ;;  %v7416_v0 = vld [vmem:[%s10507_s1 + $0x26c] sm:$0xf] }
 0x25b   : > { %v3258_v37 = vmax.f32 %v2527_v12, 0.0  ;;  %v6141_v12 = vor.u32 %v7416_v0, %v6138_v39 }
 0x25d   : > { %v9576_v48 = vpack.c.bf16 %v3258_v37, %v3254_v4  ;;  %3004 = vmatpush.bf16.msrb.mxu3 %v6141_v12 }
 0x25e   : > { %v2575_v43 = vpop.f32.mrf.mxu2  ;;  %v2480_v46 = vpop.f32.mrf.mxu0 }
 0x25f   : > { %10677 = vst [vmem:[#allocation11_spill] sm:$0xff] %v9576_v48  ;;  %v2576_v61 = vadd.f32 %v2575_v43, %v9519_v62  ;;  %v2624_v36 = vpop.f32.mrf.mxu3  ;;  %v2481_v14 = vadd.f32 %v2480_v46, %v9325_v19  ;;  %v6010_v19 = vld [vmem:[%s10507_s1 + $0x178] sm:$0xf0]  ;;  %v7352_v46 = vld [vmem:[%s10507_s1 + $0x6c] sm:$0xf] }
 0x260   : > { %v2529_v31 = vpop.f32.mrf.mxu1  ;;  %v6013_v24 = vor.u32 %v7384_v35, %v6010_v19 }
 0x261   : > { %v9580_v44 = vadd.f32 %v2624_v36, %v2576_v61  ;;  %v2530_v6 = vadd.f32 %v2529_v31, %v2481_v14  ;;  %2675 = vmatmul.bf16.gmra.mxu0 %v8361_v41  ;;  %v5882_v14 = vld [vmem:[%s10507_s1 + $0x78] sm:$0xf0] }
 0x262   : > { %2955 = vmatpush.bf16.msrb.mxu2 %v6013_v24  ;;  %v5885_v35 = vor.u32 %v7352_v46, %v5882_v14  ;;  %v6122_v46 = vld [vmem:[%s10507_s1 + $0x258] sm:$0xf0] }
 0x263   : > { %2724 = vmatmul.bf16.gmra.mxu1 %v8363_v42  ;;  %2773 = vmatmul.bf16.gmra.mxu2 %v8692_v11  ;;  %v3262_v19 = vmax.f32 %v2530_v6, 0.0  ;;  %v7380_v6 = vld [vmem:[%s10507_s1 + $0x14c] sm:$0xf] }
 0x264   : > { %2822 = vmatmul.bf16.gmra.mxu3 %v10658_v29  ;;  %2906 = vmatpush.bf16.msrb.mxu1 %v5885_v35 }
 0x266   : > { %v2578_v50 = vpop.f32.mrf.mxu2  ;;  %v2482_v37 = vpop.f32.mrf.mxu0 }
 0x267   : > { %v2579_v51 = vadd.f32 %v2578_v50, %v9519_v62  ;;  %v2627_v4 = vpop.f32.mrf.mxu3  ;;  %v2483_v43 = vadd.f32 %v2482_v37, %v9335_v25 }
 0x268   : > { %v2531_v61 = vpop.f32.mrf.mxu1 }
 0x269   : > { %v9600_v36 = vadd.f32 %v2627_v4, %v2579_v51  ;;  %v2532_v31 = vadd.f32 %v2531_v61, %v2483_v43  ;;  %v7412_v61 = vld [vmem:[%s10507_s1 + $0x24c] sm:$0xf] }
 0x26b   : > { %v3266_v0 = vmax.f32 %v2532_v31, 0.0  ;;  %v6125_v31 = vor.u32 %v7412_v61, %v6122_v46 }
 0x26d   : > { %v9608_v24 = vpack.c.bf16 %v3266_v0, %v3262_v19  ;;  %3005 = vmatpush.bf16.msrb.mxu3 %v6125_v31 }
 0x26e   : > { %v2580_v25 = vpop.f32.mrf.mxu2  ;;  %v2485_v12 = vpop.f32.mrf.mxu0 }
 0x26f   : > { %10678 = vst [vmem:[#allocation32_spill] sm:$0xff] %v9608_v24  ;;  %v2581_v39 = vadd.f32 %v2580_v25, %v9519_v62  ;;  %v2629_v50 = vpop.f32.mrf.mxu3  ;;  %v2486_v51 = vadd.f32 %v2485_v12, %v9362_v40  ;;  %v5994_v40 = vld [vmem:[%s10507_s1 + $0x158] sm:$0xf0]  ;;  %v7348_v12 = vld [vmem:[%s10507_s1 + $0x4c] sm:$0xf] }
 0x270   : > { %v2534_v4 = vpop.f32.mrf.mxu1  ;;  %v5997_v43 = vor.u32 %v7380_v6, %v5994_v40 }
 0x271   : > { %v9612_v37 = vadd.f32 %v2629_v50, %v2581_v39  ;;  %v2535_v48 = vadd.f32 %v2534_v4, %v2486_v51  ;;  %2680 = vmatmul.bf16.gmra.mxu0 %v8399_v2  ;;  %v5866_v51 = vld [vmem:[%s10507_s1 + $0x58] sm:$0xf0] }
 0x272   : > { %2956 = vmatpush.bf16.msrb.mxu2 %v5997_v43  ;;  %v5869_v6 = vor.u32 %v7348_v12, %v5866_v51  ;;  %v6106_v12 = vld [vmem:[%s10507_s1 + $0x238] sm:$0xf0] }
 0x273   : > { %2729 = vmatmul.bf16.gmra.mxu1 %v8401_v3  ;;  %2778 = vmatmul.bf16.gmra.mxu2 %v8739_v8  ;;  %v3270_v40 = vmax.f32 %v2535_v48, 0.0  ;;  %v7376_v48 = vld [vmem:[%s10507_s1 + $0x12c] sm:$0xf] }
 0x274   : > { %2827 = vmatmul.bf16.gmra.mxu3 %v10661_v49  ;;  %2907 = vmatpush.bf16.msrb.mxu1 %v5869_v6 }
 0x276   : > { %v2583_v14 = vpop.f32.mrf.mxu2  ;;  %v2487_v0 = vpop.f32.mrf.mxu0 }
 0x277   : > { %v2584_v35 = vadd.f32 %v2583_v14, %v9519_v62  ;;  %v2632_v19 = vpop.f32.mrf.mxu3  ;;  %v2488_v25 = vadd.f32 %v2487_v0, %v9372_v15 }
 0x278   : > { %v2536_v39 = vpop.f32.mrf.mxu1 }
 0x279   : > { %v9632_v50 = vadd.f32 %v2632_v19, %v2584_v35  ;;  %v2537_v4 = vadd.f32 %v2536_v39, %v2488_v25  ;;  %v7408_v39 = vld [vmem:[%s10507_s1 + $0x22c] sm:$0xf] }
 0x27b   : > { %v3274_v61 = vmax.f32 %v2537_v4, 0.0  ;;  %v6109_v4 = vor.u32 %v7408_v39, %v6106_v12 }
 0x27d   : > { %v9640_v43 = vpack.c.bf16 %v3274_v61, %v3270_v40  ;;  %3006 = vmatpush.bf16.msrb.mxu3 %v6109_v4 }
 0x27e   : > { %v2585_v15 = vpop.f32.mrf.mxu2  ;;  %v2490_v31 = vpop.f32.mrf.mxu0 }
 0x27f   : > { %10679 = vst [vmem:[#allocation34_spill] sm:$0xff] %v9640_v43  ;;  %v2586_v46 = vadd.f32 %v2585_v15, %v9519_v62  ;;  %v2634_v14 = vpop.f32.mrf.mxu3  ;;  %v2491_v35 = vadd.f32 %v2490_v31, %v9399_v1  ;;  %v5978_v1 = vld [vmem:[%s10507_s1 + $0x138] sm:$0xf0]  ;;  %v7344_v31 = vld [vmem:[%s10507_s1 + $0x2c] sm:$0xf] }
 0x280   : > { %v2539_v19 = vpop.f32.mrf.mxu1  ;;  %v5981_v25 = vor.u32 %v7376_v48, %v5978_v1 }
 0x281   : > { %v9644_v0 = vadd.f32 %v2634_v14, %v2586_v46  ;;  %v2540_v24 = vadd.f32 %v2539_v19, %v2491_v35  ;;  %2685 = vmatmul.bf16.gmra.mxu0 %v8437_v27  ;;  %v5850_v35 = vld [vmem:[%s10507_s1 + $0x38] sm:$0xf0] }
 0x282   : > { %2957 = vmatpush.bf16.msrb.mxu2 %v5981_v25  ;;  %v5853_v48 = vor.u32 %v7344_v31, %v5850_v35  ;;  %v6090_v31 = vld [vmem:[%s10507_s1 + $0x218] sm:$0xf0] }
 0x283   : > { %2734 = vmatmul.bf16.gmra.mxu1 %v8439_v28  ;;  %2783 = vmatmul.bf16.gmra.mxu2 %v8786_v9  ;;  %v3278_v1 = vmax.f32 %v2540_v24, 0.0  ;;  %v7372_v24 = vld [vmem:[%s10507_s1 + $0x10c] sm:$0xf] }
 0x284   : > { %2832 = vmatmul.bf16.gmra.mxu3 %v10664_v53  ;;  %2908 = vmatpush.bf16.msrb.mxu1 %v5853_v48 }
 0x286   : > { %v2588_v51 = vpop.f32.mrf.mxu2  ;;  %v2492_v61 = vpop.f32.mrf.mxu0 }
 0x287   : > { %v2589_v6 = vadd.f32 %v2588_v51, %v9519_v62  ;;  %v2637_v40 = vpop.f32.mrf.mxu3  ;;  %v2493_v15 = vadd.f32 %v2492_v61, %v9409_v34 }
 0x288   : > { %v2541_v46 = vpop.f32.mrf.mxu1 }
 0x289   : > { %v9664_v14 = vadd.f32 %v2637_v40, %v2589_v6  ;;  %v2542_v19 = vadd.f32 %v2541_v46, %v2493_v15  ;;  %v7404_v46 = vld [vmem:[%s10507_s1 + $0x20c] sm:$0xf] }
 0x28b   : > { %v3282_v39 = vmax.f32 %v2542_v19, 0.0  ;;  %v6093_v19 = vor.u32 %v7404_v46, %v6090_v31 }
 0x28d   : > { %v9672_v25 = vpack.c.bf16 %v3282_v39, %v3278_v1  ;;  %3007 = vmatpush.bf16.msrb.mxu3 %v6093_v19 }
 0x28e   : > { %v2590_v34 = vpop.f32.mrf.mxu2  ;;  %v2495_v4 = vpop.f32.mrf.mxu0 }
 0x28f   : > { %10680 = vst [vmem:[#allocation36_spill] sm:$0xff] %v9672_v25  ;;  %v2591_v12 = vadd.f32 %v2590_v34, %v9519_v62  ;;  %v2639_v51 = vpop.f32.mrf.mxu3  ;;  %v2496_v6 = vadd.f32 %v2495_v4, %v9436_v26  ;;  %v5962_v26 = vld [vmem:[%s10507_s1 + $0x118] sm:$0xf0]  ;;  %v7340_v4 = vld [vmem:[%s10507_s1 + $0xc] sm:$0xf] }
 0x290   : > { %v2544_v40 = vpop.f32.mrf.mxu1  ;;  %v5965_v15 = vor.u32 %v7372_v24, %v5962_v26 }
 0x291   : > { %v9676_v61 = vadd.f32 %v2639_v51, %v2591_v12  ;;  %v2545_v43 = vadd.f32 %v2544_v40, %v2496_v6  ;;  %2690 = vmatmul.bf16.gmra.mxu0 %v8475_v56  ;;  %v5834_v6 = vld [vmem:[%s10507_s1 + $0x18] sm:$0xf0] }
 0x292   : > { %2958 = vmatpush.bf16.msrb.mxu2 %v5965_v15  ;;  %v5837_v24 = vor.u32 %v7340_v4, %v5834_v6  ;;  %v7464_v4 = vld [vmem:[%s10507_s1 + $0x3ec] sm:$0xf]  ;;  %v6330_v6 = vld [vmem:[%s10507_s1 + $0x3f8] sm:$0xf0] }
 0x293   : > { %2739 = vmatmul.bf16.gmra.mxu1 %v8477_v57  ;;  %2788 = vmatmul.bf16.gmra.mxu2 %v8833_v7  ;;  %v3286_v26 = vmax.f32 %v2545_v43, 0.0  ;;  %v10682_v43 = vld [vmem:[#allocation42_spill] sm:$0xff] }
 0x294   : > { %2837 = vmatmul.bf16.gmra.mxu3 %v10667_v23  ;;  %2909 = vmatpush.bf16.msrb.mxu1 %v5837_v24 }
 0x296   : > { %v2593_v35 = vpop.f32.mrf.mxu2  ;;  %v2497_v39 = vpop.f32.mrf.mxu0 }
 0x297   : > { %v2594_v48 = vadd.f32 %v2593_v35, %v9519_v62  ;;  %v2642_v1 = vpop.f32.mrf.mxu3  ;;  %v2498_v34 = vadd.f32 %v2497_v39, %v9446_v33 }
 0x298   : > { %v2546_v12 = vpop.f32.mrf.mxu1 }
 0x299   : > { %v9696_v51 = vadd.f32 %v2642_v1, %v2594_v48  ;;  %v2547_v40 = vadd.f32 %v2546_v12, %v2498_v34  ;;  %v7528_v34 = vld [vmem:[%s10507_s1 + $0x5ec] sm:$0xf] }
 0x29b   : > { %v3290_v46 = vmax.f32 %v2547_v40, 0.0  ;;  %v7532_v40 = vld [vmem:[%s10507_s1 + $0x60c] sm:$0xf] }
 0x29d   : > { %v9704_v15 = vpack.c.bf16 %v3290_v46, %v3286_v26  ;;  %v6333_v26 = vor.u32 %v7464_v4, %v6330_v6  ;;  %v6602_v46 = vld [vmem:[%s10507_s1 + $0x618] sm:$0xf0] }
 0x29e   : > { %v2595_v33 = vpop.f32.mrf.mxu2  ;;  %v2500_v19 = vpop.f32.mrf.mxu0  ;;  %v6458_v4 = vld [vmem:[%s10507_s1 + $0x4f8] sm:$0xf0] }
 0x29f   : > { %10681 = vst [vmem:[#allocation38_spill] sm:$0xff] %v9704_v15  ;;  %v2596_v31 = vadd.f32 %v2595_v33, %v9519_v62  ;;  %v2644_v35 = vpop.f32.mrf.mxu3  ;;  %v2501_v48 = vadd.f32 %v2500_v19, %v9473_v54  ;;  %v6586_v54 = vld [vmem:[%s10507_s1 + $0x5f8] sm:$0xf0]  ;;  %v6605_v19 = vor.u32 %v7532_v40, %v6602_v46  ;;  %3049 = vmatpush.bf16.msra.mxu0 %v6333_v26 }
 0x2a0   : > { %v2549_v1 = vpop.f32.mrf.mxu1  ;;  %v6589_v12 = vor.u32 %v7528_v34, %v6586_v54  ;;  %v7496_v54 = vld [vmem:[%s10507_s1 + $0x4ec] sm:$0xf] }
 0x2a1   : > { %v9708_v39 = vadd.f32 %v2644_v35, %v2596_v31  ;;  %v2550_v25 = vadd.f32 %v2549_v1, %v2501_v48  ;;  %2695 = vmatmul.bf16.gmra.mxu0 %v8513_v17  ;;  %3203 = vmatpush.bf16.msra.mxu3 %v6605_v19 }
 0x2a2   : > { %3147 = vmatpush.bf16.msra.mxu2 %v6589_v12 }
 0x2a3   : > { %2744 = vmatmul.bf16.gmra.mxu1 %v8515_v22  ;;  %2793 = vmatmul.bf16.gmra.mxu2 %v10682_v43  ;;  %v3294_v15 = vmax.f32 %v2550_v25, 0.0  ;;  %v10684_v43 = vld [vmem:[#allocation27_spill] sm:$0xff]  ;;  %v10686_v25 = vld [vmem:[#allocation45_spill] sm:$0xff] }
 0x2a4   : > { %2842 = vmatmul.bf16.gmra.mxu3 %v10670_v60 }
 0x2a6   : > { %v2598_v24 = vpop.f32.mrf.mxu2  ;;  %v2502_v35 = vpop.f32.mrf.mxu0 }
 0x2a7   : > { %v2599_v33 = vadd.f32 %v2598_v24, %v9519_v62  ;;  %v2647_v31 = vpop.f32.mrf.mxu3  ;;  %v2503_v48 = vadd.f32 %v2502_v35, %v9483_v32  ;;  %v6461_v24 = vor.u32 %v7496_v54, %v6458_v4  ;;  %v7460_v54 = vld [vmem:[%s10507_s1 + $0x3cc] sm:$0xf]  ;;  %v6314_v4 = vld [vmem:[%s10507_s1 + $0x3d8] sm:$0xf0] }
 0x2a8   : > { %v2551_v1 = vpop.f32.mrf.mxu1 }
 0x2a9   : > { %v9734_v34 = vadd.f32 %v2647_v31, %v2599_v33  ;;  %v2552_v6 = vadd.f32 %v2551_v1, %v2503_v48  ;;  %3098 = vmatpush.bf16.msra.mxu1 %v6461_v24  ;;  %v10685_v48 = vld [vmem:[#allocation28_spill] sm:$0xff]  ;;  %v6317_v24 = vor.u32 %v7460_v54, %v6314_v4 }
 0x2ab   : > { %v3298_v12 = vmax.f32 %v2552_v6, 0.0  ;;  %3050 = vmatpush.bf16.msra.mxu0 %v6317_v24 }
 0x2ad   : > { %v9742_v40 = vpack.c.bf16 %v3298_v12, %v3294_v15  ;;  %v7524_v15 = vld [vmem:[%s10507_s1 + $0x5cc] sm:$0xf] }
 0x2ae   : > { %v2600_v32 = vpop.f32.mrf.mxu2  ;;  %v2505_v33 = vpop.f32.mrf.mxu0 }
 0x2af   : > { %10683 = vst [vmem:[#allocation40_spill] sm:$0xff] %v9742_v40  ;;  %v2601_v26 = vadd.f32 %v2600_v32, %v9519_v62  ;;  %v2649_v46 = vpop.f32.mrf.mxu3  ;;  %v2506_v31 = vadd.f32 %v2505_v33, %v9504_v18  ;;  %v6570_v18 = vld [vmem:[%s10507_s1 + $0x5d8] sm:$0xf0] }
 0x2b0   : > { %v2554_v35 = vpop.f32.mrf.mxu1  ;;  %v6573_v1 = vor.u32 %v7524_v15, %v6570_v18  ;;  %v6442_v15 = vld [vmem:[%s10507_s1 + $0x4d8] sm:$0xf0] }
 0x2b1   : > { %v9746_v19 = vadd.f32 %v2649_v46, %v2601_v26  ;;  %v2555_v60 = vadd.f32 %v2554_v35, %v2506_v31  ;;  %2700 = vmatmul.bf16.gmra.mxu0 %v10684_v43  ;;  %v7492_v35 = vld [vmem:[%s10507_s1 + $0x4cc] sm:$0xf] }
 0x2b2   : > { %3148 = vmatpush.bf16.msra.mxu2 %v6573_v1  ;;  %v6445_v54 = vor.u32 %v7492_v35, %v6442_v15 }
 0x2b3   : > { %2749 = vmatmul.bf16.gmra.mxu1 %v10685_v48  ;;  %2798 = vmatmul.bf16.gmra.mxu2 %v10686_v25  ;;  %v3302_v4 = vmax.f32 %v2555_v60, 0.0  ;;  %v10687_v60 = vld [vmem:[#allocation12_spill] sm:$0xff] }
 0x2b4   : > { %2847 = vmatmul.bf16.gmra.mxu3 %v10673_v47  ;;  %3099 = vmatpush.bf16.msra.mxu1 %v6445_v54 }
 0x2b6   : > { %v2603_v6 = vpop.f32.mrf.mxu2  ;;  %v2507_v26 = vpop.f32.mrf.mxu0 }
 0x2b7   : > { %v2604_v12 = vadd.f32 %v2603_v6, %v9519_v62  ;;  %v2652_v32 = vpop.f32.mrf.mxu3  ;;  %v2508_v46 = vadd.f32 %v2507_v26, %v9513_v30 }
 0x2b8   : > { %v2556_v33 = vpop.f32.mrf.mxu1 }
 0x2b9   : > { %v9766_v31 = vadd.f32 %v2652_v32, %v2604_v12  ;;  %v2557_v18 = vadd.f32 %v2556_v33, %v2508_v46 }
 0x2bb   : > { %v3306_v6 = vmax.f32 %v2557_v18, 0.0 }
 0x2bd   : > { %v9774_v1 = vpack.c.bf16 %v3306_v6, %v3302_v4 }
 0x2be   : > { %v2605_v30 = vpop.f32.mrf.mxu2  ;;  %v2666_v32 = vpop.f32.mrf.mxu0 }
 0x2bf   : > { %v2606_v24 = vadd.f32 %v2605_v30, %v9519_v62  ;;  %v2654_v12 = vpop.f32.mrf.mxu3  ;;  %v2667_v26 = vadd.f32 %v2666_v32, %v9536_v38  ;;  %v7520_v62 = vld [vmem:[%s10507_s1 + $0x5ac] sm:$0xf]  ;;  %v6554_v38 = vld [vmem:[%s10507_s1 + $0x5b8] sm:$0xf0] }
 0x2c0   : > { %v2715_v40 = vpop.f32.mrf.mxu1  ;;  %v6557_v46 = vor.u32 %v7520_v62, %v6554_v38  ;;  %v7488_v30 = vld [vmem:[%s10507_s1 + $0x4ac] sm:$0xf] }
 0x2c1   : > { %v9778_v47 = vadd.f32 %v2654_v12, %v2606_v24  ;;  %v2716_v25 = vadd.f32 %v2715_v40, %v2667_v26  ;;  %6622 = vmatmul.msk.bf16.vlgmr.msrb.gmra.mxu0 %vm1848_vm0, %v10653_v10  ;;  %v7456_v40 = vld [vmem:[%s10507_s1 + $0x3ac] sm:$0xf]  ;;  %v6426_v24 = vld [vmem:[%s10507_s1 + $0x4b8] sm:$0xf0] }
 0x2c2   : > { %3149 = vmatpush.bf16.msra.mxu2 %v6557_v46  ;;  %v6429_v32 = vor.u32 %v7488_v30, %v6426_v24 }
 0x2c3   : > { %2910 = vmatmul.bf16.vlgmr.msrb.gmra.mxu1 %v10654_v5  ;;  %2959 = vmatmul.bf16.vlgmr.msrb.gmra.mxu2 %v10687_v60  ;;  %v6298_v5 = vld [vmem:[%s10507_s1 + $0x3b8] sm:$0xf0] }
 0x2c4   : > { %3008 = vmatmul.bf16.vlgmr.msrb.gmra.mxu3 %v8267_v52  ;;  %v6301_v35 = vor.u32 %v7456_v40, %v6298_v5  ;;  %3100 = vmatpush.bf16.msra.mxu1 %v6429_v32  ;;  %v10688_v5 = vld [vmem:[#allocation33_spill] sm:$0xff] }
 0x2c6   : > { %v2764_v33 = vpop.f32.mrf.mxu2  ;;  %v2668_v18 = vpop.f32.mrf.mxu0  ;;  %3051 = vmatpush.bf16.msra.mxu0 %v6301_v35  ;;  %v10690_v35 = vld [vmem:[#allocation14_spill] sm:$0xff] }
 0x2c7   : > { %v2765_v52 = vadd.f32 %v2764_v33, %v2716_v25  ;;  %v2813_v15 = vpop.f32.mrf.mxu3  ;;  %v2669_v54 = vadd.f32 %v2668_v18, %v9548_v59  ;;  %v10689_v33 = vld [vmem:[#allocation13_spill] sm:$0xff] }
 0x2c8   : > { %v2717_v4 = vpop.f32.mrf.mxu1 }
 0x2c9   : > { %v9798_v6 = vadd.f32 %v2813_v15, %v2765_v52  ;;  %v2718_v12 = vadd.f32 %v2717_v4, %v2669_v54  ;;  %v7516_v52 = vld [vmem:[%s10507_s1 + $0x58c] sm:$0xf]  ;;  %v6282_v54 = vld [vmem:[%s10507_s1 + $0x398] sm:$0xf0] }
 0x2ca   : > { %v7452_v15 = vld [vmem:[%s10507_s1 + $0x38c] sm:$0xf] }
 0x2cb   : > { %v6285_v30 = vor.u32 %v7452_v15, %v6282_v54  ;;  %v10691_v54 = vld [vmem:[#allocation35_spill] sm:$0xff] }
 0x2cd   : > { %3052 = vmatpush.bf16.msra.mxu0 %v6285_v30  ;;  %v10693_v30 = vld [vmem:[#allocation16_spill] sm:$0xff] }
 0x2ce   : > { %v2766_v25 = vpop.f32.mrf.mxu2  ;;  %v2671_v62 = vpop.f32.mrf.mxu0 }
 0x2cf   : > { %v2767_v26 = vadd.f32 %v2766_v25, %v2718_v12  ;;  %v2815_v60 = vpop.f32.mrf.mxu3  ;;  %v2672_v59 = vadd.f32 %v2671_v62, %v9568_v13  ;;  %v6538_v13 = vld [vmem:[%s10507_s1 + $0x598] sm:$0xf0] }
 0x2d0   : > { %v2720_v38 = vpop.f32.mrf.mxu1  ;;  %v6541_v18 = vor.u32 %v7516_v52, %v6538_v13  ;;  %v6410_v62 = vld [vmem:[%s10507_s1 + $0x498] sm:$0xf0] }
 0x2d1   : > { %v9807_v40 = vadd.f32 %v2815_v60, %v2767_v26  ;;  %v2721_v46 = vadd.f32 %v2720_v38, %v2672_v59  ;;  %6623 = vmatmul.msk.bf16.gmra.mxu0 %vm1848_vm0, %v10688_v5  ;;  %v7484_v60 = vld [vmem:[%s10507_s1 + $0x48c] sm:$0xf] }
 0x2d2   : > { %3150 = vmatpush.bf16.msra.mxu2 %v6541_v18  ;;  %v6413_v38 = vor.u32 %v7484_v60, %v6410_v62 }
 0x2d3   : > { %2915 = vmatmul.bf16.gmra.mxu1 %v10689_v33  ;;  %2964 = vmatmul.bf16.gmra.mxu2 %v10690_v35 }
 0x2d4   : > { %3013 = vmatmul.bf16.gmra.mxu3 %v8323_v20  ;;  %3101 = vmatpush.bf16.msra.mxu1 %v6413_v38 }
 0x2d6   : > { %v2769_v4 = vpop.f32.mrf.mxu2  ;;  %v2673_v12 = vpop.f32.mrf.mxu0 }
 0x2d7   : > { %v2770_v20 = vadd.f32 %v2769_v4, %v2721_v46  ;;  %v2818_v24 = vpop.f32.mrf.mxu3  ;;  %v2674_v32 = vadd.f32 %v2673_v12, %v9580_v44  ;;  %v10692_v4 = vld [vmem:[#allocation15_spill] sm:$0xff] }
 0x2d8   : > { %v2722_v25 = vpop.f32.mrf.mxu1 }
 0x2d9   : > { %v9827_v26 = vadd.f32 %v2818_v24, %v2770_v20  ;;  %v2723_v59 = vadd.f32 %v2722_v25, %v2674_v32  ;;  %v7512_v20 = vld [vmem:[%s10507_s1 + $0x56c] sm:$0xf]  ;;  %v6266_v32 = vld [vmem:[%s10507_s1 + $0x378] sm:$0xf0] }
 0x2da   : > { %v7448_v24 = vld [vmem:[%s10507_s1 + $0x36c] sm:$0xf] }
 0x2db   : > { %v6269_v60 = vor.u32 %v7448_v24, %v6266_v32  ;;  %v10694_v32 = vld [vmem:[#allocation37_spill] sm:$0xff] }
 0x2dd   : > { %3053 = vmatpush.bf16.msra.mxu0 %v6269_v60  ;;  %v10696_v60 = vld [vmem:[#allocation18_spill] sm:$0xff] }
 0x2de   : > { %v2771_v46 = vpop.f32.mrf.mxu2  ;;  %v2676_v52 = vpop.f32.mrf.mxu0 }
 0x2df   : > { %v2772_v33 = vadd.f32 %v2771_v46, %v2723_v59  ;;  %v2820_v35 = vpop.f32.mrf.mxu3  ;;  %v2677_v44 = vadd.f32 %v2676_v52, %v9600_v36  ;;  %v6522_v36 = vld [vmem:[%s10507_s1 + $0x578] sm:$0xf0] }
 0x2e0   : > { %v2725_v13 = vpop.f32.mrf.mxu1  ;;  %v6525_v12 = vor.u32 %v7512_v20, %v6522_v36  ;;  %v6394_v52 = vld [vmem:[%s10507_s1 + $0x478] sm:$0xf0] }
 0x2e1   : > { %v9836_v15 = vadd.f32 %v2820_v35, %v2772_v33  ;;  %v2726_v18 = vadd.f32 %v2725_v13, %v2677_v44  ;;  %6624 = vmatmul.msk.bf16.gmra.mxu0 %vm1848_vm0, %v10691_v54  ;;  %v7480_v35 = vld [vmem:[%s10507_s1 + $0x46c] sm:$0xf] }
 0x2e2   : > { %3151 = vmatpush.bf16.msra.mxu2 %v6525_v12  ;;  %v6397_v13 = vor.u32 %v7480_v35, %v6394_v52 }
 0x2e3   : > { %2920 = vmatmul.bf16.gmra.mxu1 %v10692_v4  ;;  %2969 = vmatmul.bf16.gmra.mxu2 %v10693_v30 }
 0x2e4   : > { %3018 = vmatmul.bf16.gmra.mxu3 %v8361_v41  ;;  %3102 = vmatpush.bf16.msra.mxu1 %v6397_v13 }
 0x2e6   : > { %v2774_v25 = vpop.f32.mrf.mxu2  ;;  %v2678_v59 = vpop.f32.mrf.mxu0 }
 0x2e7   : > { %v2775_v41 = vadd.f32 %v2774_v25, %v2726_v18  ;;  %v2823_v62 = vpop.f32.mrf.mxu3  ;;  %v2679_v38 = vadd.f32 %v2678_v59, %v9612_v37  ;;  %v10695_v25 = vld [vmem:[#allocation17_spill] sm:$0xff] }
 0x2e8   : > { %v2727_v46 = vpop.f32.mrf.mxu1 }
 0x2e9   : > { %v9856_v33 = vadd.f32 %v2823_v62, %v2775_v41  ;;  %v2728_v44 = vadd.f32 %v2727_v46, %v2679_v38  ;;  %v7508_v41 = vld [vmem:[%s10507_s1 + $0x54c] sm:$0xf]  ;;  %v6250_v38 = vld [vmem:[%s10507_s1 + $0x358] sm:$0xf0] }
 0x2ea   : > { %v7444_v62 = vld [vmem:[%s10507_s1 + $0x34c] sm:$0xf] }
 0x2eb   : > { %v6253_v35 = vor.u32 %v7444_v62, %v6250_v38  ;;  %v10697_v38 = vld [vmem:[#allocation39_spill] sm:$0xff] }
 0x2ed   : > { %3054 = vmatpush.bf16.msra.mxu0 %v6253_v35  ;;  %v10699_v35 = vld [vmem:[#allocation20_spill] sm:$0xff] }
 0x2ee   : > { %v2776_v18 = vpop.f32.mrf.mxu2  ;;  %v2681_v20 = vpop.f32.mrf.mxu0 }
 0x2ef   : > { %v2777_v4 = vadd.f32 %v2776_v18, %v2728_v44  ;;  %v2825_v30 = vpop.f32.mrf.mxu3  ;;  %v2682_v37 = vadd.f32 %v2681_v20, %v9632_v50  ;;  %v6506_v50 = vld [vmem:[%s10507_s1 + $0x558] sm:$0xf0] }
 0x2f0   : > { %v2730_v36 = vpop.f32.mrf.mxu1  ;;  %v6509_v59 = vor.u32 %v7508_v41, %v6506_v50  ;;  %v6378_v20 = vld [vmem:[%s10507_s1 + $0x458] sm:$0xf0] }
 0x2f1   : > { %v9865_v24 = vadd.f32 %v2825_v30, %v2777_v4  ;;  %v2731_v12 = vadd.f32 %v2730_v36, %v2682_v37  ;;  %6625 = vmatmul.msk.bf16.gmra.mxu0 %vm1848_vm0, %v10694_v32  ;;  %v7476_v30 = vld [vmem:[%s10507_s1 + $0x44c] sm:$0xf] }
 0x2f2   : > { %3152 = vmatpush.bf16.msra.mxu2 %v6509_v59  ;;  %v6381_v36 = vor.u32 %v7476_v30, %v6378_v20 }
 0x2f3   : > { %2925 = vmatmul.bf16.gmra.mxu1 %v10695_v25  ;;  %2974 = vmatmul.bf16.gmra.mxu2 %v10696_v60 }
 0x2f4   : > { %3023 = vmatmul.bf16.gmra.mxu3 %v8399_v2  ;;  %3103 = vmatpush.bf16.msra.mxu1 %v6381_v36 }
 0x2f6   : > { %v2779_v46 = vpop.f32.mrf.mxu2  ;;  %v2683_v44 = vpop.f32.mrf.mxu0 }
 0x2f7   : > { %v2780_v2 = vadd.f32 %v2779_v46, %v2731_v12  ;;  %v2828_v52 = vpop.f32.mrf.mxu3  ;;  %v2684_v13 = vadd.f32 %v2683_v44, %v9644_v0  ;;  %v10698_v46 = vld [vmem:[#allocation19_spill] sm:$0xff] }
 0x2f8   : > { %v2732_v18 = vpop.f32.mrf.mxu1 }
 0x2f9   : > { %v9885_v4 = vadd.f32 %v2828_v52, %v2780_v2  ;;  %v2733_v37 = vadd.f32 %v2732_v18, %v2684_v13  ;;  %v7504_v2 = vld [vmem:[%s10507_s1 + $0x52c] sm:$0xf]  ;;  %v6234_v13 = vld [vmem:[%s10507_s1 + $0x338] sm:$0xf0] }
 0x2fa   : > { %v7440_v52 = vld [vmem:[%s10507_s1 + $0x32c] sm:$0xf] }
 0x2fb   : > { %v6237_v30 = vor.u32 %v7440_v52, %v6234_v13  ;;  %v10700_v13 = vld [vmem:[#allocation41_spill] sm:$0xff] }
 0x2fd   : > { %3055 = vmatpush.bf16.msra.mxu0 %v6237_v30  ;;  %v10702_v30 = vld [vmem:[#allocation22_spill] sm:$0xff] }
 0x2fe   : > { %v2781_v12 = vpop.f32.mrf.mxu2  ;;  %v2686_v41 = vpop.f32.mrf.mxu0 }
 0x2ff   : > { %v2782_v25 = vadd.f32 %v2781_v12, %v2733_v37  ;;  %v2830_v60 = vpop.f32.mrf.mxu3  ;;  %v2687_v0 = vadd.f32 %v2686_v41, %v9664_v14  ;;  %v6490_v14 = vld [vmem:[%s10507_s1 + $0x538] sm:$0xf0] }
 0x300   : > { %v2735_v50 = vpop.f32.mrf.mxu1  ;;  %v6493_v44 = vor.u32 %v7504_v2, %v6490_v14  ;;  %v6362_v41 = vld [vmem:[%s10507_s1 + $0x438] sm:$0xf0] }
 0x301   : > { %v9894_v62 = vadd.f32 %v2830_v60, %v2782_v25  ;;  %v2736_v59 = vadd.f32 %v2735_v50, %v2687_v0  ;;  %6626 = vmatmul.msk.bf16.gmra.mxu0 %vm1848_vm0, %v10697_v38  ;;  %v7472_v60 = vld [vmem:[%s10507_s1 + $0x42c] sm:$0xf] }
 0x302   : > { %3153 = vmatpush.bf16.msra.mxu2 %v6493_v44  ;;  %v6365_v50 = vor.u32 %v7472_v60, %v6362_v41 }
 0x303   : > { %2930 = vmatmul.bf16.gmra.mxu1 %v10698_v46  ;;  %2979 = vmatmul.bf16.gmra.mxu2 %v10699_v35 }
 0x304   : > { %3028 = vmatmul.bf16.gmra.mxu3 %v8437_v27  ;;  %3104 = vmatpush.bf16.msra.mxu1 %v6365_v50 }
 0x306   : > { %v2784_v18 = vpop.f32.mrf.mxu2  ;;  %v2688_v37 = vpop.f32.mrf.mxu0 }
 0x307   : > { %v2785_v27 = vadd.f32 %v2784_v18, %v2736_v59  ;;  %v2833_v20 = vpop.f32.mrf.mxu3  ;;  %v2689_v36 = vadd.f32 %v2688_v37, %v9676_v61  ;;  %v10701_v18 = vld [vmem:[#allocation21_spill] sm:$0xff] }
 0x308   : > { %v2737_v12 = vpop.f32.mrf.mxu1 }
 0x309   : > { %v9914_v25 = vadd.f32 %v2833_v20, %v2785_v27  ;;  %v2738_v0 = vadd.f32 %v2737_v12, %v2689_v36  ;;  %v7500_v27 = vld [vmem:[%s10507_s1 + $0x50c] sm:$0xf]  ;;  %v6218_v36 = vld [vmem:[%s10507_s1 + $0x318] sm:$0xf0] }
 0x30a   : > { %v7436_v20 = vld [vmem:[%s10507_s1 + $0x30c] sm:$0xf] }
 0x30b   : > { %v6221_v60 = vor.u32 %v7436_v20, %v6218_v36  ;;  %v10703_v36 = vld [vmem:[#allocation44_spill] sm:$0xff] }
 0x30d   : > { %3056 = vmatpush.bf16.msra.mxu0 %v6221_v60  ;;  %v10705_v60 = vld [vmem:[#allocation24_spill] sm:$0xff] }
 0x30e   : > { %v2786_v59 = vpop.f32.mrf.mxu2  ;;  %v2691_v2 = vpop.f32.mrf.mxu0 }
 0x30f   : > { %v2787_v46 = vadd.f32 %v2786_v59, %v2738_v0  ;;  %v2835_v35 = vpop.f32.mrf.mxu3  ;;  %v2692_v61 = vadd.f32 %v2691_v2, %v9696_v51  ;;  %v6474_v51 = vld [vmem:[%s10507_s1 + $0x518] sm:$0xf0] }
 0x310   : > { %v2740_v14 = vpop.f32.mrf.mxu1  ;;  %v6477_v37 = vor.u32 %v7500_v27, %v6474_v51  ;;  %v6346_v2 = vld [vmem:[%s10507_s1 + $0x418] sm:$0xf0] }
 0x311   : > { %v9923_v52 = vadd.f32 %v2835_v35, %v2787_v46  ;;  %v2741_v44 = vadd.f32 %v2740_v14, %v2692_v61  ;;  %6627 = vmatmul.msk.bf16.gmra.mxu0 %vm1848_vm0, %v10700_v13  ;;  %v7468_v35 = vld [vmem:[%s10507_s1 + $0x40c] sm:$0xf] }
 0x312   : > { %3154 = vmatpush.bf16.msra.mxu2 %v6477_v37  ;;  %v6349_v14 = vor.u32 %v7468_v35, %v6346_v2 }
 0x313   : > { %2935 = vmatmul.bf16.gmra.mxu1 %v10701_v18  ;;  %2984 = vmatmul.bf16.gmra.mxu2 %v10702_v30 }
 0x314   : > { %3033 = vmatmul.bf16.gmra.mxu3 %v8475_v56  ;;  %3105 = vmatpush.bf16.msra.mxu1 %v6349_v14 }
 0x316   : > { %v2789_v12 = vpop.f32.mrf.mxu2  ;;  %v2693_v0 = vpop.f32.mrf.mxu0 }
 0x317   : > { %v2790_v56 = vadd.f32 %v2789_v12, %v2741_v44  ;;  %v2838_v41 = vpop.f32.mrf.mxu3  ;;  %v2694_v50 = vadd.f32 %v2693_v0, %v9708_v39  ;;  %v10704_v12 = vld [vmem:[#allocation23_spill] sm:$0xff] }
 0x318   : > { %v2742_v59 = vpop.f32.mrf.mxu1 }
 0x319   : > { %v9943_v46 = vadd.f32 %v2838_v41, %v2790_v56  ;;  %v2743_v61 = vadd.f32 %v2742_v59, %v2694_v50 }
 0x31e   : > { %v2791_v44 = vpop.f32.mrf.mxu2  ;;  %v2696_v27 = vpop.f32.mrf.mxu0 }
 0x31f   : > { %v2792_v18 = vadd.f32 %v2791_v44, %v2743_v61  ;;  %v2840_v30 = vpop.f32.mrf.mxu3  ;;  %v2697_v39 = vadd.f32 %v2696_v27, %v9734_v34 }
 0x320   : > { %v2745_v51 = vpop.f32.mrf.mxu1 }
 0x321   : > { %v9952_v20 = vadd.f32 %v2840_v30, %v2792_v18  ;;  %v2746_v37 = vadd.f32 %v2745_v51, %v2697_v39  ;;  %6628 = vmatmul.msk.bf16.gmra.mxu0 %vm1848_vm0, %v10703_v36  ;;  %v7008_v51 = vld [vmem:[#allocation2 + $0x2e0] sm:$0xf] }
 0x323   : > { %2940 = vmatmul.bf16.gmra.mxu1 %v10704_v12  ;;  %2989 = vmatmul.bf16.gmra.mxu2 %v10705_v60 }
 0x324   : > { %3038 = vmatmul.bf16.gmra.mxu3 %v8513_v17 }
 0x326   : > { %v2794_v56 = vpop.f32.mrf.mxu2  ;;  %v2698_v50 = vpop.f32.mrf.mxu0 }
 0x327   : > { %v2795_v41 = vadd.f32 %v2794_v56, %v2746_v37  ;;  %v2843_v0 = vpop.f32.mrf.mxu3  ;;  %v2699_v59 = vadd.f32 %v2698_v50, %v9746_v19  ;;  %v10706_v19 = vld [vmem:[#allocation26_spill] sm:$0xff]  ;;  %v7629_v37 = vld [vmem:[#allocation2 + $0x2ec] sm:$0xf0] }
 0x328   : > { %v2747_v34 = vpop.f32.mrf.mxu1  ;;  %v7009_v12 = vor.u32 %v7629_v37, %v7008_v51 }
 0x329   : > { %v9960_v35 = vadd.f32 %v2843_v0, %v2795_v41  ;;  %v2748_v2 = vadd.f32 %v2747_v34, %v2699_v59  ;;  %v6752_v34 = vld [vmem:[#allocation2 + $0xe0] sm:$0xf] }
 0x32a   : > { %4217 = vmatpush.bf16.msrb.mxu2 %v7009_v12 }
 0x32e   : > { %v2796_v61 = vpop.f32.mrf.mxu2  ;;  %v2701_v18 = vpop.f32.mrf.mxu0 }
 0x32f   : > { %v2797_v14 = vadd.f32 %v2796_v61, %v2748_v2  ;;  %v2845_v44 = vpop.f32.mrf.mxu3  ;;  %v2702_v30 = vadd.f32 %v2701_v18, %v9766_v31  ;;  %v7565_v2 = vld [vmem:[#allocation2 + $0xec] sm:$0xf0]  ;;  %v6880_v18 = vld [vmem:[#allocation2 + $0x1e0] sm:$0xf] }
 0x330   : > { %v2750_v27 = vpop.f32.mrf.mxu1 }
 0x331   : > { %v9963_v39 = vadd.f32 %v2845_v44, %v2797_v14  ;;  %v2751_v17 = vadd.f32 %v2750_v27, %v2702_v30  ;;  %6629 = vmatmul.msk.bf16.gmra.mxu0 %vm1848_vm0, %v10674_v63  ;;  %v6753_v14 = vor.u32 %v7565_v2, %v6752_v34  ;;  %v7661_v44 = vld [vmem:[#allocation2 + $0x3ec] sm:$0xf0]  ;;  %v6992_v34 = vld [vmem:[#allocation2 + $0x2c0] sm:$0xf] }
 0x332   : > { %v7597_v30 = vld [vmem:[#allocation2 + $0x1ec] sm:$0xf0] }
 0x333   : > { %2945 = vmatmul.bf16.gmra.mxu1 %v10675_v16  ;;  %2994 = vmatmul.bf16.gmra.mxu2 %v10706_v19  ;;  %v7136_v16 = vld [vmem:[#allocation2 + $0x3e0] sm:$0xf]  ;;  %v6881_v27 = vor.u32 %v7597_v30, %v6880_v18  ;;  %v7625_v2 = vld [vmem:[#allocation2 + $0x2cc] sm:$0xf0] }
 0x334   : > { %3043 = vmatmul.bf16.gmra.mxu3 %v10684_v43  ;;  %v7137_v43 = vor.u32 %v7661_v44, %v7136_v16  ;;  %4119 = vmatpush.bf16.msrb.mxu0 %v6753_v14  ;;  %v6993_v16 = vor.u32 %v7625_v2, %v6992_v34  ;;  %v6736_v30 = vld [vmem:[#allocation2 + $0xc0] sm:$0xf] }
 0x335   : > { %4168 = vmatpush.bf16.msrb.mxu1 %v6881_v27  ;;  %v7561_v27 = vld [vmem:[#allocation2 + $0xcc] sm:$0xf0] }
 0x336   : > { %v2799_v60 = vpop.f32.mrf.mxu2  ;;  %v2703_v31 = vpop.f32.mrf.mxu0  ;;  %4266 = vmatpush.bf16.msrb.mxu3 %v7137_v43  ;;  %4218 = vmatpush.bf16.msrb.mxu2 %v6993_v16 }
 0x337   : > { %v2800_v56 = vadd.f32 %v2799_v60, %v2751_v17  ;;  %v2848_v41 = vpop.f32.mrf.mxu3  ;;  %v2704_v0 = vadd.f32 %v2703_v31, %v9778_v47  ;;  %v7765_v47 = vld [vmem:[%s10508_s2] sm:$0xf] }
 0x338   : > { %v2752_v50 = vpop.f32.mrf.mxu1  ;;  %v9976_v12 = vperm.slane %v7765_v47, 3 }
 0x339   : > { %v9971_v59 = vadd.f32 %v2848_v41, %v2800_v56  ;;  %v2753_v61 = vadd.f32 %v2752_v50, %v2704_v0  ;;  %v10707_v0 = vld [vmem:[#allocation29_spill] sm:$0xff]  ;;  %v10708_v50 = vld [vmem:[#allocation30_spill] sm:$0xff] }
 0x33e   : > { %v2801_v17 = vpop.f32.mrf.mxu2  ;;  %v2862_v37 = vpop.f32.mrf.mxu0 }
 0x33f   : > { %v2802_v19 = vadd.f32 %v2801_v17, %v2753_v61  ;;  %v2850_v51 = vpop.f32.mrf.mxu3  ;;  %v2863_v60 = vadd.f32 %v2862_v37, %v9798_v6  ;;  %v7120_v17 = vld [vmem:[#allocation2 + $0x3c0] sm:$0xf]  ;;  %v6737_v37 = vor.u32 %v7561_v27, %v6736_v30 }
 0x340   : > { %v2911_v56 = vpop.f32.mrf.mxu1 }
 0x341   : > { %v9979_v41 = vadd.f32 %v2850_v51, %v2802_v19  ;;  %3057 = vmatmul.bf16.vlgmr.msra.gmra.mxu0 %v8275_v55  ;;  %v2912_v31 = vadd.f32 %v2911_v56, %v9976_v12  ;;  %v3247_v19 = vmax.f32 %v2863_v60, 0.0 }
 0x342   : > { %4120 = vmatpush.bf16.msrb.mxu0 %v6737_v37 }
 0x343   : > { %3106 = vmatmul.bf16.vlgmr.msra.gmra.mxu1 %v10707_v0  ;;  %3155 = vmatmul.bf16.vlgmr.msra.gmra.mxu2 %v10708_v50  ;;  %v7593_v0 = vld [vmem:[#allocation2 + $0x1cc] sm:$0xf0] }
 0x344   : > { %6630 = vmatmul.msk.bf16.vlgmr.msra.gmra.mxu3 %vm1848_vm0, %v10653_v10  ;;  %v7657_v10 = vld [vmem:[#allocation2 + $0x3cc] sm:$0xf0] }
 0x345   : > { %v7121_v47 = vor.u32 %v7657_v10, %v7120_v17  ;;  %v6720_v10 = vld [vmem:[#allocation2 + $0xa0] sm:$0xf] }
 0x346   : > { %v2960_v61 = vpop.f32.mrf.mxu2  ;;  %v2864_v44 = vpop.f32.mrf.mxu0 }
 0x347   : > { %v2961_v14 = vadd.f32 %v2960_v61, %v2912_v31  ;;  %v3009_v6 = vpop.f32.mrf.mxu3  ;;  %v2865_v43 = vadd.f32 %v2864_v44, %v9807_v40  ;;  %v6864_v31 = vld [vmem:[#allocation2 + $0x1c0] sm:$0xf]  ;;  %4267 = vmatpush.bf16.msrb.mxu3 %v7121_v47 }
 0x348   : > { %v2913_v55 = vpop.f32.mrf.mxu1  ;;  %v6865_v40 = vor.u32 %v7593_v0, %v6864_v31  ;;  %v7104_v47 = vld [vmem:[#allocation2 + $0x3a0] sm:$0xf] }
 0x349   : > { %v9988_v18 = vadd.f32 %v3009_v6, %v2961_v14  ;;  %v3251_v51 = vmax.f32 %v2865_v43, 0.0  ;;  %v2914_v50 = vadd.f32 %v2913_v55, %v9976_v12  ;;  %v6976_v43 = vld [vmem:[#allocation2 + $0x2a0] sm:$0xf]  ;;  %v7621_v55 = vld [vmem:[#allocation2 + $0x2ac] sm:$0xf0] }
 0x34a   : > { %4169 = vmatpush.bf16.msrb.mxu1 %v6865_v40  ;;  %v6977_v30 = vor.u32 %v7621_v55, %v6976_v43 }
 0x34b   : > { %v9990_v56 = vpack.c.bf16 %v3251_v51, %v3247_v19 }
 0x34c   : > { %4219 = vmatpush.bf16.msrb.mxu2 %v6977_v30 }
 0x34e   : > { %v2962_v34 = vpop.f32.mrf.mxu2  ;;  %v2867_v61 = vpop.f32.mrf.mxu0 }
 0x34f   : > { %v2963_v2 = vadd.f32 %v2962_v34, %v2914_v50  ;;  %v3011_v16 = vpop.f32.mrf.mxu3  ;;  %v2868_v60 = vadd.f32 %v2867_v61, %v9827_v26  ;;  %v6848_v34 = vld [vmem:[#allocation2 + $0x1a0] sm:$0xf] }
 0x350   : > { %v2916_v14 = vpop.f32.mrf.mxu1 }
 0x351   : > { %v9994_v6 = vadd.f32 %v3011_v16, %v2963_v2  ;;  %3062 = vmatmul.bf16.gmra.mxu0 %v8325_v21  ;;  %v2917_v44 = vadd.f32 %v2916_v14, %v9976_v12  ;;  %v7589_v2 = vld [vmem:[#allocation2 + $0x1ac] sm:$0xf0] }
 0x353   : > { %3111 = vmatmul.bf16.gmra.mxu1 %v8645_v45  ;;  %3160 = vmatmul.bf16.gmra.mxu2 %v10655_v58  ;;  %v7557_v45 = vld [vmem:[#allocation2 + $0xac] sm:$0xf0]  ;;  %v3255_v58 = vmax.f32 %v2868_v60, 0.0 }
 0x354   : > { %6631 = vmatmul.msk.bf16.gmra.mxu3 %vm1848_vm0, %v10688_v5  ;;  %v6721_v0 = vor.u32 %v7557_v45, %v6720_v10  ;;  %v7653_v5 = vld [vmem:[#allocation2 + $0x3ac] sm:$0xf0] }
 0x355   : > { %v7105_v50 = vor.u32 %v7653_v5, %v7104_v47 }
 0x356   : > { %v2965_v27 = vpop.f32.mrf.mxu2  ;;  %v2869_v19 = vpop.f32.mrf.mxu0  ;;  %4121 = vmatpush.bf16.msrb.mxu0 %v6721_v0 }
 0x357   : > { %v2966_v17 = vadd.f32 %v2965_v27, %v2917_v44  ;;  %v3014_v26 = vpop.f32.mrf.mxu3  ;;  %v2870_v51 = vadd.f32 %v2869_v19, %v9836_v15  ;;  %4268 = vmatpush.bf16.msrb.mxu3 %v7105_v50  ;;  %v6849_v15 = vor.u32 %v7589_v2, %v6848_v34  ;;  %v6832_v2 = vld [vmem:[#allocation2 + $0x180] sm:$0xf] }
 0x358   : > { %v2918_v21 = vpop.f32.mrf.mxu1 }
 0x359   : > { %v10003_v37 = vadd.f32 %v3014_v26, %v2966_v17  ;;  %v3259_v31 = vmax.f32 %v2870_v51, 0.0  ;;  %v2919_v16 = vadd.f32 %v2918_v21, %v9976_v12  ;;  %4170 = vmatpush.bf16.msrb.mxu1 %v6849_v15  ;;  %v6960_v17 = vld [vmem:[#allocation2 + $0x280] sm:$0xf]  ;;  %v7617_v26 = vld [vmem:[#allocation2 + $0x28c] sm:$0xf0] }
 0x35a   : > { %v6961_v19 = vor.u32 %v7617_v26, %v6960_v17  ;;  %v6944_v26 = vld [vmem:[#allocation2 + $0x260] sm:$0xf] }
 0x35b   : > { %v10005_v40 = vpack.c.bf16 %v3259_v31, %v3255_v58  ;;  %v6704_v58 = vld [vmem:[#allocation2 + $0x80] sm:$0xf] }
 0x35c   : > { %4220 = vmatpush.bf16.msrb.mxu2 %v6961_v19  ;;  %v7088_v31 = vld [vmem:[#allocation2 + $0x380] sm:$0xf]  ;;  %v7613_v19 = vld [vmem:[#allocation2 + $0x26c] sm:$0xf0] }
 0x35e   : > { %v2967_v61 = vpop.f32.mrf.mxu2  ;;  %v2872_v43 = vpop.f32.mrf.mxu0 }
 0x35f   : > { %v2968_v14 = vadd.f32 %v2967_v61, %v2919_v16  ;;  %v3016_v44 = vpop.f32.mrf.mxu3  ;;  %v2873_v60 = vadd.f32 %v2872_v43, %v9856_v33  ;;  %v7585_v16 = vld [vmem:[#allocation2 + $0x18c] sm:$0xf0] }
 0x360   : > { %v2921_v55 = vpop.f32.mrf.mxu1 }
 0x361   : > { %v10009_v30 = vadd.f32 %v3016_v44, %v2968_v14  ;;  %3067 = vmatmul.bf16.gmra.mxu0 %v8363_v42  ;;  %v2922_v27 = vadd.f32 %v2921_v55, %v9976_v12 }
 0x363   : > { %3116 = vmatmul.bf16.gmra.mxu1 %v8692_v11  ;;  %3165 = vmatmul.bf16.gmra.mxu2 %v10658_v29  ;;  %v7553_v11 = vld [vmem:[#allocation2 + $0x8c] sm:$0xf0]  ;;  %v3263_v29 = vmax.f32 %v2873_v60, 0.0 }
 0x364   : > { %6632 = vmatmul.msk.bf16.gmra.mxu3 %vm1848_vm0, %v10691_v54  ;;  %v6705_v5 = vor.u32 %v7553_v11, %v6704_v58  ;;  %v7649_v54 = vld [vmem:[#allocation2 + $0x38c] sm:$0xf0]  ;;  %v6688_v58 = vld [vmem:[#allocation2 + $0x60] sm:$0xf] }
 0x365   : > { %v7089_v50 = vor.u32 %v7649_v54, %v7088_v31  ;;  %v7072_v11 = vld [vmem:[#allocation2 + $0x360] sm:$0xf] }
 0x366   : > { %v2970_v51 = vpop.f32.mrf.mxu2  ;;  %v2874_v10 = vpop.f32.mrf.mxu0  ;;  %4122 = vmatpush.bf16.msrb.mxu0 %v6705_v5  ;;  %v6816_v54 = vld [vmem:[#allocation2 + $0x160] sm:$0xf] }
 0x367   : > { %v2971_v21 = vadd.f32 %v2970_v51, %v2922_v27  ;;  %v3019_v33 = vpop.f32.mrf.mxu3  ;;  %v2875_v45 = vadd.f32 %v2874_v10, %v9865_v24  ;;  %4269 = vmatpush.bf16.msrb.mxu3 %v7089_v50  ;;  %v6833_v24 = vor.u32 %v7585_v16, %v6832_v2  ;;  %v6945_v51 = vor.u32 %v7613_v19, %v6944_v26  ;;  %v7581_v50 = vld [vmem:[#allocation2 + $0x16c] sm:$0xf0] }
 0x368   : > { %v2923_v42 = vpop.f32.mrf.mxu1 }
 0x369   : > { %v10018_v47 = vadd.f32 %v3019_v33, %v2971_v21  ;;  %v3267_v0 = vmax.f32 %v2875_v45, 0.0  ;;  %v2924_v15 = vadd.f32 %v2923_v42, %v9976_v12  ;;  %4171 = vmatpush.bf16.msrb.mxu1 %v6833_v24  ;;  %4221 = vmatpush.bf16.msrb.mxu2 %v6945_v51 }
 0x36b   : > { %v10020_v34 = vpack.c.bf16 %v3267_v0, %v3263_v29 }
 0x36e   : > { %v2972_v61 = vpop.f32.mrf.mxu2  ;;  %v2877_v43 = vpop.f32.mrf.mxu0 }
 0x36f   : > { %v2973_v14 = vadd.f32 %v2972_v61, %v2924_v15  ;;  %v3021_v44 = vpop.f32.mrf.mxu3  ;;  %v2878_v60 = vadd.f32 %v2877_v43, %v9885_v4 }
 0x370   : > { %v2926_v55 = vpop.f32.mrf.mxu1 }
 0x371   : > { %v10024_v27 = vadd.f32 %v3021_v44, %v2973_v14  ;;  %3072 = vmatmul.bf16.gmra.mxu0 %v8401_v3  ;;  %v2927_v17 = vadd.f32 %v2926_v55, %v9976_v12  ;;  %v6928_v55 = vld [vmem:[#allocation2 + $0x240] sm:$0xf] }
 0x373   : > { %3121 = vmatmul.bf16.gmra.mxu1 %v8739_v8  ;;  %3170 = vmatmul.bf16.gmra.mxu2 %v10661_v49  ;;  %v7549_v8 = vld [vmem:[#allocation2 + $0x6c] sm:$0xf0]  ;;  %v3271_v49 = vmax.f32 %v2878_v60, 0.0 }
 0x374   : > { %6633 = vmatmul.msk.bf16.gmra.mxu3 %vm1848_vm0, %v10694_v32  ;;  %v6689_v29 = vor.u32 %v7549_v8, %v6688_v58  ;;  %v7645_v32 = vld [vmem:[#allocation2 + $0x36c] sm:$0xf0] }
 0x375   : > { %v7073_v0 = vor.u32 %v7645_v32, %v7072_v11 }
 0x376   : > { %v2975_v21 = vpop.f32.mrf.mxu2  ;;  %v2879_v10 = vpop.f32.mrf.mxu0  ;;  %4123 = vmatpush.bf16.msrb.mxu0 %v6689_v29 }
 0x377   : > { %v2976_v33 = vadd.f32 %v2975_v21, %v2927_v17  ;;  %v3024_v4 = vpop.f32.mrf.mxu3  ;;  %v2880_v45 = vadd.f32 %v2879_v10, %v9894_v62  ;;  %4270 = vmatpush.bf16.msrb.mxu3 %v7073_v0  ;;  %v6817_v62 = vor.u32 %v7581_v50, %v6816_v54  ;;  %v7609_v17 = vld [vmem:[#allocation2 + $0x24c] sm:$0xf0]  ;;  %v6672_v10 = vld [vmem:[#allocation2 + $0x40] sm:$0xf] }
 0x378   : > { %v2928_v3 = vpop.f32.mrf.mxu1  ;;  %v6929_v26 = vor.u32 %v7609_v17, %v6928_v55 }
 0x379   : > { %v10033_v42 = vadd.f32 %v3024_v4, %v2976_v33  ;;  %v3275_v31 = vmax.f32 %v2880_v45, 0.0  ;;  %v2929_v2 = vadd.f32 %v2928_v3, %v9976_v12  ;;  %4172 = vmatpush.bf16.msrb.mxu1 %v6817_v62  ;;  %v7056_v45 = vld [vmem:[#allocation2 + $0x340] sm:$0xf] }
 0x37a   : > { %4222 = vmatpush.bf16.msrb.mxu2 %v6929_v26  ;;  %v6656_v26 = vld [vmem:[#allocation2 + $0x20] sm:$0xf] }
 0x37b   : > { %v10035_v5 = vpack.c.bf16 %v3275_v31, %v3271_v49  ;;  %v6800_v49 = vld [vmem:[#allocation2 + $0x140] sm:$0xf]  ;;  %v7577_v31 = vld [vmem:[#allocation2 + $0x14c] sm:$0xf0] }
 0x37e   : > { %v2977_v16 = vpop.f32.mrf.mxu2  ;;  %v2882_v61 = vpop.f32.mrf.mxu0 }
 0x37f   : > { %v2978_v15 = vadd.f32 %v2977_v16, %v2929_v2  ;;  %v3026_v24 = vpop.f32.mrf.mxu3  ;;  %v2883_v14 = vadd.f32 %v2882_v61, %v9914_v25 }
 0x380   : > { %v2931_v44 = vpop.f32.mrf.mxu1 }
 0x381   : > { %v10039_v43 = vadd.f32 %v3026_v24, %v2978_v15  ;;  %3077 = vmatmul.bf16.gmra.mxu0 %v8439_v28  ;;  %v2932_v60 = vadd.f32 %v2931_v44, %v9976_v12  ;;  %v6912_v15 = vld [vmem:[#allocation2 + $0x220] sm:$0xf]  ;;  %v7605_v24 = vld [vmem:[#allocation2 + $0x22c] sm:$0xf0] }
 0x382   : > { %v6913_v61 = vor.u32 %v7605_v24, %v6912_v15  ;;  %v10709_v24 = vld [vmem:[#allocation42_spill] sm:$0xff] }
 0x383   : > { %3126 = vmatmul.bf16.gmra.mxu1 %v8786_v9  ;;  %3175 = vmatmul.bf16.gmra.mxu2 %v10664_v53  ;;  %v7545_v9 = vld [vmem:[#allocation2 + $0x4c] sm:$0xf0]  ;;  %v3279_v53 = vmax.f32 %v2883_v14, 0.0 }
 0x384   : > { %6634 = vmatmul.msk.bf16.gmra.mxu3 %vm1848_vm0, %v10697_v38  ;;  %v6673_v58 = vor.u32 %v7545_v9, %v6672_v10  ;;  %v7641_v38 = vld [vmem:[#allocation2 + $0x34c] sm:$0xf0]  ;;  %4223 = vmatpush.bf16.msrb.mxu2 %v6913_v61  ;;  %v10710_v61 = vld [vmem:[#allocation43_spill] sm:$0xff] }
 0x385   : > { %v7057_v8 = vor.u32 %v7641_v38, %v7056_v45 }
 0x386   : > { %v2980_v19 = vpop.f32.mrf.mxu2  ;;  %v2884_v21 = vpop.f32.mrf.mxu0  ;;  %4124 = vmatpush.bf16.msrb.mxu0 %v6673_v58  ;;  %v6768_v58 = vld [vmem:[#allocation2 + $0x100] sm:$0xf] }
 0x387   : > { %v2981_v51 = vadd.f32 %v2980_v19, %v2932_v60  ;;  %v3029_v25 = vpop.f32.mrf.mxu3  ;;  %v2885_v33 = vadd.f32 %v2884_v21, %v9923_v52  ;;  %4271 = vmatpush.bf16.msrb.mxu3 %v7057_v8  ;;  %v6801_v52 = vor.u32 %v7577_v31, %v6800_v49  ;;  %v7040_v19 = vld [vmem:[#allocation2 + $0x320] sm:$0xf] }
 0x388   : > { %v2933_v28 = vpop.f32.mrf.mxu1  ;;  %v6784_v21 = vld [vmem:[#allocation2 + $0x120] sm:$0xf] }
 0x389   : > { %v10048_v4 = vadd.f32 %v3029_v25, %v2981_v51  ;;  %v3283_v3 = vmax.f32 %v2885_v33, 0.0  ;;  %v2934_v29 = vadd.f32 %v2933_v28, %v9976_v12  ;;  %4173 = vmatpush.bf16.msrb.mxu1 %v6801_v52  ;;  %v7573_v28 = vld [vmem:[#allocation2 + $0x12c] sm:$0xf0]  ;;  %v6896_v52 = vld [vmem:[#allocation2 + $0x200] sm:$0xf] }
 0x38a   : > { %v6785_v9 = vor.u32 %v7573_v28, %v6784_v21 }
 0x38b   : > { %v10050_v11 = vpack.c.bf16 %v3283_v3, %v3279_v53  ;;  %v6640_v53 = vld [vmem:[#allocation2] sm:$0xf]  ;;  %v7537_v3 = vld [vmem:[#allocation2 + $0xc] sm:$0xf0] }
 0x38c   : > { %v6641_v31 = vor.u32 %v7537_v3, %v6640_v53  ;;  %v7627_v53 = vld [vmem:[#allocation2 + $0x2e4] sm:$0xf]  ;;  %v7010_v3 = vld [vmem:[#allocation2 + $0x2f0] sm:$0xf0] }
 0x38d   : > { %4174 = vmatpush.bf16.msrb.mxu1 %v6785_v9 }
 0x38e   : > { %v2982_v32 = vpop.f32.mrf.mxu2  ;;  %v2887_v50 = vpop.f32.mrf.mxu0 }
 0x38f   : > { %v10053_v0 = vadd.f32 %v2982_v32, %v2934_v29  ;;  %v10055_v54 = vpop.f32.mrf.mxu3  ;;  %v2888_v2 = vadd.f32 %v2887_v50, %v9943_v46  ;;  %v7569_v29 = vld [vmem:[#allocation2 + $0x10c] sm:$0xf0] }
 0x390   : > { %v2936_v62 = vpop.f32.mrf.mxu1  ;;  %v7601_v32 = vld [vmem:[#allocation2 + $0x20c] sm:$0xf0] }
 0x391   : > { %3082 = vmatmul.bf16.gmra.mxu0 %v8477_v57  ;;  %v2937_v16 = vadd.f32 %v2936_v62, %v9976_v12  ;;  %v6769_v62 = vor.u32 %v7569_v29, %v6768_v58 }
 0x393   : > { %3131 = vmatmul.bf16.gmra.mxu1 %v8833_v7  ;;  %3180 = vmatmul.bf16.gmra.mxu2 %v10667_v23  ;;  %v7541_v7 = vld [vmem:[#allocation2 + $0x2c] sm:$0xf0]  ;;  %v3287_v23 = vmax.f32 %v2888_v2, 0.0 }
 0x394   : > { %6635 = vmatmul.msk.bf16.gmra.mxu3 %vm1848_vm0, %v10700_v13  ;;  %v6657_v25 = vor.u32 %v7541_v7, %v6656_v26  ;;  %v7637_v13 = vld [vmem:[#allocation2 + $0x32c] sm:$0xf0]  ;;  %4175 = vmatpush.bf16.msrb.mxu1 %v6769_v62  ;;  %v7024_v7 = vld [vmem:[#allocation2 + $0x300] sm:$0xf]  ;;  %v7563_v62 = vld [vmem:[#allocation2 + $0xe4] sm:$0xf] }
 0x395   : > { %v7041_v33 = vor.u32 %v7637_v13, %v7040_v19  ;;  %v7633_v19 = vld [vmem:[#allocation2 + $0x30c] sm:$0xf0] }
 0x396   : > { %v2985_v14 = vpop.f32.mrf.mxu2  ;;  %v2889_v55 = vpop.f32.mrf.mxu0  ;;  %4125 = vmatpush.bf16.msrb.mxu0 %v6657_v25 }
 0x397   : > { %v2986_v44 = vadd.f32 %v2985_v14, %v2937_v16  ;;  %v3034_v60 = vpop.f32.mrf.mxu3  ;;  %v2890_v46 = vadd.f32 %v2889_v55, %v9952_v20  ;;  %4272 = vmatpush.bf16.msrb.mxu3 %v7041_v33  ;;  %v6897_v16 = vor.u32 %v7601_v32, %v6896_v52 }
 0x398   : > { %v2938_v57 = vpop.f32.mrf.mxu1 }
 0x399   : > { %v10065_v17 = vadd.f32 %v3034_v60, %v2986_v44  ;;  %v3291_v51 = vmax.f32 %v2890_v46, 0.0  ;;  %v2939_v45 = vadd.f32 %v2938_v57, %v9976_v12  ;;  %4224 = vmatpush.bf16.msrb.mxu2 %v6897_v16  ;;  %v6754_v16 = vld [vmem:[#allocation2 + $0xf0] sm:$0xf0] }
 0x39a   : > { %4126 = vmatpush.bf16.msrb.mxu0 %v6641_v31 }
 0x39b   : > { %v10067_v10 = vpack.c.bf16 %v3291_v51, %v3287_v23  ;;  %v7025_v51 = vor.u32 %v7633_v19, %v7024_v7  ;;  %v10713_v19 = vld [vmem:[#allocation48_spill] sm:$0xff] }
 0x39d   : > { %4273 = vmatpush.bf16.msrb.mxu3 %v7025_v51  ;;  %v10714_v51 = vld [vmem:[#allocation31_spill] sm:$0xff] }
 0x39e   : > { %v2987_v20 = vpop.f32.mrf.mxu2  ;;  %v2892_v49 = vpop.f32.mrf.mxu0 }
 0x39f   : > { %v10070_v38 = vadd.f32 %v2987_v20, %v2939_v45  ;;  %v10072_v8 = vpop.f32.mrf.mxu3  ;;  %v2893_v50 = vadd.f32 %v2892_v49, %v9960_v35  ;;  %v10711_v45 = vld [vmem:[#allocation45_spill] sm:$0xff]  ;;  %v10712_v20 = vld [vmem:[#allocation46_spill] sm:$0xff]  ;;  %v7013_v49 = vor.u32 %v7627_v53, %v7010_v3 }
 0x3a0   : > { %v2941_v2 = vpop.f32.mrf.mxu1 }
 0x3a1   : > { %3087 = vmatmul.bf16.gmra.mxu0 %v8515_v22  ;;  %v2942_v15 = vadd.f32 %v2941_v2, %v9976_v12  ;;  %v3295_v22 = vmax.f32 %v2893_v50, 0.0  ;;  %4413 = vmatpush.bf16.msra.mxu2 %v7013_v49  ;;  %v6738_v49 = vld [vmem:[#allocation2 + $0xd0] sm:$0xf0] }
 0x3a3   : > { %3136 = vmatmul.bf16.gmra.mxu1 %v10709_v24  ;;  %3185 = vmatmul.bf16.gmra.mxu2 %v10710_v61  ;;  %v7138_v61 = vld [vmem:[#allocation2 + $0x3f0] sm:$0xf0] }
 0x3a4   : > { %6636 = vmatmul.msk.bf16.gmra.mxu3 %vm1848_vm0, %v10703_v36 }
 0x3a6   : > { %v2990_v14 = vpop.f32.mrf.mxu2  ;;  %v2894_v60 = vpop.f32.mrf.mxu0 }
 0x3a7   : > { %v2991_v44 = vadd.f32 %v2990_v14, %v2942_v15  ;;  %v3039_v35 = vpop.f32.mrf.mxu3  ;;  %v2895_v55 = vadd.f32 %v2894_v60, %v9963_v39  ;;  %v7659_v15 = vld [vmem:[#allocation2 + $0x3e4] sm:$0xf] }
 0x3a8   : > { %v2943_v46 = vpop.f32.mrf.mxu1  ;;  %v7595_v14 = vld [vmem:[#allocation2 + $0x1e4] sm:$0xf]  ;;  %v7141_v60 = vor.u32 %v7659_v15, %v7138_v61 }
 0x3a9   : > { %v10082_v57 = vadd.f32 %v3039_v35, %v2991_v44  ;;  %v3299_v26 = vmax.f32 %v2895_v55, 0.0  ;;  %v2944_v25 = vadd.f32 %v2943_v46, %v9976_v12  ;;  %v6882_v44 = vld [vmem:[#allocation2 + $0x1f0] sm:$0xf0] }
 0x3aa   : > { %v6885_v55 = vor.u32 %v7595_v14, %v6882_v44  ;;  %4462 = vmatpush.bf16.msra.mxu3 %v7141_v60  ;;  %v10715_v44 = vld [vmem:[#allocation49_spill] sm:$0xff] }
 0x3ab   : > { %v10084_v23 = vpack.c.bf16 %v3299_v26, %v3295_v22 }
 0x3ac   : > { %4364 = vmatpush.bf16.msra.mxu1 %v6885_v55  ;;  %v10716_v55 = vld [vmem:[#allocation11_spill] sm:$0xff] }
 0x3ae   : > { %v2992_v36 = vpop.f32.mrf.mxu2  ;;  %v2897_v33 = vpop.f32.mrf.mxu0 }
 0x3af   : > { %v10087_v13 = vadd.f32 %v2992_v36, %v2944_v25  ;;  %v10089_v21 = vpop.f32.mrf.mxu3  ;;  %v2898_v39 = vadd.f32 %v2897_v33, %v9971_v59  ;;  %v7623_v25 = vld [vmem:[#allocation2 + $0x2c4] sm:$0xf]  ;;  %v6994_v36 = vld [vmem:[#allocation2 + $0x2d0] sm:$0xf0] }
 0x3b0   : > { %v2946_v28 = vpop.f32.mrf.mxu1 }
 0x3b1   : > { %3092 = vmatmul.bf16.gmra.mxu0 %v10685_v48  ;;  %v2947_v9 = vadd.f32 %v2946_v28, %v9976_v12  ;;  %v3303_v50 = vmax.f32 %v2898_v39, 0.0  ;;  %v6997_v39 = vor.u32 %v7623_v25, %v6994_v36 }
 0x3b3   : > { %3141 = vmatmul.bf16.gmra.mxu1 %v10711_v45  ;;  %3190 = vmatmul.bf16.gmra.mxu2 %v10712_v20 }
 0x3b4   : > { %6637 = vmatmul.msk.bf16.gmra.mxu3 %vm1848_vm0, %v10674_v63  ;;  %v6757_v63 = vor.u32 %v7563_v62, %v6754_v16  ;;  %4414 = vmatpush.bf16.msra.mxu2 %v6997_v39 }
 0x3b6   : > { %v2995_v58 = vpop.f32.mrf.mxu2  ;;  %v2899_v52 = vpop.f32.mrf.mxu0  ;;  %4315 = vmatpush.bf16.msra.mxu0 %v6757_v63 }
 0x3b7   : > { %v2996_v31 = vadd.f32 %v2995_v58, %v2947_v9  ;;  %v3044_v29 = vpop.f32.mrf.mxu3  ;;  %v2900_v59 = vadd.f32 %v2899_v52, %v9979_v41  ;;  %v7559_v58 = vld [vmem:[#allocation2 + $0xc4] sm:$0xf]  ;;  %v7122_v52 = vld [vmem:[#allocation2 + $0x3d0] sm:$0xf0] }
 0x3b8   : > { %v2948_v32 = vpop.f32.mrf.mxu1 }
 0x3b9   : > { %v10099_v48 = vadd.f32 %v3044_v29, %v2996_v31  ;;  %v3307_v2 = vmax.f32 %v2900_v59, 0.0  ;;  %v2949_v35 = vadd.f32 %v2948_v32, %v9976_v12  ;;  %v6741_v31 = vor.u32 %v7559_v58, %v6738_v49  ;;  %v7655_v29 = vld [vmem:[#allocation2 + $0x3c4] sm:$0xf] }
 0x3ba   : > { %v7591_v59 = vld [vmem:[#allocation2 + $0x1c4] sm:$0xf] }
 0x3bb   : > { %v10101_v24 = vpack.c.bf16 %v3307_v2, %v3303_v50  ;;  %v6866_v50 = vld [vmem:[#allocation2 + $0x1d0] sm:$0xf0]  ;;  %4316 = vmatpush.bf16.msra.mxu0 %v6741_v31  ;;  %v7651_v49 = vld [vmem:[#allocation2 + $0x3a4] sm:$0xf] }
 0x3bc   : > { %v6869_v62 = vor.u32 %v7591_v59, %v6866_v50  ;;  %v7106_v31 = vld [vmem:[#allocation2 + $0x3b0] sm:$0xf0] }
 0x3bd   : > { %v6850_v59 = vld [vmem:[#allocation2 + $0x1b0] sm:$0xf0] }
 0x3be   : > { %v2997_v41 = vpop.f32.mrf.mxu2  ;;  %v3058_v26 = vpop.f32.mrf.mxu0  ;;  %4365 = vmatpush.bf16.msra.mxu1 %v6869_v62 }
 0x3bf   : > { %v10104_v46 = vadd.f32 %v2997_v41, %v2949_v35  ;;  %v10106_v22 = vpop.f32.mrf.mxu3  ;;  %v3059_v12 = vadd.f32 %v3058_v26, %v9988_v18  ;;  %v7125_v18 = vor.u32 %v7655_v29, %v7122_v52  ;;  %v7109_v52 = vor.u32 %v7651_v49, %v7106_v31  ;;  %v7090_v49 = vld [vmem:[#allocation2 + $0x390] sm:$0xf0] }
 0x3c0   : > { %v3107_v7 = vpop.f32.mrf.mxu1 }
 0x3c1   : > { %4127 = vmatmul.bf16.vlgmr.msrb.gmra.mxu0 %v10713_v19  ;;  %v3108_v20 = vadd.f32 %v3107_v7, %v3059_v12  ;;  %4463 = vmatpush.bf16.msra.mxu3 %v7125_v18  ;;  %v7619_v7 = vld [vmem:[#allocation2 + $0x2a4] sm:$0xf]  ;;  %v6978_v12 = vld [vmem:[#allocation2 + $0x2b0] sm:$0xf0] }
 0x3c2   : > { %v6981_v36 = vor.u32 %v7619_v7, %v6978_v12  ;;  %v6962_v7 = vld [vmem:[#allocation2 + $0x290] sm:$0xf0] }
 0x3c3   : > { %4176 = vmatmul.bf16.vlgmr.msrb.gmra.mxu1 %v10714_v51  ;;  %4225 = vmatmul.bf16.vlgmr.msrb.gmra.mxu2 %v9990_v56 }
 0x3c4   : > { %4415 = vmatpush.bf16.msra.mxu2 %v6981_v36 }
 0x3c5   : > { %4464 = vmatpush.bf16.msra.mxu3 %v7109_v52 }
 0x3c6   : > { %v3156_v33 = vpop.f32.mrf.mxu2  ;;  %v3060_v9 = vpop.f32.mrf.mxu0 }
 0x3c7   : > { %v3205_v28 = vpop.f32.mrf.mxu3  ;;  %v3061_v53 = vadd.f32 %v3060_v9, %v9994_v6  ;;  %v3157_v3 = vadd.f32 %v3156_v33, %v3108_v20 }
 0x3c8   : > { %v3109_v45 = vpop.f32.mrf.mxu1 }
 0x3c9   : > { %v3110_v32 = vadd.f32 %v3109_v45, %v3061_v53  ;;  %v3206_v16 = vadd.f32 %v3205_v28, %v3157_v3  ;;  %v7555_v53 = vld [vmem:[#allocation2 + $0xa4] sm:$0xf]  ;;  %v6722_v3 = vld [vmem:[#allocation2 + $0xb0] sm:$0xf0] }
 0x3ca   : > { %v6725_v58 = vor.u32 %v7555_v53, %v6722_v3  ;;  %v6706_v53 = vld [vmem:[#allocation2 + $0x90] sm:$0xf0] }
 0x3cb   : > { %v3248_v35 = vmax.f32 %v3206_v16, 0.0 }
 0x3cc   : > { %4317 = vmatpush.bf16.msra.mxu0 %v6725_v58  ;;  %v7647_v58 = vld [vmem:[#allocation2 + $0x384] sm:$0xf] }
 0x3ce   : > { %v3158_v2 = vpop.f32.mrf.mxu2  ;;  %v3063_v61 = vpop.f32.mrf.mxu0 }
 0x3cf   : > { %v3159_v15 = vadd.f32 %v3158_v2, %v3110_v32  ;;  %v3207_v63 = vpop.f32.mrf.mxu3  ;;  %v3064_v26 = vadd.f32 %v3063_v61, %v10003_v37  ;;  %v7587_v37 = vld [vmem:[#allocation2 + $0x1a4] sm:$0xf] }
 0x3d0   : > { %v3112_v14 = vpop.f32.mrf.mxu1  ;;  %v6853_v18 = vor.u32 %v7587_v37, %v6850_v59  ;;  %v7093_v37 = vor.u32 %v7647_v58, %v7090_v49  ;;  %v7643_v58 = vld [vmem:[#allocation2 + $0x364] sm:$0xf]  ;;  %v7074_v49 = vld [vmem:[#allocation2 + $0x370] sm:$0xf0] }
 0x3d1   : > { %v3208_v6 = vadd.f32 %v3207_v63, %v3159_v15  ;;  %4132 = vmatmul.bf16.gmra.mxu0 %v10715_v44  ;;  %v3113_v9 = vadd.f32 %v3112_v14, %v3064_v26  ;;  %v10717_v63 = vld [vmem:[#allocation50_spill] sm:$0xff]  ;;  %v7615_v26 = vld [vmem:[#allocation2 + $0x284] sm:$0xf] }
 0x3d2   : > { %4366 = vmatpush.bf16.msra.mxu1 %v6853_v18  ;;  %4465 = vmatpush.bf16.msra.mxu3 %v7093_v37  ;;  %v6818_v37 = vld [vmem:[#allocation2 + $0x170] sm:$0xf0] }
 0x3d3   : > { %v3252_v60 = vmax.f32 %v3208_v6, 0.0  ;;  %4181 = vmatmul.bf16.gmra.mxu1 %v10716_v55  ;;  %4230 = vmatmul.bf16.gmra.mxu2 %v10005_v40  ;;  %v10718_v6 = vld [vmem:[#allocation32_spill] sm:$0xff] }
 0x3d5   : > { %v10116_v41 = vpack.c.bf16 %v3252_v60, %v3248_v35 }
 0x3d6   : > { %v3161_v25 = vpop.f32.mrf.mxu2  ;;  %v3065_v39 = vpop.f32.mrf.mxu0 }
 0x3d7   : > { %v3210_v33 = vpop.f32.mrf.mxu3  ;;  %4274 = vmatmul.bf16.vlgmr.msrb.gmra.mxu3 %v10116_v41  ;;  %v3066_v45 = vadd.f32 %v3065_v39, %v10009_v30  ;;  %v3162_v20 = vadd.f32 %v3161_v25, %v3113_v9  ;;  %v6965_v25 = vor.u32 %v7615_v26, %v6962_v7  ;;  %v7611_v26 = vld [vmem:[#allocation2 + $0x264] sm:$0xf]  ;;  %v6946_v7 = vld [vmem:[#allocation2 + $0x270] sm:$0xf0] }
 0x3d8   : > { %v3114_v28 = vpop.f32.mrf.mxu1 }
 0x3d9   : > { %v3115_v29 = vadd.f32 %v3114_v28, %v3066_v45  ;;  %v3211_v50 = vadd.f32 %v3210_v33, %v3162_v20  ;;  %4416 = vmatpush.bf16.msra.mxu2 %v6965_v25  ;;  %v7551_v20 = vld [vmem:[#allocation2 + $0x84] sm:$0xf]  ;;  %v6949_v25 = vor.u32 %v7611_v26, %v6946_v7 }
 0x3da   : > { %v6709_v3 = vor.u32 %v7551_v20, %v6706_v53  ;;  %v7547_v20 = vld [vmem:[#allocation2 + $0x64] sm:$0xf]  ;;  %v6690_v53 = vld [vmem:[#allocation2 + $0x70] sm:$0xf0] }
 0x3db   : > { %v3256_v61 = vmax.f32 %v3211_v50, 0.0  ;;  %v7607_v7 = vld [vmem:[#allocation2 + $0x244] sm:$0xf] }
 0x3dc   : > { %4318 = vmatpush.bf16.msra.mxu0 %v6709_v3  ;;  %v6693_v3 = vor.u32 %v7547_v20, %v6690_v53 }
 0x3dd   : > { %4417 = vmatpush.bf16.msra.mxu2 %v6949_v25 }
 0x3de   : > { %v3163_v32 = vpop.f32.mrf.mxu2  ;;  %v3068_v16 = vpop.f32.mrf.mxu0 }
 0x3df   : > { %v3164_v2 = vadd.f32 %v3163_v32, %v3115_v29  ;;  %v3212_v62 = vpop.f32.mrf.mxu3  ;;  %v3069_v60 = vadd.f32 %v3068_v16, %v10018_v47  ;;  %v7583_v47 = vld [vmem:[#allocation2 + $0x184] sm:$0xf]  ;;  %v6834_v29 = vld [vmem:[#allocation2 + $0x190] sm:$0xf0] }
 0x3e0   : > { %v3117_v15 = vpop.f32.mrf.mxu1  ;;  %v6837_v59 = vor.u32 %v7583_v47, %v6834_v29  ;;  %v10719_v16 = vld [vmem:[#allocation51_spill] sm:$0xff]  ;;  %4319 = vmatpush.bf16.msra.mxu0 %v6693_v3 }
 0x3e1   : > { %v3213_v30 = vadd.f32 %v3212_v62, %v3164_v2  ;;  %4137 = vmatmul.bf16.gmra.mxu0 %v10717_v63  ;;  %v3118_v28 = vadd.f32 %v3117_v15, %v3069_v60  ;;  %v7543_v3 = vld [vmem:[#allocation2 + $0x44] sm:$0xf] }
 0x3e2   : > { %4367 = vmatpush.bf16.msra.mxu1 %v6837_v59 }
 0x3e3   : > { %v3260_v14 = vmax.f32 %v3213_v30, 0.0  ;;  %4186 = vmatmul.bf16.gmra.mxu1 %v10718_v6  ;;  %4235 = vmatmul.bf16.gmra.mxu2 %v10020_v34 }
 0x3e5   : > { %v10124_v35 = vpack.c.bf16 %v3260_v14, %v3256_v61  ;;  %v10720_v61 = vld [vmem:[#allocation34_spill] sm:$0xff] }
 0x3e6   : > { %v3166_v12 = vpop.f32.mrf.mxu2  ;;  %v3070_v33 = vpop.f32.mrf.mxu0 }
 0x3e7   : > { %v3215_v36 = vpop.f32.mrf.mxu3  ;;  %4279 = vmatmul.bf16.gmra.mxu3 %v10124_v35  ;;  %v3071_v9 = vadd.f32 %v3070_v33, %v10024_v27  ;;  %v3167_v45 = vadd.f32 %v3166_v12, %v3118_v28 }
 0x3e8   : > { %v3119_v39 = vpop.f32.mrf.mxu1 }
 0x3e9   : > { %v3120_v31 = vadd.f32 %v3119_v39, %v3071_v9  ;;  %v3216_v32 = vadd.f32 %v3215_v36, %v3167_v45 }
 0x3eb   : > { %v3264_v15 = vmax.f32 %v3216_v32, 0.0 }
 0x3ee   : > { %v3168_v52 = vpop.f32.mrf.mxu2  ;;  %v3073_v2 = vpop.f32.mrf.mxu0 }
 0x3ef   : > { %v3169_v18 = vadd.f32 %v3168_v52, %v3120_v31  ;;  %v3217_v50 = vpop.f32.mrf.mxu3  ;;  %v3074_v60 = vadd.f32 %v3073_v2, %v10033_v42  ;;  %v7579_v42 = vld [vmem:[#allocation2 + $0x164] sm:$0xf]  ;;  %v7077_v31 = vor.u32 %v7643_v58, %v7074_v49  ;;  %v6674_v58 = vld [vmem:[#allocation2 + $0x50] sm:$0xf0] }
 0x3f0   : > { %v3122_v62 = vpop.f32.mrf.mxu1  ;;  %v6821_v52 = vor.u32 %v7579_v42, %v6818_v37  ;;  %v6677_v49 = vor.u32 %v7543_v3, %v6674_v58  ;;  %v7058_v42 = vld [vmem:[#allocation2 + $0x350] sm:$0xf0]  ;;  %v7539_v58 = vld [vmem:[#allocation2 + $0x24] sm:$0xf] }
 0x3f1   : > { %v3218_v27 = vadd.f32 %v3217_v50, %v3169_v18  ;;  %4142 = vmatmul.bf16.gmra.mxu0 %v10719_v16  ;;  %v3123_v28 = vadd.f32 %v3122_v62, %v3074_v60  ;;  %4466 = vmatpush.bf16.msra.mxu3 %v7077_v31  ;;  %v10721_v62 = vld [vmem:[#allocation52_spill] sm:$0xff] }
 0x3f2   : > { %4368 = vmatpush.bf16.msra.mxu1 %v6821_v52  ;;  %4320 = vmatpush.bf16.msra.mxu0 %v6677_v49  ;;  %v6658_v49 = vld [vmem:[#allocation2 + $0x30] sm:$0xf0] }
 0x3f3   : > { %v3268_v30 = vmax.f32 %v3218_v27, 0.0  ;;  %4191 = vmatmul.bf16.gmra.mxu1 %v10720_v61  ;;  %4240 = vmatmul.bf16.gmra.mxu2 %v10035_v5 }
 0x3f5   : > { %v10132_v14 = vpack.c.bf16 %v3268_v30, %v3264_v15  ;;  %v10722_v30 = vld [vmem:[#allocation36_spill] sm:$0xff] }
 0x3f6   : > { %v3171_v12 = vpop.f32.mrf.mxu2  ;;  %v3075_v33 = vpop.f32.mrf.mxu0 }
 0x3f7   : > { %v3220_v36 = vpop.f32.mrf.mxu3  ;;  %4284 = vmatmul.bf16.gmra.mxu3 %v10132_v14  ;;  %v3076_v9 = vadd.f32 %v3075_v33, %v10039_v43  ;;  %v3172_v45 = vadd.f32 %v3171_v12, %v3123_v28  ;;  %v6930_v12 = vld [vmem:[#allocation2 + $0x250] sm:$0xf0]  ;;  %v3032_v33 = vadd.f32 %v10055_v54, %v10053_v0 }
 0x3f8   : > { %v3124_v39 = vpop.f32.mrf.mxu1 }
 0x3f9   : > { %v3125_v47 = vadd.f32 %v3124_v39, %v3076_v9  ;;  %v3221_v59 = vadd.f32 %v3220_v36, %v3172_v45  ;;  %v6933_v36 = vor.u32 %v7607_v7, %v6930_v12 }
 0x3fb   : > { %v3272_v27 = vmax.f32 %v3221_v59, 0.0  ;;  %4418 = vmatpush.bf16.msra.mxu2 %v6933_v36  ;;  %v6914_v36 = vld [vmem:[#allocation2 + $0x230] sm:$0xf0] }
 0x3fe   : > { %v3173_v29 = vpop.f32.mrf.mxu2  ;;  %v3078_v50 = vpop.f32.mrf.mxu0 }
 0x3ff   : > { %v3174_v32 = vadd.f32 %v3173_v29, %v3125_v47  ;;  %v3222_v18 = vpop.f32.mrf.mxu3  ;;  %v3079_v26 = vadd.f32 %v3078_v50, %v10048_v4  ;;  %v7639_v4 = vld [vmem:[#allocation2 + $0x344] sm:$0xf]  ;;  %v6802_v29 = vld [vmem:[#allocation2 + $0x150] sm:$0xf0] }
 0x400   : > { %v3127_v2 = vpop.f32.mrf.mxu1  ;;  %v7575_v47 = vld [vmem:[#allocation2 + $0x144] sm:$0xf]  ;;  %v7061_v37 = vor.u32 %v7639_v4, %v7058_v42 }
 0x401   : > { %v3223_v43 = vadd.f32 %v3222_v18, %v3174_v32  ;;  %4147 = vmatmul.bf16.gmra.mxu0 %v10721_v62  ;;  %v3128_v45 = vadd.f32 %v3127_v2, %v3079_v26  ;;  %v6805_v0 = vor.u32 %v7575_v47, %v6802_v29  ;;  %v10724_v26 = vld [vmem:[#allocation38_spill] sm:$0xff]  ;;  %v7571_v4 = vld [vmem:[#allocation2 + $0x124] sm:$0xf]  ;;  %v6786_v29 = vld [vmem:[#allocation2 + $0x130] sm:$0xf0] }
 0x402   : > { %4467 = vmatpush.bf16.msra.mxu3 %v7061_v37  ;;  %v7635_v47 = vld [vmem:[#allocation2 + $0x324] sm:$0xf] }
 0x403   : > { %v3276_v15 = vmax.f32 %v3223_v43, 0.0  ;;  %4196 = vmatmul.bf16.gmra.mxu1 %v10722_v30  ;;  %4245 = vmatmul.bf16.gmra.mxu2 %v10050_v11  ;;  %v10723_v43 = vld [vmem:[#allocation53_spill] sm:$0xff] }
 0x404   : > { %4369 = vmatpush.bf16.msra.mxu1 %v6805_v0  ;;  %v7535_v0 = vld [vmem:[#allocation2 + $0x4] sm:$0xf] }
 0x405   : > { %v10140_v60 = vpack.c.bf16 %v3276_v15, %v3272_v27 }
 0x406   : > { %v3176_v25 = vpop.f32.mrf.mxu2  ;;  %v3080_v28 = vpop.f32.mrf.mxu0 }
 0x407   : > { %v3225_v39 = vpop.f32.mrf.mxu3  ;;  %4289 = vmatmul.bf16.gmra.mxu3 %v10140_v60  ;;  %v3081_v20 = vadd.f32 %v3080_v28, %v3032_v33  ;;  %v3177_v53 = vadd.f32 %v3176_v25, %v3128_v45  ;;  %v7603_v25 = vld [vmem:[#allocation2 + $0x224] sm:$0xf]  ;;  %v3037_v28 = vadd.f32 %v10072_v8, %v10070_v38  ;;  %v6789_v38 = vor.u32 %v7571_v4, %v6786_v29 }
 0x408   : > { %v3129_v9 = vpop.f32.mrf.mxu1  ;;  %v3042_v4 = vadd.f32 %v10089_v21, %v10087_v13  ;;  %v10727_v21 = vld [vmem:[#allocation55_spill] sm:$0xff] }
 0x409   : > { %v3130_v31 = vadd.f32 %v3129_v9, %v3081_v20  ;;  %v3226_v54 = vadd.f32 %v3225_v39, %v3177_v53  ;;  %v6917_v39 = vor.u32 %v7603_v25, %v6914_v36  ;;  %4370 = vmatpush.bf16.msra.mxu1 %v6789_v38 }
 0x40b   : > { %v3280_v27 = vmax.f32 %v3226_v54, 0.0  ;;  %4419 = vmatpush.bf16.msra.mxu2 %v6917_v39  ;;  %v6642_v54 = vld [vmem:[#allocation2 + $0x10] sm:$0xf0] }
 0x40e   : > { %v3178_v52 = vpop.f32.mrf.mxu2  ;;  %v3083_v18 = vpop.f32.mrf.mxu0 }
 0x40f   : > { %v3179_v59 = vadd.f32 %v3178_v52, %v3130_v31  ;;  %v3227_v32 = vpop.f32.mrf.mxu3  ;;  %v3084_v12 = vadd.f32 %v3083_v18, %v10065_v17  ;;  %v6661_v17 = vor.u32 %v7539_v58, %v6658_v49  ;;  %v7042_v31 = vld [vmem:[#allocation2 + $0x330] sm:$0xf0] }
 0x410   : > { %v3132_v50 = vpop.f32.mrf.mxu1  ;;  %v7045_v37 = vor.u32 %v7635_v47, %v7042_v31  ;;  %v7631_v47 = vld [vmem:[#allocation2 + $0x304] sm:$0xf]  ;;  %v7026_v31 = vld [vmem:[#allocation2 + $0x310] sm:$0xf0] }
 0x411   : > { %v3228_v2 = vadd.f32 %v3227_v32, %v3179_v59  ;;  %4152 = vmatmul.bf16.gmra.mxu0 %v10723_v43  ;;  %v3133_v53 = vadd.f32 %v3132_v50, %v3084_v12  ;;  %v7567_v59 = vld [vmem:[#allocation2 + $0x104] sm:$0xf]  ;;  %v7029_v29 = vor.u32 %v7631_v47, %v7026_v31  ;;  %v7662_v47 = vld [vmem:[#allocation2 + $0x3f4] sm:$0xf0] }
 0x412   : > { %4321 = vmatpush.bf16.msra.mxu0 %v6661_v17  ;;  %4468 = vmatpush.bf16.msra.mxu3 %v7045_v37  ;;  %v7599_v12 = vld [vmem:[#allocation2 + $0x204] sm:$0xf] }
 0x413   : > { %v3284_v15 = vmax.f32 %v3228_v2, 0.0  ;;  %4201 = vmatmul.bf16.gmra.mxu1 %v10724_v26  ;;  %4250 = vmatmul.bf16.gmra.mxu2 %v10067_v10 }
 0x415   : > { %v10149_v7 = vpack.c.bf16 %v3284_v15, %v3280_v27  ;;  %v6645_v27 = vor.u32 %v7535_v0, %v6642_v54  ;;  %v6770_v15 = vld [vmem:[#allocation2 + $0x110] sm:$0xf0] }
 0x416   : > { %v3181_v33 = vpop.f32.mrf.mxu2  ;;  %v3085_v45 = vpop.f32.mrf.mxu0  ;;  %v6773_v36 = vor.u32 %v7567_v59, %v6770_v15  ;;  %4469 = vmatpush.bf16.msra.mxu3 %v7029_v29  ;;  %v7016_v15 = vld [vmem:[#allocation2 + $0x2e8] sm:$0xf] }
 0x417   : > { %v3230_v9 = vpop.f32.mrf.mxu3  ;;  %4294 = vmatmul.bf16.gmra.mxu3 %v10149_v7  ;;  %v3086_v3 = vadd.f32 %v3085_v45, %v3037_v28  ;;  %v3182_v42 = vadd.f32 %v3181_v33, %v3133_v53  ;;  %v6898_v33 = vld [vmem:[#allocation2 + $0x210] sm:$0xf0]  ;;  %4322 = vmatpush.bf16.msra.mxu0 %v6645_v27  ;;  %v10725_v45 = vld [vmem:[#allocation54_spill] sm:$0xff] }
 0x418   : > { %v3134_v20 = vpop.f32.mrf.mxu1  ;;  %v6901_v28 = vor.u32 %v7599_v12, %v6898_v33  ;;  %4371 = vmatpush.bf16.msra.mxu1 %v6773_v36  ;;  %v7630_v12 = vld [vmem:[#allocation2 + $0x2f4] sm:$0xf0] }
 0x419   : > { %v3135_v52 = vadd.f32 %v3134_v20, %v3086_v3  ;;  %v3231_v32 = vadd.f32 %v3230_v9, %v3182_v42  ;;  %v10726_v3 = vld [vmem:[#allocation40_spill] sm:$0xff] }
 0x41a   : > { %4420 = vmatpush.bf16.msra.mxu2 %v6901_v28  ;;  %v3047_v28 = vadd.f32 %v10106_v22, %v10104_v46  ;;  %v6888_v46 = vld [vmem:[#allocation2 + $0x1e8] sm:$0xf]  ;;  %v7598_v22 = vld [vmem:[#allocation2 + $0x1f4] sm:$0xf0] }
 0x41b   : > { %v3288_v20 = vmax.f32 %v3231_v32, 0.0 }
 0x41e   : > { %v3183_v8 = vpop.f32.mrf.mxu2  ;;  %v3088_v2 = vpop.f32.mrf.mxu0 }
 0x41f   : > { %v3184_v18 = vadd.f32 %v3183_v8, %v3135_v52  ;;  %v3232_v50 = vpop.f32.mrf.mxu3  ;;  %v3089_v58 = vadd.f32 %v3088_v2, %v10082_v57 }
 0x420   : > { %v3137_v25 = vpop.f32.mrf.mxu1 }
 0x421   : > { %v3233_v39 = vadd.f32 %v3232_v50, %v3184_v18  ;;  %4157 = vmatmul.bf16.gmra.mxu0 %v10725_v45  ;;  %v3138_v52 = vadd.f32 %v3137_v25, %v3089_v58  ;;  %v7017_v25 = vor.u32 %v7630_v12, %v7016_v15  ;;  %v6760_v58 = vld [vmem:[#allocation2 + $0xe8] sm:$0xf] }
 0x423   : > { %v3292_v53 = vmax.f32 %v3233_v39, 0.0  ;;  %4206 = vmatmul.bf16.gmra.mxu1 %v10726_v3  ;;  %4255 = vmatmul.bf16.gmra.mxu2 %v10084_v23 }
 0x424   : > { %4609 = vmatpush.bf16.msrb.mxu2 %v7017_v25 }
 0x425   : > { %v10158_v9 = vpack.c.bf16 %v3292_v53, %v3288_v20 }
 0x426   : > { %v3186_v49 = vpop.f32.mrf.mxu2  ;;  %v3090_v17 = vpop.f32.mrf.mxu0 }
 0x427   : > { %v3235_v42 = vpop.f32.mrf.mxu3  ;;  %4299 = vmatmul.bf16.gmra.mxu3 %v10158_v9  ;;  %v3091_v38 = vadd.f32 %v3090_v17, %v3042_v4  ;;  %v3187_v8 = vadd.f32 %v3186_v49, %v3138_v52  ;;  %v7566_v49 = vld [vmem:[#allocation2 + $0xf4] sm:$0xf0]  ;;  %v7144_v4 = vld [vmem:[#allocation2 + $0x3e8] sm:$0xf] }
 0x428   : > { %v3139_v37 = vpop.f32.mrf.mxu1  ;;  %v6761_v17 = vor.u32 %v7566_v49, %v6760_v58  ;;  %v7145_v29 = vor.u32 %v7662_v47, %v7144_v4  ;;  %v6744_v58 = vld [vmem:[#allocation2 + $0xc8] sm:$0xf] }
 0x429   : > { %v3140_v0 = vadd.f32 %v3139_v37, %v3091_v38  ;;  %v3236_v59 = vadd.f32 %v3235_v42, %v3187_v8  ;;  %v6889_v38 = vor.u32 %v7598_v22, %v6888_v46  ;;  %v7128_v47 = vld [vmem:[#allocation2 + $0x3c8] sm:$0xf] }
 0x42a   : > { %4511 = vmatpush.bf16.msrb.mxu0 %v6761_v17  ;;  %4658 = vmatpush.bf16.msrb.mxu3 %v7145_v29  ;;  %v7562_v17 = vld [vmem:[#allocation2 + $0xd4] sm:$0xf0]  ;;  %v6872_v22 = vld [vmem:[#allocation2 + $0x1c8] sm:$0xf] }
 0x42b   : > { %v3296_v2 = vmax.f32 %v3236_v59, 0.0  ;;  %4560 = vmatpush.bf16.msrb.mxu1 %v6889_v38 }
 0x42e   : > { %v3188_v54 = vpop.f32.mrf.mxu2  ;;  %v3093_v18 = vpop.f32.mrf.mxu0 }
 0x42f   : > { %v3189_v57 = vadd.f32 %v3188_v54, %v3140_v0  ;;  %v3237_v32 = vpop.f32.mrf.mxu3  ;;  %v3094_v33 = vadd.f32 %v3093_v18, %v10099_v48  ;;  %v10176_v48 = vld [vmem:[%s10510_s4] sm:$0xf] }
 0x430   : > { %v3142_v50 = vpop.f32.mrf.mxu1  ;;  %v10179_v8 = vperm.slane %v10176_v48, 0 }
 0x431   : > { %v3238_v13 = vadd.f32 %v3237_v32, %v3189_v57  ;;  %4162 = vmatmul.bf16.gmra.mxu0 %v10727_v21  ;;  %v3143_v31 = vadd.f32 %v3142_v50, %v3094_v33 }
 0x433   : > { %v3300_v27 = vmax.f32 %v3238_v13, 0.0  ;;  %4211 = vmatmul.bf16.gmra.mxu1 %v9774_v1  ;;  %4260 = vmatmul.bf16.gmra.mxu2 %v10101_v24 }
 0x435   : > { %v10167_v36 = vpack.c.bf16 %v3300_v27, %v3296_v2 }
 0x436   : > { %v3191_v39 = vpop.f32.mrf.mxu2  ;;  %v3095_v53 = vpop.f32.mrf.mxu0 }
 0x437   : > { %v3240_v20 = vpop.f32.mrf.mxu3  ;;  %4304 = vmatmul.bf16.gmra.mxu3 %v10167_v36  ;;  %v3096_v37 = vadd.f32 %v3095_v53, %v3047_v28  ;;  %v3192_v52 = vadd.f32 %v3191_v39, %v3143_v31  ;;  %v7626_v53 = vld [vmem:[#allocation2 + $0x2d4] sm:$0xf0] }
 0x438   : > { %v3144_v42 = vpop.f32.mrf.mxu1  ;;  %v7658_v31 = vld [vmem:[#allocation2 + $0x3d4] sm:$0xf0] }
 0x439   : > { %v3145_v0 = vadd.f32 %v3144_v42, %v3096_v37  ;;  %v3241_v59 = vadd.f32 %v3240_v20, %v3192_v52  ;;  %v7000_v20 = vld [vmem:[#allocation2 + $0x2c8] sm:$0xf]  ;;  %v6745_v37 = vor.u32 %v7562_v17, %v6744_v58  ;;  %v7129_v29 = vor.u32 %v7658_v31, %v7128_v47  ;;  %v7594_v52 = vld [vmem:[#allocation2 + $0x1d4] sm:$0xf0] }
 0x43a   : > { %v7001_v42 = vor.u32 %v7626_v53, %v7000_v20  ;;  %v6873_v38 = vor.u32 %v7594_v52, %v6872_v22  ;;  %v7112_v20 = vld [vmem:[#allocation2 + $0x3a8] sm:$0xf] }
 0x43b   : > { %v3304_v15 = vmax.f32 %v3241_v59, 0.0  ;;  %4512 = vmatpush.bf16.msrb.mxu0 %v6745_v37  ;;  %4659 = vmatpush.bf16.msrb.mxu3 %v7129_v29  ;;  %v6856_v31 = vld [vmem:[#allocation2 + $0x1a8] sm:$0xf]  ;;  %v7590_v37 = vld [vmem:[#allocation2 + $0x1b4] sm:$0xf0] }
 0x43c   : > { %4610 = vmatpush.bf16.msrb.mxu2 %v7001_v42  ;;  %4561 = vmatpush.bf16.msrb.mxu1 %v6873_v38 }
 0x43e   : > { %v3193_v54 = vpop.f32.mrf.mxu2  ;;  %v4128_v32 = vpop.f32.mrf.mxu0 }
 0x43f   : > { %v3194_v57 = vadd.f32 %v3193_v54, %v3145_v0  ;;  %v3242_v18 = vpop.f32.mrf.mxu3  ;;  %v4129_v50 = vadd.f32 %v4128_v32, %v10179_v8 }
 0x440   : > { %v4177_v13 = vpop.f32.mrf.mxu1 }
 0x441   : > { %v3243_v2 = vadd.f32 %v3242_v18, %v3194_v57  ;;  %v4178_v27 = vadd.f32 %v4177_v13, %v4129_v50  ;;  %4323 = vmatmul.bf16.vlgmr.msra.gmra.mxu0 %v10713_v19  ;;  %v6984_v50 = vld [vmem:[#allocation2 + $0x2a8] sm:$0xf]  ;;  %v7622_v13 = vld [vmem:[#allocation2 + $0x2b4] sm:$0xf0] }
 0x443   : > { %v3308_v12 = vmax.f32 %v3243_v2, 0.0  ;;  %4372 = vmatmul.bf16.vlgmr.msra.gmra.mxu1 %v10714_v51  ;;  %4421 = vmatmul.bf16.vlgmr.msra.gmra.mxu2 %v9990_v56 }
 0x445   : > { %v10185_v25 = vpack.c.bf16 %v3308_v12, %v3304_v15 }
 0x446   : > { %v4226_v33 = vpop.f32.mrf.mxu2  ;;  %v4130_v28 = vpop.f32.mrf.mxu0 }
 0x447   : > { %v4227_v39 = vadd.f32 %v4226_v33, %v4178_v27  ;;  %4309 = vmatmul.bf16.gmra.mxu3 %v10185_v25  ;;  %v4131_v49 = vadd.f32 %v4130_v28, %v10179_v8  ;;  %v6985_v27 = vor.u32 %v7622_v13, %v6984_v50  ;;  %v6728_v33 = vld [vmem:[#allocation2 + $0xa8] sm:$0xf]  ;;  %v7558_v28 = vld [vmem:[#allocation2 + $0xb4] sm:$0xf0] }
 0x448   : > { %v4179_v4 = vpop.f32.mrf.mxu1  ;;  %v6968_v13 = vld [vmem:[#allocation2 + $0x288] sm:$0xf] }
 0x449   : > { %v4180_v46 = vadd.f32 %v4179_v4, %v4131_v49  ;;  %4611 = vmatpush.bf16.msrb.mxu2 %v6985_v27  ;;  %v6729_v49 = vor.u32 %v7558_v28, %v6728_v33  ;;  %v7654_v4 = vld [vmem:[#allocation2 + $0x3b4] sm:$0xf0] }
 0x44a   : > { %v7113_v42 = vor.u32 %v7654_v4, %v7112_v20 }
 0x44b   : > { %4513 = vmatpush.bf16.msrb.mxu0 %v6729_v49  ;;  %v7096_v49 = vld [vmem:[#allocation2 + $0x388] sm:$0xf] }
 0x44c   : > { %4660 = vmatpush.bf16.msrb.mxu3 %v7113_v42 }
 0x44e   : > { %v4228_v0 = vpop.f32.mrf.mxu2  ;;  %v4133_v59 = vpop.f32.mrf.mxu0 }
 0x44f   : > { %v4229_v54 = vadd.f32 %v4228_v0, %v4180_v46  ;;  %v4134_v57 = vadd.f32 %v4133_v59, %v10179_v8  ;;  %v6857_v46 = vor.u32 %v7590_v37, %v6856_v31 }
 0x450   : > { %v4182_v32 = vpop.f32.mrf.mxu1 }
 0x451   : > { %v4183_v18 = vadd.f32 %v4182_v32, %v4134_v57  ;;  %4328 = vmatmul.bf16.gmra.mxu0 %v10715_v44  ;;  %4562 = vmatpush.bf16.msrb.mxu1 %v6857_v46  ;;  %v7586_v46 = vld [vmem:[#allocation2 + $0x194] sm:$0xf0] }
 0x453   : > { %4377 = vmatmul.bf16.gmra.mxu1 %v10716_v55  ;;  %4426 = vmatmul.bf16.gmra.mxu2 %v10005_v40 }
 0x456   : > { %v4231_v2 = vpop.f32.mrf.mxu2  ;;  %v4135_v12 = vpop.f32.mrf.mxu0 }
 0x457   : > { %v4232_v15 = vadd.f32 %v4231_v2, %v4183_v18  ;;  %4470 = vmatmul.bf16.vlgmr.msra.gmra.mxu3 %v10116_v41  ;;  %v4136_v53 = vadd.f32 %v4135_v12, %v10179_v8  ;;  %v7618_v2 = vld [vmem:[#allocation2 + $0x294] sm:$0xf0] }
 0x458   : > { %v4184_v58 = vpop.f32.mrf.mxu1  ;;  %v6969_v12 = vor.u32 %v7618_v2, %v6968_v13 }
 0x459   : > { %v4185_v17 = vadd.f32 %v4184_v58, %v4136_v53  ;;  %v6712_v53 = vld [vmem:[#allocation2 + $0x88] sm:$0xf]  ;;  %v7554_v58 = vld [vmem:[#allocation2 + $0x94] sm:$0xf0] }
 0x45a   : > { %v4275_v47 = vpop.f32.mrf.mxu3  ;;  %4612 = vmatpush.bf16.msrb.mxu2 %v6969_v12  ;;  %v6713_v42 = vor.u32 %v7554_v58, %v6712_v53  ;;  %v7614_v12 = vld [vmem:[#allocation2 + $0x274] sm:$0xf0] }
 0x45b   : > { %v4276_v29 = vadd.f32 %v4275_v47, %v4227_v39 }
 0x45c   : > { %4514 = vmatpush.bf16.msrb.mxu0 %v6713_v42  ;;  %v7080_v42 = vld [vmem:[#allocation2 + $0x368] sm:$0xf] }
 0x45d   : > { %v4903_v50 = vmax.f32 %v4276_v29, 0.0  ;;  %v6840_v29 = vld [vmem:[#allocation2 + $0x188] sm:$0xf] }
 0x45e   : > { %v4233_v22 = vpop.f32.mrf.mxu2  ;;  %v4138_v38 = vpop.f32.mrf.mxu0 }
 0x45f   : > { %v4234_v52 = vadd.f32 %v4233_v22, %v4185_v17  ;;  %v4139_v0 = vadd.f32 %v4138_v38, %v10179_v8  ;;  %v7650_v17 = vld [vmem:[#allocation2 + $0x394] sm:$0xf0]  ;;  %v6841_v38 = vor.u32 %v7586_v46, %v6840_v29 }
 0x460   : > { %v4187_v59 = vpop.f32.mrf.mxu1  ;;  %v7097_v47 = vor.u32 %v7650_v17, %v7096_v49 }
 0x461   : > { %v4188_v57 = vadd.f32 %v4187_v59, %v4139_v0  ;;  %4333 = vmatmul.bf16.gmra.mxu0 %v10717_v63  ;;  %4563 = vmatpush.bf16.msrb.mxu1 %v6841_v38  ;;  %v6824_v38 = vld [vmem:[#allocation2 + $0x168] sm:$0xf] }
 0x462   : > { %v4277_v32 = vpop.f32.mrf.mxu3  ;;  %4661 = vmatpush.bf16.msrb.mxu3 %v7097_v47 }
 0x463   : > { %v4278_v18 = vadd.f32 %v4277_v32, %v4229_v54  ;;  %4382 = vmatmul.bf16.gmra.mxu1 %v10718_v6  ;;  %4431 = vmatmul.bf16.gmra.mxu2 %v10020_v34 }
 0x465   : > { %v4907_v39 = vmax.f32 %v4278_v18, 0.0 }
 0x466   : > { %v4236_v27 = vpop.f32.mrf.mxu2  ;;  %v4140_v20 = vpop.f32.mrf.mxu0 }
 0x467   : > { %v10199_v33 = vpack.c.bf16 %v4907_v39, %v4903_v50  ;;  %v4237_v28 = vadd.f32 %v4236_v27, %v4188_v57  ;;  %4475 = vmatmul.bf16.gmra.mxu3 %v10124_v35  ;;  %v4141_v54 = vadd.f32 %v4140_v20, %v10179_v8  ;;  %v6952_v27 = vld [vmem:[#allocation2 + $0x268] sm:$0xf] }
 0x468   : > { %v4189_v4 = vpop.f32.mrf.mxu1  ;;  %v6953_v53 = vor.u32 %v7614_v12, %v6952_v27 }
 0x469   : > { %v4190_v31 = vadd.f32 %v4189_v4, %v4141_v54  ;;  %v6696_v54 = vld [vmem:[#allocation2 + $0x68] sm:$0xf]  ;;  %v7550_v4 = vld [vmem:[#allocation2 + $0x74] sm:$0xf0] }
 0x46a   : > { %v4280_v37 = vpop.f32.mrf.mxu3  ;;  %4613 = vmatpush.bf16.msrb.mxu2 %v6953_v53  ;;  %v6936_v53 = vld [vmem:[#allocation2 + $0x248] sm:$0xf] }
 0x46b   : > { %v4281_v22 = vadd.f32 %v4280_v37, %v4232_v15  ;;  %v7646_v37 = vld [vmem:[#allocation2 + $0x374] sm:$0xf0] }
 0x46c   : > { %v7081_v29 = vor.u32 %v7646_v37, %v7080_v42  ;;  %v7064_v37 = vld [vmem:[#allocation2 + $0x348] sm:$0xf] }
 0x46d   : > { %v4911_v2 = vmax.f32 %v4281_v22, 0.0 }
 0x46e   : > { %v4238_v0 = vpop.f32.mrf.mxu2  ;;  %v4143_v57 = vpop.f32.mrf.mxu0  ;;  %4662 = vmatpush.bf16.msrb.mxu3 %v7081_v29 }
 0x46f   : > { %v4239_v59 = vadd.f32 %v4238_v0, %v4190_v31  ;;  %v4144_v32 = vadd.f32 %v4143_v57, %v10179_v8  ;;  %v6697_v31 = vor.u32 %v7550_v4, %v6696_v54  ;;  %v7582_v0 = vld [vmem:[#allocation2 + $0x174] sm:$0xf0] }
 0x470   : > { %v4192_v18 = vpop.f32.mrf.mxu1 }
 0x471   : > { %v4193_v50 = vadd.f32 %v4192_v18, %v4144_v32  ;;  %4338 = vmatmul.bf16.gmra.mxu0 %v10719_v16  ;;  %v6825_v32 = vor.u32 %v7582_v0, %v6824_v38  ;;  %v7642_v38 = vld [vmem:[#allocation2 + $0x354] sm:$0xf0] }
 0x472   : > { %v4282_v39 = vpop.f32.mrf.mxu3  ;;  %4515 = vmatpush.bf16.msrb.mxu0 %v6697_v31  ;;  %v7546_v31 = vld [vmem:[#allocation2 + $0x54] sm:$0xf0]  ;;  %v7065_v0 = vor.u32 %v7642_v38, %v7064_v37 }
 0x473   : > { %v4283_v13 = vadd.f32 %v4282_v39, %v4234_v52  ;;  %4387 = vmatmul.bf16.gmra.mxu1 %v10720_v61  ;;  %4436 = vmatmul.bf16.gmra.mxu2 %v10035_v5  ;;  %v7542_v38 = vld [vmem:[#allocation2 + $0x34] sm:$0xf0] }
 0x474   : > { %4564 = vmatpush.bf16.msrb.mxu1 %v6825_v32  ;;  %4663 = vmatpush.bf16.msrb.mxu3 %v7065_v0  ;;  %v7048_v0 = vld [vmem:[#allocation2 + $0x328] sm:$0xf] }
 0x475   : > { %v4915_v15 = vmax.f32 %v4283_v13, 0.0 }
 0x476   : > { %v4241_v20 = vpop.f32.mrf.mxu2  ;;  %v4145_v49 = vpop.f32.mrf.mxu0 }
 0x477   : > { %v4242_v58 = vadd.f32 %v4241_v20, %v4193_v50  ;;  %4480 = vmatmul.bf16.gmra.mxu3 %v10132_v14  ;;  %v10208_v17 = vpack.c.bf16 %v4915_v15, %v4911_v2  ;;  %v4146_v52 = vadd.f32 %v4145_v49, %v10179_v8  ;;  %v7610_v49 = vld [vmem:[#allocation2 + $0x254] sm:$0xf0] }
 0x478   : > { %v4194_v47 = vpop.f32.mrf.mxu1  ;;  %v6937_v4 = vor.u32 %v7610_v49, %v6936_v53 }
 0x479   : > { %v4195_v46 = vadd.f32 %v4194_v47, %v4146_v52  ;;  %v6680_v47 = vld [vmem:[#allocation2 + $0x48] sm:$0xf] }
 0x47a   : > { %v4285_v22 = vpop.f32.mrf.mxu3  ;;  %4614 = vmatpush.bf16.msrb.mxu2 %v6937_v4 }
 0x47b   : > { %v4286_v57 = vadd.f32 %v4285_v22, %v4237_v28  ;;  %v6681_v22 = vor.u32 %v7546_v31, %v6680_v47  ;;  %v7606_v47 = vld [vmem:[#allocation2 + $0x234] sm:$0xf0] }
 0x47d   : > { %v4919_v20 = vmax.f32 %v4286_v57, 0.0  ;;  %4516 = vmatpush.bf16.msrb.mxu0 %v6681_v22  ;;  %v6664_v22 = vld [vmem:[#allocation2 + $0x28] sm:$0xf] }
 0x47e   : > { %v4243_v18 = vpop.f32.mrf.mxu2  ;;  %v4148_v39 = vpop.f32.mrf.mxu0 }
 0x47f   : > { %v4244_v50 = vadd.f32 %v4243_v18, %v4195_v46  ;;  %v4149_v13 = vadd.f32 %v4148_v39, %v10179_v8  ;;  %v6808_v18 = vld [vmem:[#allocation2 + $0x148] sm:$0xf]  ;;  %v7578_v39 = vld [vmem:[#allocation2 + $0x154] sm:$0xf0] }
 0x480   : > { %v4197_v2 = vpop.f32.mrf.mxu1 }
 0x481   : > { %v4198_v15 = vadd.f32 %v4197_v2, %v4149_v13  ;;  %4343 = vmatmul.bf16.gmra.mxu0 %v10721_v62  ;;  %v6809_v2 = vor.u32 %v7578_v39, %v6808_v18  ;;  %v6665_v18 = vor.u32 %v7542_v38, %v6664_v22  ;;  %v7638_v39 = vld [vmem:[#allocation2 + $0x334] sm:$0xf0] }
 0x482   : > { %v4287_v27 = vpop.f32.mrf.mxu3 }
 0x483   : > { %v4288_v12 = vadd.f32 %v4287_v27, %v4239_v59  ;;  %4392 = vmatmul.bf16.gmra.mxu1 %v10722_v30  ;;  %4441 = vmatmul.bf16.gmra.mxu2 %v10050_v11 }
 0x484   : > { %4565 = vmatpush.bf16.msrb.mxu1 %v6809_v2  ;;  %4517 = vmatpush.bf16.msrb.mxu0 %v6665_v18 }
 0x485   : > { %v4923_v28 = vmax.f32 %v4288_v12, 0.0 }
 0x486   : > { %v4246_v54 = vpop.f32.mrf.mxu2  ;;  %v4150_v52 = vpop.f32.mrf.mxu0 }
 0x487   : > { %v4247_v42 = vadd.f32 %v4246_v54, %v4198_v15  ;;  %4485 = vmatmul.bf16.gmra.mxu3 %v10140_v60  ;;  %v10216_v29 = vpack.c.bf16 %v4923_v28, %v4919_v20  ;;  %v4151_v59 = vadd.f32 %v4150_v52, %v10179_v8  ;;  %v6920_v52 = vld [vmem:[#allocation2 + $0x228] sm:$0xf] }
 0x488   : > { %v4199_v46 = vpop.f32.mrf.mxu1  ;;  %v6921_v37 = vor.u32 %v7606_v47, %v6920_v52 }
 0x489   : > { %v4200_v57 = vadd.f32 %v4199_v46, %v4151_v59 }
 0x48a   : > { %v4290_v32 = vpop.f32.mrf.mxu3  ;;  %4615 = vmatpush.bf16.msrb.mxu2 %v6921_v37  ;;  %v7570_v37 = vld [vmem:[#allocation2 + $0x114] sm:$0xf0] }
 0x48b   : > { %v4291_v13 = vadd.f32 %v4290_v32, %v4242_v58 }
 0x48d   : > { %v4927_v4 = vmax.f32 %v4291_v13, 0.0  ;;  %v7049_v13 = vor.u32 %v7638_v39, %v7048_v0 }
 0x48e   : > { %v4248_v15 = vpop.f32.mrf.mxu2  ;;  %v4153_v12 = vpop.f32.mrf.mxu0 }
 0x48f   : > { %v4249_v27 = vadd.f32 %v4248_v15, %v4200_v57  ;;  %v4154_v20 = vadd.f32 %v4153_v12, %v10179_v8  ;;  %v6792_v12 = vld [vmem:[#allocation2 + $0x128] sm:$0xf]  ;;  %4664 = vmatpush.bf16.msrb.mxu3 %v7049_v13 }
 0x490   : > { %v4202_v28 = vpop.f32.mrf.mxu1 }
 0x491   : > { %v4203_v53 = vadd.f32 %v4202_v28, %v4154_v20  ;;  %4348 = vmatmul.bf16.gmra.mxu0 %v10723_v43  ;;  %v7574_v20 = vld [vmem:[#allocation2 + $0x134] sm:$0xf0] }
 0x492   : > { %v4292_v49 = vpop.f32.mrf.mxu3 }
 0x493   : > { %v4293_v54 = vadd.f32 %v4292_v49, %v4244_v50  ;;  %4397 = vmatmul.bf16.gmra.mxu1 %v10724_v26  ;;  %4446 = vmatmul.bf16.gmra.mxu2 %v10067_v10 }
 0x495   : > { %v4931_v58 = vmax.f32 %v4293_v54, 0.0  ;;  %v6648_v54 = vld [vmem:[#allocation2 + $0x8] sm:$0xf] }
 0x496   : > { %v4251_v31 = vpop.f32.mrf.mxu2  ;;  %v4155_v46 = vpop.f32.mrf.mxu0 }
 0x497   : > { %v4252_v59 = vadd.f32 %v4251_v31, %v4203_v53  ;;  %4490 = vmatmul.bf16.gmra.mxu3 %v10149_v7  ;;  %v10224_v57 = vpack.c.bf16 %v4931_v58, %v4927_v4  ;;  %v4156_v50 = vadd.f32 %v4155_v46, %v10179_v8  ;;  %v6793_v53 = vor.u32 %v7574_v20, %v6792_v12  ;;  %v7538_v4 = vld [vmem:[#allocation2 + $0x14] sm:$0xf0]  ;;  %v6776_v58 = vld [vmem:[#allocation2 + $0x108] sm:$0xf] }
 0x498   : > { %v4204_v32 = vpop.f32.mrf.mxu1  ;;  %v6649_v31 = vor.u32 %v7538_v4, %v6648_v54  ;;  %v6904_v46 = vld [vmem:[#allocation2 + $0x208] sm:$0xf]  ;;  %v6777_v0 = vor.u32 %v7570_v37, %v6776_v58 }
 0x499   : > { %10728 = vst [vmem:[#allocation47_spill] sm:$0xff] %v10224_v57  ;;  %v4205_v2 = vadd.f32 %v4204_v32, %v4156_v50  ;;  %4566 = vmatpush.bf16.msrb.mxu1 %v6793_v53  ;;  %v7602_v50 = vld [vmem:[#allocation2 + $0x214] sm:$0xf0]  ;;  %v7032_v53 = vld [vmem:[#allocation2 + $0x308] sm:$0xf] }
 0x49a   : > { %v4295_v15 = vpop.f32.mrf.mxu3  ;;  %4518 = vmatpush.bf16.msrb.mxu0 %v6649_v31  ;;  %v6905_v32 = vor.u32 %v7602_v50, %v6904_v46 }
 0x49b   : > { %v4296_v28 = vadd.f32 %v4295_v15, %v4247_v42 }
 0x49c   : > { %4616 = vmatpush.bf16.msrb.mxu2 %v6905_v32 }
 0x49d   : > { %4567 = vmatpush.bf16.msrb.mxu1 %v6777_v0  ;;  %v4935_v13 = vmax.f32 %v4296_v28, 0.0 }
 0x49e   : > { %v4253_v49 = vpop.f32.mrf.mxu2  ;;  %v4158_v47 = vpop.f32.mrf.mxu0 }
 0x49f   : > { %v4254_v52 = vadd.f32 %v4253_v49, %v4205_v2  ;;  %v4159_v22 = vadd.f32 %v4158_v47, %v10179_v8  ;;  %v7634_v49 = vld [vmem:[#allocation2 + $0x314] sm:$0xf0] }
 0x4a0   : > { %v4207_v38 = vpop.f32.mrf.mxu1 }
 0x4a1   : > { %v4208_v42 = vadd.f32 %v4207_v38, %v4159_v22  ;;  %4353 = vmatmul.bf16.gmra.mxu0 %v10725_v45 }
 0x4a2   : > { %v4297_v18 = vpop.f32.mrf.mxu3 }
 0x4a3   : > { %v4298_v39 = vadd.f32 %v4297_v18, %v4249_v27  ;;  %4402 = vmatmul.bf16.gmra.mxu1 %v10726_v3  ;;  %4451 = vmatmul.bf16.gmra.mxu2 %v10084_v23  ;;  %v7033_v27 = vor.u32 %v7634_v49, %v7032_v53  ;;  %v7564_v49 = vld [vmem:[#allocation2 + $0xec] sm:$0xf] }
 0x4a5   : > { %v4939_v2 = vmax.f32 %v4298_v39, 0.0  ;;  %4665 = vmatpush.bf16.msrb.mxu3 %v7033_v27 }
 0x4a6   : > { %v4256_v15 = vpop.f32.mrf.mxu2  ;;  %v4160_v20 = vpop.f32.mrf.mxu0 }
 0x4a7   : > { %v4257_v12 = vadd.f32 %v4256_v15, %v4208_v42  ;;  %4495 = vmatmul.bf16.gmra.mxu3 %v10158_v9  ;;  %v10232_v54 = vpack.c.bf16 %v4939_v2, %v4935_v13  ;;  %v4161_v4 = vadd.f32 %v4160_v20, %v10179_v8  ;;  %v7628_v13 = vld [vmem:[#allocation2 + $0x2ec] sm:$0xf]  ;;  %v7018_v2 = vld [vmem:[#allocation2 + $0x2f8] sm:$0xf0] }
 0x4a8   : > { %v4209_v58 = vpop.f32.mrf.mxu1  ;;  %v7021_v15 = vor.u32 %v7628_v13, %v7018_v2  ;;  %v10244_v13 = vperm.slane %v10176_v48, 1 }
 0x4a9   : > { %10729 = vst [vmem:[#allocation25_spill] sm:$0xff] %v10232_v54  ;;  %v4210_v47 = vadd.f32 %v4209_v58, %v4161_v4  ;;  %v6762_v4 = vld [vmem:[#allocation2 + $0xf8] sm:$0xf0]  ;;  %v7660_v58 = vld [vmem:[#allocation2 + $0x3ec] sm:$0xf] }
 0x4aa   : > { %v4300_v31 = vpop.f32.mrf.mxu3  ;;  %4805 = vmatpush.bf16.msra.mxu2 %v7021_v15 }
 0x4ab   : > { %v4301_v37 = vadd.f32 %v4300_v31, %v4252_v59  ;;  %v6765_v31 = vor.u32 %v7564_v49, %v6762_v4 }
 0x4ad   : > { %v4943_v18 = vmax.f32 %v4301_v37, 0.0  ;;  %v7146_v37 = vld [vmem:[#allocation2 + $0x3f8] sm:$0xf0]  ;;  %4707 = vmatpush.bf16.msra.mxu0 %v6765_v31 }
 0x4ae   : > { %v4258_v46 = vpop.f32.mrf.mxu2  ;;  %v4163_v22 = vpop.f32.mrf.mxu0  ;;  %v7002_v31 = vld [vmem:[#allocation2 + $0x2d8] sm:$0xf0] }
 0x4af   : > { %v4259_v28 = vadd.f32 %v4258_v46, %v4210_v47  ;;  %v4164_v38 = vadd.f32 %v4163_v22, %v10179_v8  ;;  %v7149_v46 = vor.u32 %v7660_v58, %v7146_v37  ;;  %v7560_v37 = vld [vmem:[#allocation2 + $0xcc] sm:$0xf] }
 0x4b0   : > { %v4212_v0 = vpop.f32.mrf.mxu1 }
 0x4b1   : > { %v4213_v50 = vadd.f32 %v4212_v0, %v4164_v38  ;;  %4358 = vmatmul.bf16.gmra.mxu0 %v10727_v21  ;;  %v7596_v0 = vld [vmem:[#allocation2 + $0x1ec] sm:$0xf]  ;;  %4854 = vmatpush.bf16.msra.mxu3 %v7149_v46 }
 0x4b2   : > { %v4302_v32 = vpop.f32.mrf.mxu3 }
 0x4b3   : > { %v4303_v42 = vadd.f32 %v4302_v32, %v4254_v52  ;;  %4407 = vmatmul.bf16.gmra.mxu1 %v9774_v1  ;;  %4456 = vmatmul.bf16.gmra.mxu2 %v10101_v24 }
 0x4b5   : > { %v4947_v39 = vmax.f32 %v4303_v42, 0.0 }
 0x4b6   : > { %v4261_v59 = vpop.f32.mrf.mxu2  ;;  %v4165_v53 = vpop.f32.mrf.mxu0 }
 0x4b7   : > { %v4262_v20 = vadd.f32 %v4261_v59, %v4213_v50  ;;  %4500 = vmatmul.bf16.gmra.mxu3 %v10167_v36  ;;  %v10240_v27 = vpack.c.bf16 %v4947_v39, %v4943_v18  ;;  %v4166_v52 = vadd.f32 %v4165_v53, %v10179_v8  ;;  %v6890_v50 = vld [vmem:[#allocation2 + $0x1f8] sm:$0xf0] }
 0x4b8   : > { %v4214_v47 = vpop.f32.mrf.mxu1  ;;  %v6893_v42 = vor.u32 %v7596_v0, %v6890_v50  ;;  %v6746_v0 = vld [vmem:[#allocation2 + $0xd8] sm:$0xf0]  ;;  %v7656_v50 = vld [vmem:[#allocation2 + $0x3cc] sm:$0xf] }
 0x4b9   : > { %10730 = vst [vmem:[#allocation27_spill] sm:$0xff] %v10240_v27  ;;  %v4215_v22 = vadd.f32 %v4214_v47, %v4166_v52  ;;  %v7624_v47 = vld [vmem:[#allocation2 + $0x2cc] sm:$0xf] }
 0x4ba   : > { %v4305_v38 = vpop.f32.mrf.mxu3  ;;  %4756 = vmatpush.bf16.msra.mxu1 %v6893_v42  ;;  %v7130_v42 = vld [vmem:[#allocation2 + $0x3d8] sm:$0xf0] }
 0x4bb   : > { %v4306_v32 = vadd.f32 %v4305_v38, %v4257_v12 }
 0x4bd   : > { %v4951_v12 = vmax.f32 %v4306_v32, 0.0  ;;  %v7133_v32 = vor.u32 %v7656_v50, %v7130_v42 }
 0x4be   : > { %v4263_v18 = vpop.f32.mrf.mxu2  ;;  %v4324_v8 = vpop.f32.mrf.mxu0 }
 0x4bf   : > { %v4264_v39 = vadd.f32 %v4263_v18, %v4215_v22  ;;  %v4325_v2 = vadd.f32 %v4324_v8, %v10244_v13  ;;  %v6749_v18 = vor.u32 %v7560_v37, %v6746_v0  ;;  %4855 = vmatpush.bf16.msra.mxu3 %v7133_v32  ;;  %v7556_v32 = vld [vmem:[#allocation2 + $0xac] sm:$0xf] }
 0x4c0   : > { %v4373_v59 = vpop.f32.mrf.mxu1 }
 0x4c1   : > { %v4374_v15 = vadd.f32 %v4373_v59, %v4325_v2  ;;  %4519 = vmatmul.bf16.vlgmr.msrb.gmra.mxu0 %v10713_v19  ;;  %v7592_v59 = vld [vmem:[#allocation2 + $0x1cc] sm:$0xf] }
 0x4c2   : > { %v4307_v53 = vpop.f32.mrf.mxu3  ;;  %4708 = vmatpush.bf16.msra.mxu0 %v6749_v18 }
 0x4c3   : > { %v4308_v49 = vadd.f32 %v4307_v53, %v4259_v28  ;;  %4568 = vmatmul.bf16.vlgmr.msrb.gmra.mxu1 %v10714_v51  ;;  %4617 = vmatmul.bf16.vlgmr.msrb.gmra.mxu2 %v9990_v56  ;;  %v7005_v28 = vor.u32 %v7624_v47, %v7002_v31 }
 0x4c5   : > { %v4955_v4 = vmax.f32 %v4308_v49, 0.0  ;;  %4806 = vmatpush.bf16.msra.mxu2 %v7005_v28  ;;  %v6986_v28 = vld [vmem:[#allocation2 + $0x2b8] sm:$0xf0] }
 0x4c6   : > { %v4422_v48 = vpop.f32.mrf.mxu2  ;;  %v4326_v52 = vpop.f32.mrf.mxu0 }
 0x4c7   : > { %v4423_v58 = vadd.f32 %v4422_v48, %v4374_v15  ;;  %4505 = vmatmul.bf16.gmra.mxu3 %v10185_v25  ;;  %v10251_v46 = vpack.c.bf16 %v4955_v4, %v4951_v12  ;;  %v4327_v22 = vadd.f32 %v4326_v52, %v10244_v13  ;;  %v6874_v15 = vld [vmem:[#allocation2 + $0x1d8] sm:$0xf0] }
 0x4c8   : > { %v4375_v38 = vpop.f32.mrf.mxu1  ;;  %v6877_v49 = vor.u32 %v7592_v59, %v6874_v15 }
 0x4c9   : > { %10731 = vst [vmem:[#allocation28_spill] sm:$0xff] %v10251_v46  ;;  %v4376_v8 = vadd.f32 %v4375_v38, %v4327_v22  ;;  %v7620_v38 = vld [vmem:[#allocation2 + $0x2ac] sm:$0xf] }
 0x4ca   : > { %v4310_v2 = vpop.f32.mrf.mxu3  ;;  %4757 = vmatpush.bf16.msra.mxu1 %v6877_v49  ;;  %v6989_v50 = vor.u32 %v7620_v38, %v6986_v28 }
 0x4cb   : > { %v4311_v53 = vadd.f32 %v4310_v2, %v4262_v20  ;;  %v7652_v2 = vld [vmem:[#allocation2 + $0x3ac] sm:$0xf] }
 0x4cc   : > { %4807 = vmatpush.bf16.msra.mxu2 %v6989_v50 }
 0x4cd   : > { %v4959_v20 = vmax.f32 %v4311_v53, 0.0  ;;  %v7114_v53 = vld [vmem:[#allocation2 + $0x3b8] sm:$0xf0] }
 0x4ce   : > { %v4424_v12 = vpop.f32.mrf.mxu2  ;;  %v4329_v48 = vpop.f32.mrf.mxu0  ;;  %v7117_v49 = vor.u32 %v7652_v2, %v7114_v53  ;;  %v7616_v2 = vld [vmem:[#allocation2 + $0x28c] sm:$0xf] }
 0x4cf   : > { %v4425_v4 = vadd.f32 %v4424_v12, %v4376_v8  ;;  %v4330_v52 = vadd.f32 %v4329_v48, %v10244_v13  ;;  %v6730_v8 = vld [vmem:[#allocation2 + $0xb8] sm:$0xf0] }
 0x4d0   : > { %v4378_v47 = vpop.f32.mrf.mxu1  ;;  %v6733_v15 = vor.u32 %v7556_v32, %v6730_v8  ;;  %4856 = vmatpush.bf16.msra.mxu3 %v7117_v49 }
 0x4d1   : > { %v4379_v31 = vadd.f32 %v4378_v47, %v4330_v52  ;;  %4524 = vmatmul.bf16.gmra.mxu0 %v10715_v44  ;;  %v7588_v52 = vld [vmem:[#allocation2 + $0x1ac] sm:$0xf]  ;;  %v6858_v47 = vld [vmem:[#allocation2 + $0x1b8] sm:$0xf0] }
 0x4d2   : > { %v4312_v46 = vpop.f32.mrf.mxu3  ;;  %4709 = vmatpush.bf16.msra.mxu0 %v6733_v15 }
 0x4d3   : > { %v4313_v37 = vadd.f32 %v4312_v46, %v4264_v39  ;;  %4573 = vmatmul.bf16.gmra.mxu1 %v10716_v55  ;;  %4622 = vmatmul.bf16.gmra.mxu2 %v10005_v40 }
 0x4d5   : > { %v4963_v22 = vmax.f32 %v4313_v37, 0.0  ;;  %v6861_v37 = vor.u32 %v7588_v52, %v6858_v47  ;;  %v6714_v52 = vld [vmem:[#allocation2 + $0x98] sm:$0xf0]  ;;  %v7648_v47 = vld [vmem:[#allocation2 + $0x38c] sm:$0xf] }
 0x4d6   : > { %v4427_v0 = vpop.f32.mrf.mxu2  ;;  %v4331_v18 = vpop.f32.mrf.mxu0 }
 0x4d7   : > { %v4428_v42 = vadd.f32 %v4427_v0, %v4379_v31  ;;  %4666 = vmatmul.bf16.vlgmr.msrb.gmra.mxu3 %v10116_v41  ;;  %v10259_v59 = vpack.c.bf16 %v4963_v22, %v4959_v20  ;;  %v4332_v39 = vadd.f32 %v4331_v18, %v10244_v13  ;;  %4758 = vmatpush.bf16.msra.mxu1 %v6861_v37 }
 0x4d8   : > { %v4380_v46 = vpop.f32.mrf.mxu1 }
 0x4d9   : > { %10732 = vst [vmem:[#allocation12_spill] sm:$0xff] %v10259_v59  ;;  %v4381_v12 = vadd.f32 %v4380_v46, %v4332_v39  ;;  %v6970_v39 = vld [vmem:[#allocation2 + $0x298] sm:$0xf0] }
 0x4da   : > { %v4471_v48 = vpop.f32.mrf.mxu3  ;;  %v6973_v15 = vor.u32 %v7616_v2, %v6970_v39 }
 0x4db   : > { %v4472_v31 = vadd.f32 %v4471_v48, %v4423_v58  ;;  %v7552_v48 = vld [vmem:[#allocation2 + $0x8c] sm:$0xf] }
 0x4dc   : > { %4808 = vmatpush.bf16.msra.mxu2 %v6973_v15 }
 0x4dd   : > { %v4904_v8 = vmax.f32 %v4472_v31, 0.0  ;;  %v7098_v31 = vld [vmem:[#allocation2 + $0x398] sm:$0xf0] }
 0x4de   : > { %v4429_v38 = vpop.f32.mrf.mxu2  ;;  %v4334_v20 = vpop.f32.mrf.mxu0 }
 0x4df   : > { %v4430_v28 = vadd.f32 %v4429_v38, %v4381_v12  ;;  %v4335_v22 = vadd.f32 %v4334_v20, %v10244_v13  ;;  %v6717_v38 = vor.u32 %v7552_v48, %v6714_v52  ;;  %v7101_v20 = vor.u32 %v7648_v47, %v7098_v31  ;;  %v7612_v47 = vld [vmem:[#allocation2 + $0x26c] sm:$0xf] }
 0x4e0   : > { %v4383_v0 = vpop.f32.mrf.mxu1 }
 0x4e1   : > { %v4384_v18 = vadd.f32 %v4383_v0, %v4335_v22  ;;  %4529 = vmatmul.bf16.gmra.mxu0 %v10717_v63  ;;  %4857 = vmatpush.bf16.msra.mxu3 %v7101_v20 }
 0x4e2   : > { %v4473_v50 = vpop.f32.mrf.mxu3  ;;  %4710 = vmatpush.bf16.msra.mxu0 %v6717_v38 }
 0x4e3   : > { %v4474_v32 = vadd.f32 %v4473_v50, %v4425_v4  ;;  %4578 = vmatmul.bf16.gmra.mxu1 %v10718_v6  ;;  %4627 = vmatmul.bf16.gmra.mxu2 %v10020_v34  ;;  %v7584_v50 = vld [vmem:[#allocation2 + $0x18c] sm:$0xf] }
 0x4e5   : > { %v4908_v58 = vmax.f32 %v4474_v32, 0.0  ;;  %v6842_v32 = vld [vmem:[#allocation2 + $0x198] sm:$0xf0] }
 0x4e6   : > { %v4432_v46 = vpop.f32.mrf.mxu2  ;;  %v4336_v12 = vpop.f32.mrf.mxu0 }
 0x4e7   : > { %v10266_v53 = vpack.c.bf16 %v4908_v58, %v4904_v8  ;;  %v4433_v49 = vadd.f32 %v4432_v46, %v4384_v18  ;;  %4671 = vmatmul.bf16.gmra.mxu3 %v10124_v35  ;;  %v4337_v4 = vadd.f32 %v4336_v12, %v10244_v13  ;;  %v6845_v18 = vor.u32 %v7584_v50, %v6842_v32  ;;  %v7644_v50 = vld [vmem:[#allocation2 + $0x36c] sm:$0xf] }
 0x4e8   : > { %v4385_v37 = vpop.f32.mrf.mxu1 }
 0x4e9   : > { %v4386_v22 = vadd.f32 %v4385_v37, %v4337_v4  ;;  %4759 = vmatpush.bf16.msra.mxu1 %v6845_v18  ;;  %v6954_v4 = vld [vmem:[#allocation2 + $0x278] sm:$0xf0] }
 0x4ea   : > { %v4476_v0 = vpop.f32.mrf.mxu3  ;;  %v6957_v38 = vor.u32 %v7612_v47, %v6954_v4 }
 0x4eb   : > { %v4477_v8 = vadd.f32 %v4476_v0, %v4428_v42  ;;  %v6698_v0 = vld [vmem:[#allocation2 + $0x78] sm:$0xf0] }
 0x4ec   : > { %4809 = vmatpush.bf16.msra.mxu2 %v6957_v38 }
 0x4ed   : > { %v4912_v52 = vmax.f32 %v4477_v8, 0.0  ;;  %v7082_v8 = vld [vmem:[#allocation2 + $0x378] sm:$0xf0] }
 0x4ee   : > { %v4434_v58 = vpop.f32.mrf.mxu2  ;;  %v4339_v39 = vpop.f32.mrf.mxu0 }
 0x4ef   : > { %v4435_v2 = vadd.f32 %v4434_v58, %v4386_v22  ;;  %v4340_v46 = vadd.f32 %v4339_v39, %v10244_v13  ;;  %v7548_v22 = vld [vmem:[#allocation2 + $0x6c] sm:$0xf]  ;;  %v7085_v39 = vor.u32 %v7644_v50, %v7082_v8 }
 0x4f0   : > { %v4388_v12 = vpop.f32.mrf.mxu1  ;;  %v6701_v58 = vor.u32 %v7548_v22, %v6698_v0  ;;  %v7608_v50 = vld [vmem:[#allocation2 + $0x24c] sm:$0xf] }
 0x4f1   : > { %v4389_v59 = vadd.f32 %v4388_v12, %v4340_v46  ;;  %4534 = vmatmul.bf16.gmra.mxu0 %v10719_v16  ;;  %4858 = vmatpush.bf16.msra.mxu3 %v7085_v39 }
 0x4f2   : > { %v4478_v15 = vpop.f32.mrf.mxu3  ;;  %4711 = vmatpush.bf16.msra.mxu0 %v6701_v58 }
 0x4f3   : > { %v4479_v48 = vadd.f32 %v4478_v15, %v4430_v28  ;;  %4583 = vmatmul.bf16.gmra.mxu1 %v10720_v61  ;;  %4632 = vmatmul.bf16.gmra.mxu2 %v10035_v5  ;;  %v7580_v15 = vld [vmem:[#allocation2 + $0x16c] sm:$0xf] }
 0x4f5   : > { %v4916_v42 = vmax.f32 %v4479_v48, 0.0 }
 0x4f6   : > { %v4437_v37 = vpop.f32.mrf.mxu2  ;;  %v4341_v20 = vpop.f32.mrf.mxu0 }
 0x4f7   : > { %v4438_v31 = vadd.f32 %v4437_v37, %v4389_v59  ;;  %4676 = vmatmul.bf16.gmra.mxu3 %v10132_v14  ;;  %v10275_v32 = vpack.c.bf16 %v4916_v42, %v4912_v52  ;;  %v4342_v28 = vadd.f32 %v4341_v20, %v10244_v13  ;;  %v6826_v59 = vld [vmem:[#allocation2 + $0x178] sm:$0xf0] }
 0x4f8   : > { %v4390_v18 = vpop.f32.mrf.mxu1  ;;  %v6829_v47 = vor.u32 %v7580_v15, %v6826_v59  ;;  %v7640_v15 = vld [vmem:[#allocation2 + $0x34c] sm:$0xf] }
 0x4f9   : > { %v4391_v46 = vadd.f32 %v4390_v18, %v4342_v28  ;;  %v6938_v28 = vld [vmem:[#allocation2 + $0x258] sm:$0xf0] }
 0x4fa   : > { %v4481_v12 = vpop.f32.mrf.mxu3  ;;  %4760 = vmatpush.bf16.msra.mxu1 %v6829_v47  ;;  %v6941_v58 = vor.u32 %v7608_v50, %v6938_v28 }
 0x4fb   : > { %v4482_v48 = vadd.f32 %v4481_v12, %v4433_v49  ;;  %v6682_v12 = vld [vmem:[#allocation2 + $0x58] sm:$0xf0] }
 0x4fc   : > { %4810 = vmatpush.bf16.msra.mxu2 %v6941_v58 }
 0x4fd   : > { %v4920_v0 = vmax.f32 %v4482_v48, 0.0  ;;  %v7066_v48 = vld [vmem:[#allocation2 + $0x358] sm:$0xf0] }
 0x4fe   : > { %v4439_v4 = vpop.f32.mrf.mxu2  ;;  %v4344_v52 = vpop.f32.mrf.mxu0 }
 0x4ff   : > { %v4440_v37 = vadd.f32 %v4439_v4, %v4391_v46  ;;  %v4345_v42 = vadd.f32 %v4344_v52, %v10244_v13  ;;  %v7544_v46 = vld [vmem:[#allocation2 + $0x4c] sm:$0xf]  ;;  %v7069_v52 = vor.u32 %v7640_v15, %v7066_v48 }
 0x500   : > { %v4393_v20 = vpop.f32.mrf.mxu1  ;;  %v6685_v4 = vor.u32 %v7544_v46, %v6682_v12  ;;  %v7604_v15 = vld [vmem:[#allocation2 + $0x22c] sm:$0xf] }
 0x501   : > { %v4394_v27 = vadd.f32 %v4393_v20, %v4345_v42  ;;  %4539 = vmatmul.bf16.gmra.mxu0 %v10721_v62  ;;  %4859 = vmatpush.bf16.msra.mxu3 %v7069_v52 }
 0x502   : > { %v4483_v38 = vpop.f32.mrf.mxu3  ;;  %4712 = vmatpush.bf16.msra.mxu0 %v6685_v4 }
 0x503   : > { %v4484_v22 = vadd.f32 %v4483_v38, %v4435_v2  ;;  %4588 = vmatmul.bf16.gmra.mxu1 %v10722_v30  ;;  %4637 = vmatmul.bf16.gmra.mxu2 %v10050_v11  ;;  %v7576_v38 = vld [vmem:[#allocation2 + $0x14c] sm:$0xf] }
 0x505   : > { %v4924_v49 = vmax.f32 %v4484_v22, 0.0 }
 0x506   : > { %v4442_v18 = vpop.f32.mrf.mxu2  ;;  %v4346_v39 = vpop.f32.mrf.mxu0 }
 0x507   : > { %v4443_v8 = vadd.f32 %v4442_v18, %v4394_v27  ;;  %4681 = vmatmul.bf16.gmra.mxu3 %v10140_v60  ;;  %v10283_v59 = vpack.c.bf16 %v4924_v49, %v4920_v0  ;;  %v4347_v2 = vadd.f32 %v4346_v39, %v10244_v13  ;;  %v6810_v27 = vld [vmem:[#allocation2 + $0x158] sm:$0xf0] }
 0x508   : > { %v4395_v47 = vpop.f32.mrf.mxu1  ;;  %v6813_v50 = vor.u32 %v7576_v38, %v6810_v27  ;;  %v7636_v38 = vld [vmem:[#allocation2 + $0x32c] sm:$0xf] }
 0x509   : > { %v4396_v42 = vadd.f32 %v4395_v47, %v4347_v2  ;;  %v6922_v2 = vld [vmem:[#allocation2 + $0x238] sm:$0xf0] }
 0x50a   : > { %v4486_v20 = vpop.f32.mrf.mxu3  ;;  %4761 = vmatpush.bf16.msra.mxu1 %v6813_v50  ;;  %v6925_v4 = vor.u32 %v7604_v15, %v6922_v2 }
 0x50b   : > { %v4487_v22 = vadd.f32 %v4486_v20, %v4438_v31  ;;  %v6666_v20 = vld [vmem:[#allocation2 + $0x38] sm:$0xf0] }
 0x50c   : > { %4811 = vmatpush.bf16.msra.mxu2 %v6925_v4  ;;  %v6778_v4 = vld [vmem:[#allocation2 + $0x118] sm:$0xf0] }
 0x50d   : > { %v4928_v12 = vmax.f32 %v4487_v22, 0.0  ;;  %v7050_v22 = vld [vmem:[#allocation2 + $0x338] sm:$0xf0] }
 0x50e   : > { %v4444_v28 = vpop.f32.mrf.mxu2  ;;  %v4349_v0 = vpop.f32.mrf.mxu0 }
 0x50f   : > { %v4445_v18 = vadd.f32 %v4444_v28, %v4396_v42  ;;  %v4350_v49 = vadd.f32 %v4349_v0, %v10244_v13  ;;  %v7540_v42 = vld [vmem:[#allocation2 + $0x2c] sm:$0xf]  ;;  %v7053_v0 = vor.u32 %v7636_v38, %v7050_v22 }
 0x510   : > { %v4398_v39 = vpop.f32.mrf.mxu1  ;;  %v6669_v28 = vor.u32 %v7540_v42, %v6666_v20  ;;  %v7600_v42 = vld [vmem:[#allocation2 + $0x20c] sm:$0xf] }
 0x511   : > { %v4399_v54 = vadd.f32 %v4398_v39, %v4350_v49  ;;  %4544 = vmatmul.bf16.gmra.mxu0 %v10723_v43  ;;  %4860 = vmatpush.bf16.msra.mxu3 %v7053_v0 }
 0x512   : > { %v4488_v58 = vpop.f32.mrf.mxu3  ;;  %4713 = vmatpush.bf16.msra.mxu0 %v6669_v28 }
 0x513   : > { %v4489_v46 = vadd.f32 %v4488_v58, %v4440_v37  ;;  %4593 = vmatmul.bf16.gmra.mxu1 %v10724_v26  ;;  %4642 = vmatmul.bf16.gmra.mxu2 %v10067_v10  ;;  %v7572_v58 = vld [vmem:[#allocation2 + $0x12c] sm:$0xf] }
 0x515   : > { %v4932_v31 = vmax.f32 %v4489_v46, 0.0 }
 0x516   : > { %v4447_v47 = vpop.f32.mrf.mxu2  ;;  %v4351_v52 = vpop.f32.mrf.mxu0 }
 0x517   : > { %v4448_v48 = vadd.f32 %v4447_v47, %v4399_v54  ;;  %4686 = vmatmul.bf16.gmra.mxu3 %v10149_v7  ;;  %v10291_v27 = vpack.c.bf16 %v4932_v31, %v4928_v12  ;;  %v4352_v37 = vadd.f32 %v4351_v52, %v10244_v13  ;;  %v6794_v54 = vld [vmem:[#allocation2 + $0x138] sm:$0xf0]  ;;  %v7536_v47 = vld [vmem:[#allocation2 + $0xc] sm:$0xf] }
 0x518   : > { %v4400_v50 = vpop.f32.mrf.mxu1  ;;  %v6797_v15 = vor.u32 %v7572_v58, %v6794_v54  ;;  %v6650_v12 = vld [vmem:[#allocation2 + $0x18] sm:$0xf0]  ;;  %v7568_v31 = vld [vmem:[#allocation2 + $0x10c] sm:$0xf] }
 0x519   : > { %10733 = vst [vmem:[#allocation33_spill] sm:$0xff] %v10291_v27  ;;  %v4401_v49 = vadd.f32 %v4400_v50, %v4352_v37  ;;  %v6653_v57 = vor.u32 %v7536_v47, %v6650_v12  ;;  %v6781_v37 = vor.u32 %v7568_v31, %v6778_v4  ;;  %v6906_v50 = vld [vmem:[#allocation2 + $0x218] sm:$0xf0] }
 0x51a   : > { %v4491_v39 = vpop.f32.mrf.mxu3  ;;  %4762 = vmatpush.bf16.msra.mxu1 %v6797_v15  ;;  %v6909_v28 = vor.u32 %v7600_v42, %v6906_v50 }
 0x51b   : > { %v4492_v46 = vadd.f32 %v4491_v39, %v4443_v8  ;;  %4714 = vmatpush.bf16.msra.mxu0 %v6653_v57  ;;  %v7632_v57 = vld [vmem:[#allocation2 + $0x30c] sm:$0xf] }
 0x51c   : > { %4812 = vmatpush.bf16.msra.mxu2 %v6909_v28 }
 0x51e   : > { %v4449_v2 = vpop.f32.mrf.mxu2  ;;  %v4354_v52 = vpop.f32.mrf.mxu0  ;;  %4763 = vmatpush.bf16.msra.mxu1 %v6781_v37 }
 0x51f   : > { %v4450_v27 = vadd.f32 %v4449_v2, %v4401_v49  ;;  %v4355_v20 = vadd.f32 %v4354_v52, %v10244_v13  ;;  %v4936_v49 = vmax.f32 %v4492_v46, 0.0  ;;  %v7034_v2 = vld [vmem:[#allocation2 + $0x318] sm:$0xf0] }
 0x520   : > { %v4403_v38 = vpop.f32.mrf.mxu1 }
 0x521   : > { %v4404_v8 = vadd.f32 %v4403_v38, %v4355_v20  ;;  %4549 = vmatmul.bf16.gmra.mxu0 %v10725_v45 }
 0x522   : > { %v4493_v22 = vpop.f32.mrf.mxu3 }
 0x523   : > { %v4494_v0 = vadd.f32 %v4493_v22, %v4445_v18  ;;  %4598 = vmatmul.bf16.gmra.mxu1 %v10726_v3  ;;  %4647 = vmatmul.bf16.gmra.mxu2 %v10084_v23  ;;  %v7037_v18 = vor.u32 %v7632_v57, %v7034_v2 }
 0x525   : > { %v4940_v39 = vmax.f32 %v4494_v0, 0.0  ;;  %4861 = vmatpush.bf16.msra.mxu3 %v7037_v18 }
 0x526   : > { %v4452_v58 = vpop.f32.mrf.mxu2  ;;  %v4356_v15 = vpop.f32.mrf.mxu0 }
 0x527   : > { %v4453_v54 = vadd.f32 %v4452_v58, %v4404_v8  ;;  %4691 = vmatmul.bf16.gmra.mxu3 %v10158_v9  ;;  %v10299_v47 = vpack.c.bf16 %v4940_v39, %v4936_v49  ;;  %v4357_v12 = vadd.f32 %v4356_v15, %v10244_v13 }
 0x528   : > { %v4405_v31 = vpop.f32.mrf.mxu1 }
 0x529   : > { %v4406_v52 = vadd.f32 %v4405_v31, %v4357_v12 }
 0x52a   : > { %v4496_v4 = vpop.f32.mrf.mxu3 }
 0x52b   : > { %v4497_v42 = vadd.f32 %v4496_v4, %v4448_v48 }
 0x52d   : > { %v4944_v0 = vmax.f32 %v4497_v42, 0.0 }
 0x52e   : > { %v4454_v20 = vpop.f32.mrf.mxu2  ;;  %v4359_v38 = vpop.f32.mrf.mxu0 }
 0x52f   : > { %v4455_v46 = vadd.f32 %v4454_v20, %v4406_v52  ;;  %v4360_v37 = vadd.f32 %v4359_v38, %v10244_v13 }
 0x530   : > { %v4408_v50 = vpop.f32.mrf.mxu1 }
 0x531   : > { %v4409_v28 = vadd.f32 %v4408_v50, %v4360_v37  ;;  %4554 = vmatmul.bf16.gmra.mxu0 %v10727_v21 }
 0x532   : > { %v4498_v8 = vpop.f32.mrf.mxu3 }
 0x533   : > { %v4499_v22 = vadd.f32 %v4498_v8, %v4450_v27  ;;  %4603 = vmatmul.bf16.gmra.mxu1 %v9774_v1  ;;  %4652 = vmatmul.bf16.gmra.mxu2 %v10101_v24  ;;  %v10313_v27 = vld [vmem:[%s10510_s4] sm:$0xf] }
 0x534   : > { %v10316_v52 = vperm.slane %v10313_v27, 2 }
 0x535   : > { %v4948_v49 = vmax.f32 %v4499_v22, 0.0 }
 0x536   : > { %v4457_v39 = vpop.f32.mrf.mxu2  ;;  %v4361_v48 = vpop.f32.mrf.mxu0 }
 0x537   : > { %v4458_v58 = vadd.f32 %v4457_v39, %v4409_v28  ;;  %4696 = vmatmul.bf16.gmra.mxu3 %v10167_v36  ;;  %v10307_v15 = vpack.c.bf16 %v4948_v49, %v4944_v0  ;;  %v4362_v57 = vadd.f32 %v4361_v48, %v10244_v13  ;;  %v7686_v39 = vld [vmem:[#allocation5 + $0xb8] sm:$0xff] }
 0x538   : > { %v4410_v2 = vpop.f32.mrf.mxu1  ;;  %5357 = vmatpush.bf16.msrb.mxu2 %v7686_v39  ;;  %v7685_v39 = vld [vmem:[#allocation5 + $0xb0] sm:$0xff] }
 0x539   : > { %v4411_v12 = vadd.f32 %v4410_v2, %v4362_v57 }
 0x53a   : > { %v4501_v31 = vpop.f32.mrf.mxu3 }
 0x53b   : > { %v4502_v18 = vadd.f32 %v4501_v31, %v4453_v54 }
 0x53c   : > { %5358 = vmatpush.bf16.msrb.mxu2 %v7685_v39 }
 0x53d   : > { %v4952_v54 = vmax.f32 %v4502_v18, 0.0 }
 0x53e   : > { %v4459_v4 = vpop.f32.mrf.mxu2  ;;  %v4520_v20 = vpop.f32.mrf.mxu0 }
 0x53f   : > { %v4460_v42 = vadd.f32 %v4459_v4, %v4411_v12  ;;  %v4521_v38 = vadd.f32 %v4520_v20, %v10316_v52  ;;  %v7670_v12 = vld [vmem:[#allocation5 + $0x38] sm:$0xff] }
 0x540   : > { %v4569_v37 = vpop.f32.mrf.mxu1  ;;  %5259 = vmatpush.bf16.msrb.mxu0 %v7670_v12 }
 0x541   : > { %v4570_v50 = vadd.f32 %v4569_v37, %v4521_v38  ;;  %4715 = vmatmul.bf16.vlgmr.msra.gmra.mxu0 %v10713_v19 }
 0x542   : > { %v4503_v13 = vpop.f32.mrf.mxu3 }
 0x543   : > { %v4504_v28 = vadd.f32 %v4503_v13, %v4455_v46  ;;  %4764 = vmatmul.bf16.vlgmr.msra.gmra.mxu1 %v10714_v51  ;;  %4813 = vmatmul.bf16.vlgmr.msra.gmra.mxu2 %v9990_v56  ;;  %v7694_v51 = vld [vmem:[#allocation5 + $0xf8] sm:$0xff] }
 0x544   : > { %5406 = vmatpush.bf16.msrb.mxu3 %v7694_v51  ;;  %v7678_v56 = vld [vmem:[#allocation5 + $0x78] sm:$0xff] }
 0x545   : > { %v4956_v8 = vmax.f32 %v4504_v28, 0.0  ;;  %5308 = vmatpush.bf16.msrb.mxu1 %v7678_v56 }
 0x546   : > { %v4618_v22 = vpop.f32.mrf.mxu2  ;;  %v4522_v49 = vpop.f32.mrf.mxu0 }
 0x547   : > { %v4619_v0 = vadd.f32 %v4618_v22, %v4570_v50  ;;  %4701 = vmatmul.bf16.gmra.mxu3 %v10185_v25  ;;  %v10323_v48 = vpack.c.bf16 %v4956_v8, %v4952_v54  ;;  %v4523_v57 = vadd.f32 %v4522_v49, %v10316_v52 }
 0x548   : > { %v4571_v2 = vpop.f32.mrf.mxu1 }
 0x549   : > { %v4572_v19 = vadd.f32 %v4571_v2, %v4523_v57 }
 0x54a   : > { %v4506_v46 = vpop.f32.mrf.mxu3 }
 0x54b   : > { %v4507_v31 = vadd.f32 %v4506_v46, %v4458_v58  ;;  %v7669_v46 = vld [vmem:[#allocation5 + $0x30] sm:$0xff] }
 0x54c   : > { %5260 = vmatpush.bf16.msrb.mxu0 %v7669_v46 }
 0x54d   : > { %v4960_v58 = vmax.f32 %v4507_v31, 0.0 }
 0x54e   : > { %v4620_v18 = vpop.f32.mrf.mxu2  ;;  %v4525_v20 = vpop.f32.mrf.mxu0 }
 0x54f   : > { %v4621_v4 = vadd.f32 %v4620_v18, %v4572_v19  ;;  %v4526_v38 = vadd.f32 %v4525_v20, %v10316_v52 }
 0x550   : > { %v4574_v37 = vpop.f32.mrf.mxu1 }
 0x551   : > { %v4575_v50 = vadd.f32 %v4574_v37, %v4526_v38  ;;  %4720 = vmatmul.bf16.gmra.mxu0 %v10715_v44 }
 0x552   : > { %v4508_v13 = vpop.f32.mrf.mxu3 }
 0x553   : > { %v4509_v28 = vadd.f32 %v4508_v13, %v4460_v42  ;;  %4769 = vmatmul.bf16.gmra.mxu1 %v10716_v55  ;;  %4818 = vmatmul.bf16.gmra.mxu2 %v10005_v40  ;;  %v7693_v55 = vld [vmem:[#allocation5 + $0xf0] sm:$0xff] }
 0x554   : > { %5407 = vmatpush.bf16.msrb.mxu3 %v7693_v55  ;;  %v7677_v40 = vld [vmem:[#allocation5 + $0x70] sm:$0xff] }
 0x555   : > { %v4964_v54 = vmax.f32 %v4509_v28, 0.0  ;;  %5309 = vmatpush.bf16.msrb.mxu1 %v7677_v40 }
 0x556   : > { %v4623_v8 = vpop.f32.mrf.mxu2  ;;  %v4527_v49 = vpop.f32.mrf.mxu0 }
 0x557   : > { %v4624_v22 = vadd.f32 %v4623_v8, %v4575_v50  ;;  %4862 = vmatmul.bf16.vlgmr.msra.gmra.mxu3 %v10116_v41  ;;  %v10331_v57 = vpack.c.bf16 %v4964_v54, %v4960_v58  ;;  %v4528_v2 = vadd.f32 %v4527_v49, %v10316_v52  ;;  %v7684_v8 = vld [vmem:[#allocation5 + $0xa8] sm:$0xff] }
 0x558   : > { %v4576_v19 = vpop.f32.mrf.mxu1  ;;  %5359 = vmatpush.bf16.msrb.mxu2 %v7684_v8 }
 0x559   : > { %v4577_v44 = vadd.f32 %v4576_v19, %v4528_v2  ;;  %v7668_v2 = vld [vmem:[#allocation5 + $0x28] sm:$0xff] }
 0x55a   : > { %v4667_v42 = vpop.f32.mrf.mxu3  ;;  %5261 = vmatpush.bf16.msrb.mxu0 %v7668_v2 }
 0x55b   : > { %v4668_v12 = vadd.f32 %v4667_v42, %v4619_v0 }
 0x55d   : > { %v4905_v0 = vmax.f32 %v4668_v12, 0.0 }
 0x55e   : > { %v4625_v51 = vpop.f32.mrf.mxu2  ;;  %v4530_v56 = vpop.f32.mrf.mxu0 }
 0x55f   : > { %v4626_v31 = vadd.f32 %v4625_v51, %v4577_v44  ;;  %v4531_v41 = vadd.f32 %v4530_v56, %v10316_v52 }
 0x560   : > { %v4579_v18 = vpop.f32.mrf.mxu1 }
 0x561   : > { %v4580_v20 = vadd.f32 %v4579_v18, %v4531_v41  ;;  %4725 = vmatmul.bf16.gmra.mxu0 %v10717_v63 }
 0x562   : > { %v4669_v38 = vpop.f32.mrf.mxu3 }
 0x563   : > { %v4670_v37 = vadd.f32 %v4669_v38, %v4621_v4  ;;  %4774 = vmatmul.bf16.gmra.mxu1 %v10718_v6  ;;  %4823 = vmatmul.bf16.gmra.mxu2 %v10020_v34  ;;  %v7692_v6 = vld [vmem:[#allocation5 + $0xe8] sm:$0xff]  ;;  %v7683_v38 = vld [vmem:[#allocation5 + $0xa0] sm:$0xff] }
 0x564   : > { %5408 = vmatpush.bf16.msrb.mxu3 %v7692_v6  ;;  %v7676_v34 = vld [vmem:[#allocation5 + $0x68] sm:$0xff]  ;;  %5360 = vmatpush.bf16.msrb.mxu2 %v7683_v38 }
 0x565   : > { %v4909_v50 = vmax.f32 %v4670_v37, 0.0  ;;  %5310 = vmatpush.bf16.msrb.mxu1 %v7676_v34 }
 0x566   : > { %v4628_v13 = vpop.f32.mrf.mxu2  ;;  %v4532_v54 = vpop.f32.mrf.mxu0 }
 0x567   : > { %v10338_v28 = vpack.c.bf16 %v4909_v50, %v4905_v0  ;;  %v4629_v58 = vadd.f32 %v4628_v13, %v4580_v20  ;;  %4867 = vmatmul.bf16.gmra.mxu3 %v10124_v35  ;;  %v4533_v49 = vadd.f32 %v4532_v54, %v10316_v52  ;;  %v7667_v13 = vld [vmem:[#allocation5 + $0x20] sm:$0xff] }
 0x568   : > { %v4581_v39 = vpop.f32.mrf.mxu1  ;;  %5262 = vmatpush.bf16.msrb.mxu0 %v7667_v13 }
 0x569   : > { %v4582_v63 = vadd.f32 %v4581_v39, %v4533_v49 }
 0x56a   : > { %v4672_v4 = vpop.f32.mrf.mxu3 }
 0x56b   : > { %v4673_v19 = vadd.f32 %v4672_v4, %v4624_v22 }
 0x56d   : > { %v4913_v22 = vmax.f32 %v4673_v19, 0.0 }
 0x56e   : > { %v4630_v44 = vpop.f32.mrf.mxu2  ;;  %v4535_v46 = vpop.f32.mrf.mxu0 }
 0x56f   : > { %v4631_v42 = vadd.f32 %v4630_v44, %v4582_v63  ;;  %v4536_v35 = vadd.f32 %v4535_v46, %v10316_v52 }
 0x570   : > { %v4584_v55 = vpop.f32.mrf.mxu1 }
 0x571   : > { %v4585_v12 = vadd.f32 %v4584_v55, %v4536_v35  ;;  %4730 = vmatmul.bf16.gmra.mxu0 %v10719_v16  ;;  %v7682_v35 = vld [vmem:[#allocation5 + $0x98] sm:$0xff] }
 0x572   : > { %v4674_v40 = vpop.f32.mrf.mxu3  ;;  %5361 = vmatpush.bf16.msrb.mxu2 %v7682_v35  ;;  %v7671_v35 = vld [vmem:[#allocation5 + $0x40] sm:$0xff] }
 0x573   : > { %v4675_v51 = vadd.f32 %v4674_v40, %v4626_v31  ;;  %4779 = vmatmul.bf16.gmra.mxu1 %v10720_v61  ;;  %4828 = vmatmul.bf16.gmra.mxu2 %v10035_v5  ;;  %v7691_v61 = vld [vmem:[#allocation5 + $0xe0] sm:$0xff] }
 0x574   : > { %5409 = vmatpush.bf16.msrb.mxu3 %v7691_v61  ;;  %v7675_v5 = vld [vmem:[#allocation5 + $0x60] sm:$0xff] }
 0x575   : > { %v4917_v56 = vmax.f32 %v4675_v51, 0.0  ;;  %5311 = vmatpush.bf16.msrb.mxu1 %v7675_v5  ;;  %v7666_v51 = vld [vmem:[#allocation5 + $0x18] sm:$0xff]  ;;  %v7681_v5 = vld [vmem:[#allocation5 + $0x90] sm:$0xff] }
 0x576   : > { %v4633_v41 = vpop.f32.mrf.mxu2  ;;  %v4537_v20 = vpop.f32.mrf.mxu0  ;;  %5263 = vmatpush.bf16.msrb.mxu0 %v7666_v51  ;;  %5362 = vmatpush.bf16.msrb.mxu2 %v7681_v5 }
 0x577   : > { %v4634_v18 = vadd.f32 %v4633_v41, %v4585_v12  ;;  %4872 = vmatmul.bf16.gmra.mxu3 %v10132_v14  ;;  %v10347_v37 = vpack.c.bf16 %v4917_v56, %v4913_v22  ;;  %v4538_v0 = vadd.f32 %v4537_v20, %v10316_v52 }
 0x578   : > { %v4586_v50 = vpop.f32.mrf.mxu1 }
 0x579   : > { %v4587_v16 = vadd.f32 %v4586_v50, %v4538_v0 }
 0x57a   : > { %v4677_v31 = vpop.f32.mrf.mxu3 }
 0x57b   : > { %v4678_v54 = vadd.f32 %v4677_v31, %v4629_v58 }
 0x57d   : > { %v4921_v58 = vmax.f32 %v4678_v54, 0.0 }
 0x57e   : > { %v4635_v8 = vpop.f32.mrf.mxu2  ;;  %v4540_v39 = vpop.f32.mrf.mxu0 }
 0x57f   : > { %v4636_v49 = vadd.f32 %v4635_v8, %v4587_v16  ;;  %v4541_v14 = vadd.f32 %v4540_v39, %v10316_v52  ;;  %v7665_v8 = vld [vmem:[#allocation5 + $0x10] sm:$0xff] }
 0x580   : > { %v4589_v63 = vpop.f32.mrf.mxu1  ;;  %v7673_v39 = vld [vmem:[#allocation5 + $0x50] sm:$0xff]  ;;  %5264 = vmatpush.bf16.msrb.mxu0 %v7665_v8 }
 0x581   : > { %v4590_v4 = vadd.f32 %v4589_v63, %v4541_v14  ;;  %4735 = vmatmul.bf16.gmra.mxu0 %v10721_v62 }
 0x582   : > { %v4679_v2 = vpop.f32.mrf.mxu3 }
 0x583   : > { %v4680_v6 = vadd.f32 %v4679_v2, %v4631_v42  ;;  %4784 = vmatmul.bf16.gmra.mxu1 %v10722_v30  ;;  %4833 = vmatmul.bf16.gmra.mxu2 %v10050_v11  ;;  %v7690_v30 = vld [vmem:[#allocation5 + $0xd8] sm:$0xff]  ;;  %v7664_v2 = vld [vmem:[#allocation5 + $0x8] sm:$0xff] }
 0x584   : > { %5410 = vmatpush.bf16.msrb.mxu3 %v7690_v30  ;;  %v7674_v11 = vld [vmem:[#allocation5 + $0x58] sm:$0xff]  ;;  %5265 = vmatpush.bf16.msrb.mxu0 %v7664_v2 }
 0x585   : > { %v4925_v19 = vmax.f32 %v4680_v6, 0.0  ;;  %5312 = vmatpush.bf16.msrb.mxu1 %v7674_v11  ;;  %v7672_v6 = vld [vmem:[#allocation5 + $0x48] sm:$0xff] }
 0x586   : > { %v4638_v34 = vpop.f32.mrf.mxu2  ;;  %v4542_v46 = vpop.f32.mrf.mxu0 }
 0x587   : > { %v4639_v44 = vadd.f32 %v4638_v34, %v4590_v4  ;;  %4877 = vmatmul.bf16.gmra.mxu3 %v10140_v60  ;;  %v10355_v55 = vpack.c.bf16 %v4925_v19, %v4921_v58  ;;  %v4543_v12 = vadd.f32 %v4542_v46, %v10316_v52  ;;  %v7680_v58 = vld [vmem:[#allocation5 + $0x88] sm:$0xff]  ;;  %v7663_v46 = vld [vmem:[#allocation5] sm:$0xff] }
 0x588   : > { %v4591_v40 = vpop.f32.mrf.mxu1  ;;  %5363 = vmatpush.bf16.msrb.mxu2 %v7680_v58  ;;  %5266 = vmatpush.bf16.msrb.mxu0 %v7663_v46 }
 0x589   : > { %v4592_v62 = vadd.f32 %v4591_v40, %v4543_v12  ;;  %5313 = vmatpush.bf16.msrb.mxu1 %v7673_v39  ;;  %v7679_v12 = vld [vmem:[#allocation5 + $0x80] sm:$0xff] }
 0x58a   : > { %v4682_v42 = vpop.f32.mrf.mxu3 }
 0x58b   : > { %v4683_v22 = vadd.f32 %v4682_v42, %v4634_v18 }
 0x58c   : > { %5364 = vmatpush.bf16.msrb.mxu2 %v7679_v12 }
 0x58d   : > { %v4929_v18 = vmax.f32 %v4683_v22, 0.0  ;;  %5314 = vmatpush.bf16.msrb.mxu1 %v7672_v6 }
 0x58e   : > { %v4640_v56 = vpop.f32.mrf.mxu2  ;;  %v4545_v20 = vpop.f32.mrf.mxu0 }
 0x58f   : > { %v4641_v41 = vadd.f32 %v4640_v56, %v4592_v62  ;;  %v4546_v60 = vadd.f32 %v4545_v20, %v10316_v52 }
 0x590   : > { %v4594_v38 = vpop.f32.mrf.mxu1 }
 0x591   : > { %v4595_v0 = vadd.f32 %v4594_v38, %v4546_v60  ;;  %4740 = vmatmul.bf16.gmra.mxu0 %v10723_v43  ;;  %5315 = vmatpush.bf16.msrb.mxu1 %v7671_v35 }
 0x592   : > { %v4684_v50 = vpop.f32.mrf.mxu3 }
 0x593   : > { %v4685_v16 = vadd.f32 %v4684_v50, %v4636_v49  ;;  %4789 = vmatmul.bf16.gmra.mxu1 %v10724_v26  ;;  %4838 = vmatmul.bf16.gmra.mxu2 %v10067_v10  ;;  %v7689_v10 = vld [vmem:[#allocation5 + $0xd0] sm:$0xff] }
 0x594   : > { %5411 = vmatpush.bf16.msrb.mxu3 %v7689_v10 }
 0x595   : > { %v4933_v31 = vmax.f32 %v4685_v16, 0.0  ;;  %v7688_v16 = vld [vmem:[#allocation5 + $0xc8] sm:$0xff] }
 0x596   : > { %v4643_v13 = vpop.f32.mrf.mxu2  ;;  %v4547_v54 = vpop.f32.mrf.mxu0 }
 0x597   : > { %v4644_v61 = vadd.f32 %v4643_v13, %v4595_v0  ;;  %4882 = vmatmul.bf16.gmra.mxu3 %v10149_v7  ;;  %v10363_v14 = vpack.c.bf16 %v4933_v31, %v4929_v18  ;;  %v4548_v63 = vadd.f32 %v4547_v54, %v10316_v52 }
 0x598   : > { %v4596_v43 = vpop.f32.mrf.mxu1  ;;  %5412 = vmatpush.bf16.msrb.mxu3 %v7688_v16 }
 0x599   : > { %v4597_v26 = vadd.f32 %v4596_v43, %v4548_v63 }
 0x59a   : > { %v4687_v49 = vpop.f32.mrf.mxu3 }
 0x59b   : > { %v4688_v4 = vadd.f32 %v4687_v49, %v4639_v44 }
 0x59d   : > { %v4937_v30 = vmax.f32 %v4688_v4, 0.0 }
 0x59e   : > { %v4645_v7 = vpop.f32.mrf.mxu2  ;;  %v4550_v34 = vpop.f32.mrf.mxu0 }
 0x59f   : > { %v4646_v19 = vadd.f32 %v4645_v7, %v4597_v26  ;;  %v4551_v40 = vadd.f32 %v4550_v34, %v10316_v52 }
 0x5a0   : > { %v4599_v62 = vpop.f32.mrf.mxu1 }
 0x5a1   : > { %v4600_v42 = vadd.f32 %v4599_v62, %v4551_v40  ;;  %4745 = vmatmul.bf16.gmra.mxu0 %v10725_v45 }
 0x5a2   : > { %v4689_v44 = vpop.f32.mrf.mxu3 }
 0x5a3   : > { %v4690_v51 = vadd.f32 %v4689_v44, %v4641_v41  ;;  %4794 = vmatmul.bf16.gmra.mxu1 %v10726_v3  ;;  %4843 = vmatmul.bf16.gmra.mxu2 %v10084_v23 }
 0x5a5   : > { %v4941_v22 = vmax.f32 %v4690_v51, 0.0 }
 0x5a6   : > { %v4648_v11 = vpop.f32.mrf.mxu2  ;;  %v4552_v20 = vpop.f32.mrf.mxu0 }
 0x5a7   : > { %v4649_v56 = vadd.f32 %v4648_v11, %v4600_v42  ;;  %4887 = vmatmul.bf16.gmra.mxu3 %v10158_v9  ;;  %v10371_v60 = vpack.c.bf16 %v4941_v22, %v4937_v30  ;;  %v4553_v38 = vadd.f32 %v4552_v20, %v10316_v52 }
 0x5a8   : > { %v4601_v0 = vpop.f32.mrf.mxu1 }
 0x5a9   : > { %v4602_v50 = vadd.f32 %v4601_v0, %v4553_v38 }
 0x5aa   : > { %v4692_v45 = vpop.f32.mrf.mxu3 }
 0x5ab   : > { %v4693_v41 = vadd.f32 %v4692_v45, %v4644_v61 }
 0x5ad   : > { %v4945_v8 = vmax.f32 %v4693_v41, 0.0 }
 0x5ae   : > { %v4650_v3 = vpop.f32.mrf.mxu2  ;;  %v4555_v23 = vpop.f32.mrf.mxu0 }
 0x5af   : > { %v4651_v18 = vadd.f32 %v4650_v3, %v4602_v50  ;;  %v4556_v31 = vadd.f32 %v4555_v23, %v10316_v52 }
 0x5b0   : > { %v4604_v13 = vpop.f32.mrf.mxu1 }
 0x5b1   : > { %v4605_v54 = vadd.f32 %v4604_v13, %v4556_v31  ;;  %4750 = vmatmul.bf16.gmra.mxu0 %v10727_v21  ;;  %v7687_v21 = vld [vmem:[#allocation5 + $0xc0] sm:$0xff] }
 0x5b2   : > { %v4694_v5 = vpop.f32.mrf.mxu3  ;;  %5413 = vmatpush.bf16.msrb.mxu3 %v7687_v21 }
 0x5b3   : > { %v4695_v9 = vadd.f32 %v4694_v5, %v4646_v19  ;;  %4799 = vmatmul.bf16.gmra.mxu1 %v9774_v1  ;;  %4848 = vmatmul.bf16.gmra.mxu2 %v10101_v24 }
 0x5b5   : > { %v4949_v39 = vmax.f32 %v4695_v9, 0.0 }
 0x5b6   : > { %v4653_v63 = vpop.f32.mrf.mxu2  ;;  %v4557_v43 = vpop.f32.mrf.mxu0 }
 0x5b7   : > { %v4654_v61 = vadd.f32 %v4653_v63, %v4605_v54  ;;  %4892 = vmatmul.bf16.gmra.mxu3 %v10167_v36  ;;  %v10379_v26 = vpack.c.bf16 %v4949_v39, %v4945_v8  ;;  %v4558_v49 = vadd.f32 %v4557_v43, %v10316_v52 }
 0x5b8   : > { %v4606_v10 = vpop.f32.mrf.mxu1 }
 0x5b9   : > { %v4607_v4 = vadd.f32 %v4606_v10, %v4558_v49 }
 0x5ba   : > { %v4697_v2 = vpop.f32.mrf.mxu3 }
 0x5bb   : > { %v4698_v6 = vadd.f32 %v4697_v2, %v4649_v56 }
 0x5bd   : > { %v4953_v36 = vmax.f32 %v4698_v6, 0.0 }
 0x5be   : > { %v4655_v1 = vpop.f32.mrf.mxu2  ;;  %v4716_v24 = vpop.f32.mrf.mxu0 }
 0x5bf   : > { %v4656_v58 = vadd.f32 %v4655_v1, %v4607_v4  ;;  %v10734_v1 = vld [vmem:[#allocation47_spill] sm:$0xff] }
 0x5c0   : > { %v4765_v7 = vpop.f32.mrf.mxu1 }
 0x5c1   : > { %5267 = vmatmul.bf16.vlgmr.msrb.gmra.mxu0 %v10199_v33 }
 0x5c2   : > { %v4699_v19 = vpop.f32.mrf.mxu3 }
 0x5c3   : > { %v4700_v34 = vadd.f32 %v4699_v19, %v4651_v18  ;;  %5316 = vmatmul.bf16.vlgmr.msrb.gmra.mxu1 %v10266_v53  ;;  %5365 = vmatmul.bf16.vlgmr.msrb.gmra.mxu2 %v10338_v28  ;;  %v10392_v28 = vperm.slane %v10313_v27, 3 }
 0x5c5   : > { %v4957_v52 = vmax.f32 %v4700_v34, 0.0  ;;  %v4717_v0 = vadd.f32 %v4716_v24, %v10392_v28  ;;  %v10735_v24 = vld [vmem:[#allocation33_spill] sm:$0xff] }
 0x5c6   : > { %v4814_v46 = vpop.f32.mrf.mxu2  ;;  %v4718_v35 = vpop.f32.mrf.mxu0 }
 0x5c7   : > { %4897 = vmatmul.bf16.gmra.mxu3 %v10185_v25  ;;  %v10386_v12 = vpack.c.bf16 %v4957_v52, %v4953_v36  ;;  %v4766_v45 = vadd.f32 %v4765_v7, %v4717_v0 }
 0x5c8   : > { %v4767_v40 = vpop.f32.mrf.mxu1 }
 0x5ca   : > { %v4702_v62 = vpop.f32.mrf.mxu3 }
 0x5cb   : > { %v4703_v42 = vadd.f32 %v4702_v62, %v4654_v61 }
 0x5cd   : > { %v4961_v25 = vmax.f32 %v4703_v42, 0.0 }
 0x5ce   : > { %v4816_v44 = vpop.f32.mrf.mxu2  ;;  %v4721_v51 = vpop.f32.mrf.mxu0 }
 0x5cf   : > { %v4722_v63 = vadd.f32 %v4721_v51, %v10392_v28 }
 0x5d0   : > { %v4770_v30 = vpop.f32.mrf.mxu1 }
 0x5d1   : > { %5272 = vmatmul.bf16.gmra.mxu0 %v10208_v17  ;;  %v4719_v17 = vadd.f32 %v4718_v35, %v10392_v28  ;;  %v4771_v49 = vadd.f32 %v4770_v30, %v4722_v63 }
 0x5d2   : > { %v4704_v33 = vpop.f32.mrf.mxu3 }
 0x5d3   : > { %v4705_v53 = vadd.f32 %v4704_v33, %v4656_v58  ;;  %5321 = vmatmul.bf16.gmra.mxu1 %v10275_v32  ;;  %5370 = vmatmul.bf16.gmra.mxu2 %v10347_v37  ;;  %v4815_v32 = vadd.f32 %v4814_v46, %v4766_v45  ;;  %v4768_v41 = vadd.f32 %v4767_v40, %v4719_v17 }
 0x5d5   : > { %v4965_v22 = vmax.f32 %v4705_v53, 0.0  ;;  %v4817_v27 = vadd.f32 %v4816_v44, %v4768_v41 }
 0x5d6   : > { %v4819_v11 = vpop.f32.mrf.mxu2  ;;  %v4723_v56 = vpop.f32.mrf.mxu0 }
 0x5d7   : > { %v10394_v20 = vpack.c.bf16 %v4965_v22, %v4961_v25  ;;  %v4724_v43 = vadd.f32 %v4723_v56, %v10392_v28 }
 0x5d8   : > { %v4772_v38 = vpop.f32.mrf.mxu1 }
 0x5d9   : > { %v4773_v4 = vadd.f32 %v4772_v38, %v4724_v43 }
 0x5da   : > { %v4863_v50 = vpop.f32.mrf.mxu3 }
 0x5db   : > { %v4864_v18 = vadd.f32 %v4863_v50, %v4815_v32 }
 0x5dd   : > { %v4906_v13 = vmax.f32 %v4864_v18, 0.0 }
 0x5de   : > { %v4821_v16 = vpop.f32.mrf.mxu2  ;;  %v4726_v37 = vpop.f32.mrf.mxu0 }
 0x5df   : > { %v4822_v21 = vadd.f32 %v4821_v16, %v4773_v4  ;;  %v4727_v35 = vadd.f32 %v4726_v37, %v10392_v28 }
 0x5e0   : > { %v4775_v3 = vpop.f32.mrf.mxu1 }
 0x5e1   : > { %5277 = vmatmul.bf16.gmra.mxu0 %v10216_v29  ;;  %v4820_v29 = vadd.f32 %v4819_v11, %v4771_v49  ;;  %v4776_v42 = vadd.f32 %v4775_v3, %v4727_v35  ;;  %v10736_v11 = vld [vmem:[#allocation25_spill] sm:$0xff] }
 0x5e2   : > { %v4865_v23 = vpop.f32.mrf.mxu3 }
 0x5e3   : > { %v4866_v31 = vadd.f32 %v4865_v23, %v4817_v27  ;;  %5326 = vmatmul.bf16.gmra.mxu1 %v10283_v59  ;;  %5375 = vmatmul.bf16.gmra.mxu2 %v10355_v55 }
 0x5e5   : > { %v4910_v54 = vmax.f32 %v4866_v31, 0.0 }
 0x5e6   : > { %v4824_v5 = vpop.f32.mrf.mxu2  ;;  %v4728_v8 = vpop.f32.mrf.mxu0 }
 0x5e7   : > { %v4970_v9 = vpack.c.bf16 %v4910_v54, %v4906_v13  ;;  %v4729_v62 = vadd.f32 %v4728_v8, %v10392_v28  ;;  %v4825_v51 = vadd.f32 %v4824_v5, %v4776_v42  ;;  %v10737_v5 = vld [vmem:[#allocation27_spill] sm:$0xff] }
 0x5e8   : > { %v4777_v39 = vpop.f32.mrf.mxu1 }
 0x5e9   : > { %5414 = vmatmul.bf16.vlgmr.msrb.gmra.mxu3 %v4970_v9  ;;  %v4778_v30 = vadd.f32 %v4777_v39, %v4729_v62 }
 0x5ea   : > { %v4868_v61 = vpop.f32.mrf.mxu3 }
 0x5eb   : > { %v4869_v55 = vadd.f32 %v4868_v61, %v4820_v29 }
 0x5ed   : > { %v4914_v7 = vmax.f32 %v4869_v55, 0.0 }
 0x5ee   : > { %v4826_v10 = vpop.f32.mrf.mxu2  ;;  %v4731_v2 = vpop.f32.mrf.mxu0 }
 0x5ef   : > { %v4827_v25 = vadd.f32 %v4826_v10, %v4778_v30  ;;  %v4732_v32 = vadd.f32 %v4731_v2, %v10392_v28 }
 0x5f0   : > { %v4780_v59 = vpop.f32.mrf.mxu1 }
 0x5f1   : > { %5282 = vmatmul.bf16.gmra.mxu0 %v10734_v1  ;;  %v4781_v3 = vadd.f32 %v4780_v59, %v4732_v32 }
 0x5f2   : > { %v4870_v6 = vpop.f32.mrf.mxu3 }
 0x5f3   : > { %v4871_v58 = vadd.f32 %v4870_v6, %v4822_v21  ;;  %5331 = vmatmul.bf16.gmra.mxu1 %v10735_v24  ;;  %5380 = vmatmul.bf16.gmra.mxu2 %v10363_v14  ;;  %v10738_v24 = vld [vmem:[#allocation28_spill] sm:$0xff] }
 0x5f5   : > { %v4918_v19 = vmax.f32 %v4871_v58, 0.0 }
 0x5f6   : > { %v4829_v34 = vpop.f32.mrf.mxu2  ;;  %v4733_v36 = vpop.f32.mrf.mxu0 }
 0x5f7   : > { %v4974_v52 = vpack.c.bf16 %v4918_v19, %v4914_v7  ;;  %v4734_v37 = vadd.f32 %v4733_v36, %v10392_v28  ;;  %v4830_v18 = vadd.f32 %v4829_v34, %v4781_v3 }
 0x5f8   : > { %v4782_v46 = vpop.f32.mrf.mxu1 }
 0x5f9   : > { %5419 = vmatmul.bf16.gmra.mxu3 %v4974_v52  ;;  %v4783_v23 = vadd.f32 %v4782_v46, %v4734_v37 }
 0x5fa   : > { %v4873_v40 = vpop.f32.mrf.mxu3 }
 0x5fb   : > { %v4874_v14 = vadd.f32 %v4873_v40, %v4825_v51 }
 0x5fd   : > { %v4922_v38 = vmax.f32 %v4874_v14, 0.0  ;;  %v10739_v14 = vld [vmem:[#allocation12_spill] sm:$0xff] }
 0x5fe   : > { %v4831_v44 = vpop.f32.mrf.mxu2  ;;  %v4736_v33 = vpop.f32.mrf.mxu0 }
 0x5ff   : > { %v4832_v13 = vadd.f32 %v4831_v44, %v4783_v23  ;;  %v4737_v10 = vadd.f32 %v4736_v33, %v10392_v28 }
 0x600   : > { %v4785_v53 = vpop.f32.mrf.mxu1 }
 0x601   : > { %5287 = vmatmul.bf16.gmra.mxu0 %v10736_v11  ;;  %v4786_v2 = vadd.f32 %v4785_v53, %v4737_v10 }
 0x602   : > { %v4875_v22 = vpop.f32.mrf.mxu3 }
 0x603   : > { %v4876_v56 = vadd.f32 %v4875_v22, %v4827_v25  ;;  %5336 = vmatmul.bf16.gmra.mxu1 %v10299_v47  ;;  %5385 = vmatmul.bf16.gmra.mxu2 %v10371_v60 }
 0x605   : > { %v4926_v0 = vmax.f32 %v4876_v56, 0.0 }
 0x606   : > { %v4834_v50 = vpop.f32.mrf.mxu2  ;;  %v4738_v17 = vpop.f32.mrf.mxu0 }
 0x607   : > { %v4978_v45 = vpack.c.bf16 %v4926_v0, %v4922_v38  ;;  %v4739_v4 = vadd.f32 %v4738_v17, %v10392_v28  ;;  %v4835_v21 = vadd.f32 %v4834_v50, %v4786_v2 }
 0x608   : > { %v4787_v16 = vpop.f32.mrf.mxu1 }
 0x609   : > { %5424 = vmatmul.bf16.gmra.mxu3 %v4978_v45  ;;  %v4788_v55 = vadd.f32 %v4787_v16, %v4739_v4 }
 0x60a   : > { %v4878_v41 = vpop.f32.mrf.mxu3 }
 0x60b   : > { %v4879_v60 = vadd.f32 %v4878_v41, %v4830_v18 }
 0x60d   : > { %v4930_v8 = vmax.f32 %v4879_v60, 0.0 }
 0x60e   : > { %v4836_v27 = vpop.f32.mrf.mxu2  ;;  %v4741_v31 = vpop.f32.mrf.mxu0 }
 0x60f   : > { %v4742_v35 = vadd.f32 %v4741_v31, %v10392_v28 }
 0x610   : > { %v4790_v47 = vpop.f32.mrf.mxu1 }
 0x611   : > { %5292 = vmatmul.bf16.gmra.mxu0 %v10737_v5  ;;  %v4791_v44 = vadd.f32 %v4790_v47, %v4742_v35 }
 0x612   : > { %v4880_v54 = vpop.f32.mrf.mxu3 }
 0x613   : > { %v4881_v9 = vadd.f32 %v4880_v54, %v4832_v13  ;;  %5341 = vmatmul.bf16.gmra.mxu1 %v10307_v15  ;;  %5390 = vmatmul.bf16.gmra.mxu2 %v10379_v26  ;;  %v4837_v15 = vadd.f32 %v4836_v27, %v4788_v55 }
 0x615   : > { %v4934_v39 = vmax.f32 %v4881_v9, 0.0 }
 0x616   : > { %v4839_v63 = vpop.f32.mrf.mxu2  ;;  %v4743_v61 = vpop.f32.mrf.mxu0 }
 0x617   : > { %v4982_v43 = vpack.c.bf16 %v4934_v39, %v4930_v8  ;;  %v4744_v62 = vadd.f32 %v4743_v61, %v10392_v28  ;;  %v4840_v30 = vadd.f32 %v4839_v63, %v4791_v44 }
 0x618   : > { %v4792_v49 = vpop.f32.mrf.mxu1 }
 0x619   : > { %5429 = vmatmul.bf16.gmra.mxu3 %v4982_v43  ;;  %v4793_v33 = vadd.f32 %v4792_v49, %v4744_v62 }
 0x61a   : > { %v4883_v29 = vpop.f32.mrf.mxu3 }
 0x61b   : > { %v4884_v1 = vadd.f32 %v4883_v29, %v4835_v21 }
 0x61d   : > { %v4938_v19 = vmax.f32 %v4884_v1, 0.0 }
 0x61e   : > { %v4841_v59 = vpop.f32.mrf.mxu2  ;;  %v4746_v6 = vpop.f32.mrf.mxu0 }
 0x61f   : > { %v4747_v17 = vadd.f32 %v4746_v6, %v10392_v28 }
 0x620   : > { %v4795_v26 = vpop.f32.mrf.mxu1 }
 0x621   : > { %5297 = vmatmul.bf16.gmra.mxu0 %v10738_v24  ;;  %v4796_v41 = vadd.f32 %v4795_v26, %v4747_v17 }
 0x622   : > { %v4885_v58 = vpop.f32.mrf.mxu3 }
 0x623   : > { %v4886_v7 = vadd.f32 %v4885_v58, %v4837_v15  ;;  %5346 = vmatmul.bf16.gmra.mxu1 %v10323_v48  ;;  %5395 = vmatmul.bf16.gmra.mxu2 %v10386_v12  ;;  %v4842_v48 = vadd.f32 %v4841_v59, %v4793_v33 }
 0x625   : > { %v4942_v34 = vmax.f32 %v4886_v7, 0.0 }
 0x626   : > { %v4844_v36 = vpop.f32.mrf.mxu2  ;;  %v4748_v46 = vpop.f32.mrf.mxu0 }
 0x627   : > { %v4986_v52 = vpack.c.bf16 %v4942_v34, %v4938_v19  ;;  %v4749_v32 = vadd.f32 %v4748_v46, %v10392_v28  ;;  %v4845_v37 = vadd.f32 %v4844_v36, %v4796_v41 }
 0x628   : > { %v4797_v42 = vpop.f32.mrf.mxu1 }
 0x629   : > { %5434 = vmatmul.bf16.gmra.mxu3 %v4986_v52  ;;  %v4798_v3 = vadd.f32 %v4797_v42, %v4749_v32 }
 0x62a   : > { %v4888_v40 = vpop.f32.mrf.mxu3 }
 0x62b   : > { %v4889_v25 = vadd.f32 %v4888_v40, %v4840_v30 }
 0x62d   : > { %v4946_v11 = vmax.f32 %v4889_v25, 0.0 }
 0x62e   : > { %v4846_v51 = vpop.f32.mrf.mxu2  ;;  %v4751_v53 = vpop.f32.mrf.mxu0 }
 0x62f   : > { %v4752_v5 = vadd.f32 %v4751_v53, %v10392_v28 }
 0x630   : > { %v4800_v56 = vpop.f32.mrf.mxu1 }
 0x631   : > { %5302 = vmatmul.bf16.gmra.mxu0 %v10739_v14  ;;  %v4801_v61 = vadd.f32 %v4800_v56, %v4752_v5 }
 0x632   : > { %v4890_v12 = vpop.f32.mrf.mxu3 }
 0x633   : > { %v4891_v22 = vadd.f32 %v4890_v12, %v4842_v48  ;;  %5351 = vmatmul.bf16.gmra.mxu1 %v10331_v57  ;;  %5400 = vmatmul.bf16.gmra.mxu2 %v10394_v20  ;;  %v4847_v57 = vadd.f32 %v4846_v51, %v4798_v3 }
 0x635   : > { %v4950_v38 = vmax.f32 %v4891_v22, 0.0 }
 0x636   : > { %v4849_v0 = vpop.f32.mrf.mxu2  ;;  %v4753_v45 = vpop.f32.mrf.mxu0 }
 0x637   : > { %v4990_v50 = vpack.c.bf16 %v4950_v38, %v4946_v11  ;;  %v4754_v63 = vadd.f32 %v4753_v45, %v10392_v28  ;;  %v4850_v49 = vadd.f32 %v4849_v0, %v4801_v61  ;;  %v10433_v28 = vld [vmem:[%s10512_s6] ss:$0 sm:$0xff] }
 0x638   : > { %v4802_v27 = vpop.f32.mrf.mxu1 }
 0x639   : > { %5439 = vmatmul.bf16.gmra.mxu3 %v4990_v50  ;;  %v4803_v10 = vadd.f32 %v4802_v27, %v4754_v63 }
 0x63a   : > { %v4893_v16 = vpop.f32.mrf.mxu3 }
 0x63b   : > { %v4894_v23 = vadd.f32 %v4893_v16, %v4845_v37 }
 0x63d   : > { %v4954_v13 = vmax.f32 %v4894_v23, 0.0 }
 0x63e   : > { %v4851_v18 = vpop.f32.mrf.mxu2  ;;  %v5268_v47 = vpop.f32.mrf.mxu0 }
 0x63f   : > { %v4852_v29 = vadd.f32 %v4851_v18, %v4803_v10  ;;  %v5269_v19 = vadd.f32 %v10433_v28, %v5268_v47 }
 0x640   : > { %v5317_v9 = vpop.f32.mrf.mxu1 }
 0x641   : > { %v5318_v52 = vadd.f32 %v5317_v9, %v5269_v19 }
 0x642   : > { %v4895_v20 = vpop.f32.mrf.mxu3 }
 0x643   : > { %v4896_v31 = vadd.f32 %v4895_v20, %v4847_v57 }
 0x645   : > { %v4958_v60 = vmax.f32 %v4896_v31, 0.0 }
 0x646   : > { %v5366_v8 = vpop.f32.mrf.mxu2  ;;  %v5270_v43 = vpop.f32.mrf.mxu0 }
 0x647   : > { %v4994_v54 = vpack.c.bf16 %v4958_v60, %v4954_v13  ;;  %v5367_v46 = vadd.f32 %v5366_v8, %v5318_v52  ;;  %v5271_v62 = vadd.f32 %v10433_v28, %v5270_v43 }
 0x648   : > { %v5319_v59 = vpop.f32.mrf.mxu1 }
 0x649   : > { %5444 = vmatmul.bf16.gmra.mxu3 %v4994_v54  ;;  %v5320_v51 = vadd.f32 %v5319_v59, %v5271_v62 }
 0x64a   : > { %v4898_v39 = vpop.f32.mrf.mxu3 }
 0x64b   : > { %v4899_v4 = vadd.f32 %v4898_v39, %v4850_v49 }
 0x64d   : > { %v4962_v6 = vmax.f32 %v4899_v4, 0.0 }
 0x64e   : > { %v5368_v55 = vpop.f32.mrf.mxu2  ;;  %v5273_v26 = vpop.f32.mrf.mxu0 }
 0x64f   : > { %v5369_v53 = vadd.f32 %v5368_v55, %v5320_v51  ;;  %v5274_v25 = vadd.f32 %v10433_v28, %v5273_v26 }
 0x650   : > { %v5322_v58 = vpop.f32.mrf.mxu1 }
 0x651   : > { %v5323_v11 = vadd.f32 %v5322_v58, %v5274_v25 }
 0x652   : > { %v4900_v2 = vpop.f32.mrf.mxu3 }
 0x653   : > { %v4901_v21 = vadd.f32 %v4900_v2, %v4852_v29 }
 0x655   : > { %v4966_v15 = vmax.f32 %v4901_v21, 0.0 }
 0x656   : > { %v5371_v24 = vpop.f32.mrf.mxu2  ;;  %v5275_v7 = vpop.f32.mrf.mxu0 }
 0x657   : > { %v4998_v1 = vpack.c.bf16 %v4966_v15, %v4962_v6  ;;  %v5372_v56 = vadd.f32 %v5371_v24, %v5323_v11  ;;  %v5276_v17 = vadd.f32 %v10433_v28, %v5275_v7 }
 0x658   : > { %v5324_v34 = vpop.f32.mrf.mxu1 }
 0x659   : > { %5449 = vmatmul.bf16.gmra.mxu3 %v4998_v1  ;;  %v5325_v41 = vadd.f32 %v5324_v34, %v5276_v17 }
 0x65e   : > { %v5373_v36 = vpop.f32.mrf.mxu2  ;;  %v5278_v35 = vpop.f32.mrf.mxu0 }
 0x65f   : > { %v5374_v37 = vadd.f32 %v5373_v36, %v5325_v41  ;;  %v5279_v27 = vadd.f32 %v10433_v28, %v5278_v35 }
 0x660   : > { %v5327_v30 = vpop.f32.mrf.mxu1 }
 0x661   : > { %v5328_v31 = vadd.f32 %v5327_v30, %v5279_v27 }
 0x666   : > { %v5376_v33 = vpop.f32.mrf.mxu2  ;;  %v5280_v14 = vpop.f32.mrf.mxu0 }
 0x667   : > { %v5377_v13 = vadd.f32 %v5376_v33, %v5328_v31  ;;  %v5281_v54 = vadd.f32 %v10433_v28, %v5280_v14 }
 0x668   : > { %v5329_v38 = vpop.f32.mrf.mxu1 }
 0x669   : > { %v5330_v63 = vadd.f32 %v5329_v38, %v5281_v54 }
 0x66c   : > { %v5415_v40 = vpop.f32.mrf.mxu3 }
 0x66d   : > { %v5416_v42 = vadd.f32 %v5415_v40, %v5367_v46 }
 0x66e   : > { %v5378_v0 = vpop.f32.mrf.mxu2  ;;  %v5283_v32 = vpop.f32.mrf.mxu0 }
 0x66f   : > { %v5455_v44 = vmax.f32 %v5416_v42, 0.0  ;;  %v5379_v61 = vadd.f32 %v5378_v0, %v5330_v63  ;;  %v5284_v10 = vadd.f32 %v10433_v28, %v5283_v32 }
 0x670   : > { %v5332_v18 = vpop.f32.mrf.mxu1 }
 0x671   : > { %5471 = vst [vmem:[%s10440_s20] sm:$0xff] %v5455_v44  ;;  %v5333_v2 = vadd.f32 %v5332_v18, %v5284_v10 }
 0x674   : > { %v5417_v48 = vpop.f32.mrf.mxu3 }
 0x675   : > { %v5418_v12 = vadd.f32 %v5417_v48, %v5369_v53 }
 0x676   : > { %v5381_v23 = vpop.f32.mrf.mxu2  ;;  %v5285_v47 = vpop.f32.mrf.mxu0 }
 0x677   : > { %v5456_v22 = vmax.f32 %v5418_v12, 0.0  ;;  %v5382_v55 = vadd.f32 %v5381_v23, %v5333_v2  ;;  %v5286_v15 = vadd.f32 %v10433_v28, %v5285_v47 }
 0x678   : > { %v5334_v9 = vpop.f32.mrf.mxu1 }
 0x679   : > { %5472 = vst [vmem:[%s10440_s20 + $0x8] sm:$0xff] %v5456_v22  ;;  %v5335_v24 = vadd.f32 %v5334_v9, %v5286_v15 }
 0x67c   : > { %v5420_v50 = vpop.f32.mrf.mxu3 }
 0x67d   : > { %v5421_v45 = vadd.f32 %v5420_v50, %v5372_v56 }
 0x67e   : > { %v5383_v39 = vpop.f32.mrf.mxu2  ;;  %v5288_v43 = vpop.f32.mrf.mxu0 }
 0x67f   : > { %v5457_v16 = vmax.f32 %v5421_v45, 0.0  ;;  %v5384_v7 = vadd.f32 %v5383_v39, %v5335_v24  ;;  %v5289_v52 = vadd.f32 %v10433_v28, %v5288_v43 }
 0x680   : > { %v5337_v59 = vpop.f32.mrf.mxu1 }
 0x681   : > { %5473 = vst [vmem:[%s10440_s20 + $0x10] sm:$0xff] %v5457_v16  ;;  %v5338_v62 = vadd.f32 %v5337_v59, %v5289_v52 }
 0x684   : > { %v5422_v3 = vpop.f32.mrf.mxu3 }
 0x685   : > { %v5423_v57 = vadd.f32 %v5422_v3, %v5374_v37 }
 0x686   : > { %v5386_v21 = vpop.f32.mrf.mxu2  ;;  %v5290_v26 = vpop.f32.mrf.mxu0 }
 0x687   : > { %v5458_v20 = vmax.f32 %v5423_v57, 0.0  ;;  %v5387_v42 = vadd.f32 %v5386_v21, %v5338_v62  ;;  %v5291_v51 = vadd.f32 %v10433_v28, %v5290_v26 }
 0x688   : > { %v5339_v19 = vpop.f32.mrf.mxu1 }
 0x689   : > { %5474 = vst [vmem:[%s10440_s20 + $0x18] sm:$0xff] %v5458_v20  ;;  %v5340_v25 = vadd.f32 %v5339_v19, %v5291_v51 }
 0x68c   : > { %v5425_v60 = vpop.f32.mrf.mxu3 }
 0x68d   : > { %v5426_v5 = vadd.f32 %v5425_v60, %v5377_v13 }
 0x68e   : > { %v5388_v34 = vpop.f32.mrf.mxu2  ;;  %v5293_v40 = vpop.f32.mrf.mxu0 }
 0x68f   : > { %v5459_v8 = vmax.f32 %v5426_v5, 0.0  ;;  %v5389_v14 = vadd.f32 %v5388_v34, %v5340_v25  ;;  %v5294_v11 = vadd.f32 %v10433_v28, %v5293_v40 }
 0x690   : > { %v5342_v30 = vpop.f32.mrf.mxu1 }
 0x691   : > { %5475 = vst [vmem:[%s10440_s20 + $0x20] sm:$0xff] %v5459_v8  ;;  %v5343_v17 = vadd.f32 %v5342_v30, %v5294_v11 }
 0x694   : > { %v5427_v49 = vpop.f32.mrf.mxu3 }
 0x695   : > { %v5428_v29 = vadd.f32 %v5427_v49, %v5379_v61 }
 0x696   : > { %v5391_v53 = vpop.f32.mrf.mxu2  ;;  %v5295_v12 = vpop.f32.mrf.mxu0 }
 0x697   : > { %v5460_v4 = vmax.f32 %v5428_v29, 0.0  ;;  %v5392_v45 = vadd.f32 %v5391_v53, %v5343_v17  ;;  %v5296_v41 = vadd.f32 %v10433_v28, %v5295_v12 }
 0x698   : > { %v5344_v38 = vpop.f32.mrf.mxu1 }
 0x699   : > { %5476 = vst [vmem:[%s10440_s20 + $0x28] sm:$0xff] %v5460_v4  ;;  %v5345_v27 = vadd.f32 %v5344_v38, %v5296_v41 }
 0x69c   : > { %v5430_v6 = vpop.f32.mrf.mxu3 }
 0x69d   : > { %v5431_v1 = vadd.f32 %v5430_v6, %v5382_v55 }
 0x69e   : > { %v5393_v50 = vpop.f32.mrf.mxu2  ;;  %v5298_v16 = vpop.f32.mrf.mxu0 }
 0x69f   : > { %v5461_v58 = vmax.f32 %v5431_v1, 0.0  ;;  %v5394_v23 = vadd.f32 %v5393_v50, %v5345_v27  ;;  %v5299_v31 = vadd.f32 %v10433_v28, %v5298_v16 }
 0x6a0   : > { %v5347_v18 = vpop.f32.mrf.mxu1 }
 0x6a1   : > { %5477 = vst [vmem:[%s10440_s20 + $0x30] sm:$0xff] %v5461_v58  ;;  %v5348_v54 = vadd.f32 %v5347_v18, %v5299_v31 }
 0x6a4   : > { %v5432_v36 = vpop.f32.mrf.mxu3 }
 0x6a5   : > { %v5433_v46 = vadd.f32 %v5432_v36, %v5384_v7 }
 0x6a6   : > { %v5396_v57 = vpop.f32.mrf.mxu2  ;;  %v5300_v13 = vpop.f32.mrf.mxu0 }
 0x6a7   : > { %v5462_v35 = vmax.f32 %v5433_v46, 0.0  ;;  %v5397_v5 = vadd.f32 %v5396_v57, %v5348_v54  ;;  %v5301_v63 = vadd.f32 %v10433_v28, %v5300_v13 }
 0x6a8   : > { %v5349_v9 = vpop.f32.mrf.mxu1 }
 0x6a9   : > { %5478 = vst [vmem:[%s10440_s20 + $0x38] sm:$0xff] %v5462_v35  ;;  %v5350_v10 = vadd.f32 %v5349_v9, %v5301_v63 }
 0x6ac   : > { %v5435_v44 = vpop.f32.mrf.mxu3 }
 0x6ad   : > { %v5436_v33 = vadd.f32 %v5435_v44, %v5387_v42 }
 0x6ae   : > { %v5398_v8 = vpop.f32.mrf.mxu2  ;;  %v5303_v49 = vpop.f32.mrf.mxu0 }
 0x6af   : > { %v5463_v48 = vmax.f32 %v5436_v33, 0.0  ;;  %v5399_v29 = vadd.f32 %v5398_v8, %v5350_v10  ;;  %v5304_v2 = vadd.f32 %v10433_v28, %v5303_v49 }
 0x6b0   : > { %v5352_v21 = vpop.f32.mrf.mxu1 }
 0x6b1   : > { %5479 = vst [vmem:[%s10440_s20 + $0x40] sm:$0xff] %v5463_v48  ;;  %v5353_v15 = vadd.f32 %v5352_v21, %v5304_v2 }
 0x6b4   : > { %v5437_v22 = vpop.f32.mrf.mxu3 }
 0x6b5   : > { %v5438_v56 = vadd.f32 %v5437_v22, %v5389_v14 }
 0x6b6   : > { %v5401_v55 = vpop.f32.mrf.mxu2  ;;  %v5305_v1 = vpop.f32.mrf.mxu0 }
 0x6b7   : > { %v5464_v0 = vmax.f32 %v5438_v56, 0.0  ;;  %v5402_v26 = vadd.f32 %v5401_v55, %v5353_v15  ;;  %v5306_v24 = vadd.f32 %v10433_v28, %v5305_v1 }
 0x6b8   : > { %v5354_v34 = vpop.f32.mrf.mxu1 }
 0x6b9   : > { %5480 = vst [vmem:[%s10440_s20 + $0x48] sm:$0xff] %v5464_v0  ;;  %v5355_v52 = vadd.f32 %v5354_v34, %v5306_v24 }
 0x6bc   : > { %v5440_v32 = vpop.f32.mrf.mxu3 }
 0x6bd   : > { %v5441_v37 = vadd.f32 %v5440_v32, %v5392_v45 }
 0x6be   : > { %v5403_v36 = vpop.f32.mrf.mxu2 }
 0x6bf   : > { %v5465_v3 = vmax.f32 %v5441_v37, 0.0  ;;  %v5404_v46 = vadd.f32 %v5403_v36, %v5355_v52 }
 0x6c1   : > { %5481 = vst [vmem:[%s10440_s20 + $0x50] sm:$0xff] %v5465_v3 }
 0x6c4   : > { %v5442_v20 = vpop.f32.mrf.mxu3 }
 0x6c5   : > { %v5443_v47 = vadd.f32 %v5442_v20, %v5394_v23 }
 0x6c7   : > { %v5466_v60 = vmax.f32 %v5443_v47, 0.0 }
 0x6c9   : > { %5482 = vst [vmem:[%s10440_s20 + $0x58] sm:$0xff] %v5466_v60 }
 0x6cc   : > { %v5445_v39 = vpop.f32.mrf.mxu3 }
 0x6cd   : > { %v5446_v61 = vadd.f32 %v5445_v39, %v5397_v5 }
 0x6cf   : > { %v5467_v43 = vmax.f32 %v5446_v61, 0.0 }
 0x6d1   : > { %5483 = vst [vmem:[%s10440_s20 + $0x60] sm:$0xff] %v5467_v43 }
 0x6d4   : > { %v5447_v4 = vpop.f32.mrf.mxu3 }
 0x6d5   : > { %v5448_v59 = vadd.f32 %v5447_v4, %v5399_v29 }
 0x6d7   : > { %v5468_v6 = vmax.f32 %v5448_v59, 0.0 }
 0x6d9   : > { %5484 = vst [vmem:[%s10440_s20 + $0x68] sm:$0xff] %v5468_v6 }
 0x6dc   : > { %v5450_v58 = vpop.f32.mrf.mxu3 }
 0x6dd   : > { %v5451_v7 = vadd.f32 %v5450_v58, %v5402_v26 }
 0x6df   : > { %v5469_v19 = vmax.f32 %v5451_v7, 0.0 }
 0x6e1   : > { %5485 = vst [vmem:[%s10440_s20 + $0x70] sm:$0xff] %v5469_v19 }
 0x6e4   : > { %v5452_v35 = vpop.f32.mrf.mxu3 }
 0x6e5   : > { %v5453_v40 = vadd.f32 %v5452_v35, %v5404_v46 }
 0x6e7   : > { %v5470_v28 = vmax.f32 %v5453_v40, 0.0 }
 0x6e9   : > { %5486 = vst [vmem:[%s10440_s20 + $0x78] sm:$0xff] %v5470_v28 }
 0x6ea   : > { %7854 = shalt.err (!%p7851_p8)
}
 0x6eb   : > { %s7905_s18 = smov 128   ;;  %s7906_s20 = smov 8  }
 0x6ec   : > { %7705 = dma.vmem_to_hbm [thread:$0]  (%p7985_p5), %s5501_s14, 2048, %s5503_s8, %s5488_s28, %s7905_s18, %s7905_s18, %s7906_s20  }
 0x6ed PF: > { %p7722_p9 = scmp.ge.s32.totalorder %s7897_s27, 2  ;;  %s5517_s23 = sand.u32 1, %s7885_s24  }
 0x6ee   : > { %s5518_s22 = scalar_lea.sflag [#allocation4], %s5517_s23 }
 0x6ef   : > { %p7715_p10 = pnand %p7722_p9, %p7989_p6 }
 0x6f1   : > { %p7716_p11 = pneg %p7715_p10 }
 0x6f3   : > { %7880 = dma.done.wait (%p7716_p11), %s5518_s22, 2048  }
 0x6f4   : > { %7882 = vsyncadd (%p7716_p11), %s5518_s22, 4294965248  ;;  %p19_p12 = scmp.ge.s32.totalorder %s7972_s30, 4   ;;  %s10740_s24 = smov %s7889_s25 }
 0x6f5   : > { %s10741_s25 = smov %s7893_s26  ;;  %s10742_s26 = smov %s7983_s10 }
 0x6f6   : > { %s10743_s27 = smov %s7972_s30  ;;  %21 = sbr.rel (!%p19_p12) target bundleno = 5 (0x5), region = 92 }
 0x6fb   :  { %5524 = vsyncpa [#allocation3], 1 }
 0x6fc   :  { %5526 = vsyncpa [#allocation3 + $0x1], 1 }
 0x6fd   :  { %5527 = vsyncpa [#allocation6], 1 }
 0x6fe   :  { %5528 = vsyncpa [#allocation4], 1 }
 0x6ff   :  { %5530 = vsyncpa [#allocation4 + $0x1], 1 }

</bundles_post_ra>
